<compile_context>
chip_gen: v6e
topology: v6e:2x2x1
jax: 0.10.0
libtpu: 0.0.40
codegen_flags: <defaults>
</compile_context>

<pallas_src>
import functools

import jax
import jax.numpy as jnp
from jax.experimental import pallas as pl
from jax.experimental.pallas import tpu as pltpu

K = 4                 # kernel size of every conv in the module
BN_EPS = 1e-5         # PyTorch BatchNorm2d default eps
LEAKY_SLOPE = 0.2
MAX_TILE_R = 1024     # row-tile upper bound (v5e/v6e sweet spot)
A_TILE_BYTES = 4 * 1024 * 1024   # per-buffer budget for the bf16 patch tile


# ------------------------------- small utils -------------------------------

def _round_up(x, m):
    return (x + m - 1) // m * m


def _cdiv(a, b):
    return (a + b - 1) // b


def _vmem_limit_bytes():
    """~70% of physical per-core VMEM (v7x ~45MiB, v6e/v5e ~90MiB)."""
    try:
        cap = pltpu.get_tpu_info().vmem_capacity_bytes
        return min(int(cap * 0.7), 100 * 1024 * 1024)
    except Exception:
        return 48 * 1024 * 1024


# ----------------------------- Pallas kernels ------------------------------

def _conv_bias_act_kernel(a_ref, w_ref, b_ref, o_ref, *, act):
    """(tile, Kdim)bf16 @ (Kdim, Cout)bf16 -> f32, + bias, optional LeakyReLU."""
    y = jnp.dot(a_ref[...], w_ref[...], preferred_element_type=jnp.float32)
    y = y + b_ref[...]
    if act == "leaky_relu":
        y = jnp.where(y > 0, y, LEAKY_SLOPE * y)
    o_ref[...] = y.astype(o_ref.dtype)


def _conv_stats_kernel(a_ref, w_ref, y_ref, sum_ref, sq_ref):
    """BN pass 1: matmul (conv bias omitted - cancelled by train-mode BN),
    bf16 store of y, and per-tile per-channel sum / sum-of-squares written to
    this tile's own output block (no resident accumulator, so the row-tile
    grid axis stays 'parallel')."""
    y = jnp.dot(a_ref[...], w_ref[...], preferred_element_type=jnp.float32)
    y_ref[...] = y.astype(y_ref.dtype)              # bf16 intermediate
    s = jnp.sum(y, axis=0, keepdims=True)           # (1, Cout) f32
    q = jnp.sum(y * y, axis=0, keepdims=True)       # (1, Cout) f32
    sum_ref[...] = s[None]                          # (1, 1, Cout)
    sq_ref[...] = q[None]                           # (1, 1, Cout)


def _bn_act_kernel(y_ref, scale_ref, shift_ref, o_ref):
    """BN pass 2: y*scale + shift, LeakyReLU(0.2); bf16 in -> bf16 out."""
    z = y_ref[...].astype(jnp.float32) * scale_ref[...] + shift_ref[...]
    o_ref[...] = jnp.where(z > 0, z, LEAKY_SLOPE * z).astype(o_ref.dtype)


# --------------------------- pallas_call wrappers ---------------------------

def _conv_bias_act(a, w, b, *, act, out_dtype, tile):
    rp, kdim = a.shape
    cout = w.shape[1]
    nt = rp // tile
    flops = 2 * rp * kdim * cout
    bytes_accessed = int(a.size * 2 + w.size * 2 + cout * 4 +
                         rp * cout * jnp.dtype(out_dtype).itemsize)
    return pl.pallas_call(
        functools.partial(_conv_bias_act_kernel, act=act),
        out_shape=jax.ShapeDtypeStruct((rp, cout), out_dtype),
        grid=(nt,),
        in_specs=[
            pl.BlockSpec((tile, kdim), lambda i: (i, 0)),
            pl.BlockSpec((kdim, cout), lambda i: (0, 0)),
            pl.BlockSpec((1, cout), lambda i: (0, 0)),
        ],
        out_specs=pl.BlockSpec((tile, cout), lambda i: (i, 0)),
        compiler_params=pltpu.CompilerParams(
            dimension_semantics=("parallel",),
            vmem_limit_bytes=_vmem_limit_bytes()),
        cost_estimate=pl.CostEstimate(flops=flops, transcendentals=0,
                                      bytes_accessed=bytes_accessed),
    )(a, w, b)


def _conv_stats(a, w, *, tile):
    rp, kdim = a.shape
    cout = w.shape[1]
    nt = rp // tile
    flops = 2 * rp * kdim * cout
    bytes_accessed = int(a.size * 2 + w.size * 2 + rp * cout * 2 + 2 * nt * cout * 4)
    return pl.pallas_call(
        _conv_stats_kernel,
        out_shape=(
            jax.ShapeDtypeStruct((rp, cout), jnp.bfloat16),    # bf16 BN intermediate
            jax.ShapeDtypeStruct((nt, 1, cout), jnp.float32),  # per-tile sums
            jax.ShapeDtypeStruct((nt, 1, cout), jnp.float32),  # per-tile sum-of-squares
        ),
        grid=(nt,),
        in_specs=[
            pl.BlockSpec((tile, kdim), lambda i: (i, 0)),
            pl.BlockSpec((kdim, cout), lambda i: (0, 0)),
        ],
        out_specs=(
            pl.BlockSpec((tile, cout), lambda i: (i, 0)),
            pl.BlockSpec((1, 1, cout), lambda i: (i, 0, 0)),
            pl.BlockSpec((1, 1, cout), lambda i: (i, 0, 0)),
        ),
        compiler_params=pltpu.CompilerParams(
            dimension_semantics=("parallel",),   # no cross-tile accumulator
            vmem_limit_bytes=_vmem_limit_bytes()),
        cost_estimate=pl.CostEstimate(flops=flops, transcendentals=0,
                                      bytes_accessed=bytes_accessed),
    )(a, w)


def _bn_act(y, scale, shift, *, tile, out_dtype=jnp.bfloat16):
    rp, cout = y.shape
    nt = rp // tile
    bytes_accessed = int(rp * cout * (2 + jnp.dtype(out_dtype).itemsize) + 2 * cout * 4)
    return pl.pallas_call(
        _bn_act_kernel,
        out_shape=jax.ShapeDtypeStruct((rp, cout), out_dtype),
        grid=(nt,),
        in_specs=[
            pl.BlockSpec((tile, cout), lambda i: (i, 0)),
            pl.BlockSpec((1, cout), lambda i: (0, 0)),
            pl.BlockSpec((1, cout), lambda i: (0, 0)),
        ],
        out_specs=pl.BlockSpec((tile, cout), lambda i: (i, 0)),
        compiler_params=pltpu.CompilerParams(
            dimension_semantics=("parallel",),
            vmem_limit_bytes=_vmem_limit_bytes()),
        cost_estimate=pl.CostEstimate(flops=4 * rp * cout, transcendentals=0,
                                      bytes_accessed=bytes_accessed),
    )(y, scale, shift)


# ------------------------------- JAX glue ----------------------------------

def _im2col(x, stride, pad, cin_pad=None):
    """x: (N, H, W, C) -> patches (N*Ho*Wo, K*K*Cp), column order (kh, kw, c).
    Channel padding (e.g. 6 -> 8 so layer-1 Kdim hits 128) is folded into the
    same jnp.pad as the spatial padding (no extra pass over the patch matrix)."""
    n, h, w, c = x.shape
    cp = c if cin_pad is None else max(c, cin_pad)
    xp = jnp.pad(x, ((0, 0), (pad, pad), (pad, pad), (0, cp - c)))
    ho = (h + 2 * pad - K) // stride + 1
    wo = (w + 2 * pad - K) // stride + 1
    cols = []
    for kh in range(K):
        for kw in range(K):
            cols.append(xp[:, kh:kh + (ho - 1) * stride + 1:stride,
                           kw:kw + (wo - 1) * stride + 1:stride, :])
    a = jnp.concatenate(cols, axis=-1)               # (N, Ho, Wo, K*K*Cp)
    return a.reshape(n * ho * wo, K * K * cp), (n, ho, wo)


def _pack_weight(w_pt, cin_pad=None, cout_pad=None):
    """(Cout, Cin, kH, kW) -> (K*K*Cin_pad, Cout_pad) bf16, (kh, kw, cin) rows."""
    cout, cin = w_pt.shape[0], w_pt.shape[1]
    w = w_pt
    if cin_pad is not None and cin_pad > cin:
        w = jnp.pad(w, ((0, 0), (0, cin_pad - cin), (0, 0), (0, 0)))
    w = jnp.transpose(w, (2, 3, 1, 0)).reshape(K * K * w.shape[1], cout)
    if cout_pad is not None and cout_pad > cout:
        w = jnp.pad(w, ((0, 0), (0, cout_pad - cout)))
    return w.astype(jnp.bfloat16)


def _choose_tiling(r, kdim):
    """Row tile: multiple of 8, bounded by MAX_TILE_R and a per-buffer VMEM
    budget for the bf16 patch tile; total row padding is < 8*nt (not a tile)."""
    budget = max(256, (A_TILE_BYTES // (2 * kdim)) // 8 * 8)
    max_tile = min(MAX_TILE_R, budget)
    nt = max(1, _cdiv(r, max_tile))
    tile = _round_up(_cdiv(r, nt), 8)
    return tile, tile * nt


def _pad_rows(a, rp):
    r = a.shape[0]
    if rp > r:
        a = jnp.pad(a, ((0, rp - r), (0, 0)))
    return a.astype(jnp.bfloat16)


def _conv_lrelu_layer(x, w_pt, bias, *, stride, pad, cin_pad=None, cout_pad=None):
    """Conv2d(k=4) + bias + LeakyReLU(0.2) (no BN).  NHWC bf16 -> NHWC bf16."""
    a, (n, ho, wo) = _im2col(x, stride, pad, cin_pad=cin_pad)
    r, kdim = a.shape
    cout = w_pt.shape[0]
    cp = cout if cout_pad is None else max(cout, cout_pad)   # lane-dense stores
    w = _pack_weight(w_pt, cin_pad=cin_pad, cout_pad=cp)
    b = bias.astype(jnp.float32)
    if cp > cout:
        b = jnp.pad(b, (0, cp - cout))
    tile, rp = _choose_tiling(r, kdim)
    a = _pad_rows(a, rp)
    out = _conv_bias_act(a, w, b.reshape(1, cp), act="leaky_relu",
                         out_dtype=jnp.bfloat16, tile=tile)
    return out[:r, :cout].reshape(n, ho, wo, cout)


def _conv_bn_lrelu_layer(x, w_pt, gamma, beta, *, stride, pad):
    """Conv2d(k=4) + BatchNorm2d (train-mode batch stats) + LeakyReLU(0.2).

    The conv bias is exactly cancelled by the BN batch-mean subtraction in
    training mode, so it is omitted from the matmul (this also keeps zero row
    padding statistics-neutral)."""
    a, (n, ho, wo) = _im2col(x, stride, pad)
    r, kdim = a.shape
    cout = w_pt.shape[0]
    w = _pack_weight(w_pt)
    tile, rp = _choose_tiling(r, kdim)
    a = _pad_rows(a, rp)

    y, sums, sqs = _conv_stats(a, w, tile=tile)

    # Tiny per-channel reduction & epilogue math in f32 (padded rows gave 0).
    # TODO(synk): centered sum-of-squares in pass 2 would be more robust to
    # catastrophic cancellation when |mean| >> std (no extra HBM traffic).
    ssum = jnp.sum(sums, axis=(0, 1))
    ssq = jnp.sum(sqs, axis=(0, 1))
    mean = ssum / r
    var = jnp.maximum(ssq / r - mean * mean, 0.0)    # biased variance
    inv = jax.lax.rsqrt(var + BN_EPS)
    scale = (gamma * inv).reshape(1, cout).astype(jnp.float32)
    shift = (beta - mean * gamma * inv).reshape(1, cout).astype(jnp.float32)

    # TODO(synk): fuse this epilogue into the next layer's in-kernel patch load
    # once im2col moves in-kernel, removing one HBM round trip of y.
    out = _bn_act(y, scale, shift, tile=tile)
    return out[:r].reshape(n, ho, wo, cout)


def _conv_final_layer(x, w_pt, bias, *, stride, pad):
    """Final Conv2d(k=4, s=1, p=1, Cout=1) + bias; Cout lane-padded to 128 for
    the store and sliced here."""
    # TODO(synk): re-express as in-kernel tap accumulation over the 4x4 window
    # reading h3 directly (stride 1), removing the ~16x im2col read blow-up.
    a, (n, ho, wo) = _im2col(x, stride, pad)
    r, kdim = a.shape
    cout = w_pt.shape[0]                      # 1
    cp = _round_up(max(cout, 128), 128)       # lane-dense stores
    w = _pack_weight(w_pt, cout_pad=cp)
    b = jnp.pad(bias.astype(jnp.float32), (0, cp - cout)).reshape(1, cp)
    tile, rp = _choose_tiling(r, kdim)
    a = _pad_rows(a, rp)
    out = _conv_bias_act(a, w, b, act="none", out_dtype=jnp.float32, tile=tile)
    return out[:r, :cout].reshape(n, ho, wo, cout)


# --------------------------- parameters & forward ---------------------------

def init_params(key, in_channels=6, features=64):
    keys = iter(jax.random.split(key, 16))
    f32 = jnp.float32
    p = {}
    # conv1: bias, no BN
    p["c1_w"] = 0.05 * jax.random.normal(next(keys), (features, in_channels, K, K), f32)
    p["c1_b"] = 0.1 * jax.random.normal(next(keys), (features,), f32)
    # conv2 / conv3: BN layers (their PyTorch conv biases are cancelled by BN)
    ch = [(features, features * 2), (features * 2, features * 4)]
    for idx, (ci, co) in zip((2, 3), ch):
        p[f"c{idx}_w"] = 0.05 * jax.random.normal(next(keys), (co, ci, K, K), f32)
        p[f"c{idx}_g"] = 1.0 + 0.1 * jax.random.normal(next(keys), (co,), f32)
        p[f"c{idx}_beta"] = 0.1 * jax.random.normal(next(keys), (co,), f32)
    # conv4: 1-channel patch output, bias, no activation
    p["c4_w"] = 0.05 * jax.random.normal(next(keys), (1, features * 4, K, K), f32)
    p["c4_b"] = 0.1 * jax.random.normal(next(keys), (1,), f32)
    return p


def discriminator_forward(params, x_nchw):
    # NCHW (PyTorch) -> NHWC (kernel layout); bf16 matmul operands, f32 accum.
    x = jnp.transpose(x_nchw, (0, 2, 3, 1)).astype(jnp.bfloat16)
    cin = x.shape[-1]

    h1 = _conv_lrelu_layer(x, params["c1_w"], params["c1_b"], stride=2, pad=1,
                           cin_pad=_round_up(cin, 8),   # Kdim 96 -> 128
                           cout_pad=128)                # lane-dense stores
    h2 = _conv_bn_lrelu_layer(h1, params["c2_w"], params["c2_g"],
                              params["c2_beta"], stride=2, pad=1)
    h3 = _conv_bn_lrelu_layer(h2, params["c3_w"], params["c3_g"],
                              params["c3_beta"], stride=2, pad=1)
    out = _conv_final_layer(h3, params["c4_w"], params["c4_b"], stride=1, pad=1)

    # NHWC -> NCHW
    return jnp.transpose(out, (0, 3, 1, 2)).astype(jnp.float32)


# ---------------------------------- main ------------------------------------

if __name__ == "__main__":
    root = jax.random.PRNGKey(0)
    k_x, k_p = jax.random.split(root)

    # Shapes consistent with the module: N=2, C_in=6 (pix2pix concat), H=W=16.
    x = jax.random.normal(k_x, (2, 6, 16, 16), jnp.float32)
    params = init_params(k_p, in_channels=6, features=64)

    fwd = jax.jit(discriminator_forward)
    out = jax.block_until_ready(fwd(params, x))

    # 16 -> 8 -> 4 -> 2 -> (k4,s1,p1) 1
    assert out.shape == (2, 1, 1, 1), out.shape
    assert out.dtype == jnp.float32
    assert bool(jnp.all(jnp.isfinite(out)))

    print("KERNEL_OK")
</pallas_src>

<mosaic_0001>
module attributes {stable_mosaic.version = 11 : i64} {
  func.func @_conv_bias_act_kernel(%arg0: i32, %arg1: memref<128x128xbf16, #tpu.memory_space<vmem>>, %arg2: memref<128x128xbf16, #tpu.memory_space<vmem>>, %arg3: memref<1x128xf32, #tpu.memory_space<vmem>>, %arg4: memref<128x128xbf16, #tpu.memory_space<vmem>>) attributes {dimension_semantics = [#tpu.dimension_semantics<parallel>], iteration_bounds = array<i64: 1>, scalar_prefetch = 0 : i64, scratch_operands = 0 : i64, tpu.core_type = #tpu.core_type<tc>, window_params = [{transform_indices = @transform_0, window_bounds = array<i64: 128, 128>}, {pipeline_mode = #tpu.pipeline_mode<synchronous>, transform_indices = @transform_1, window_bounds = array<i64: 128, 128>}, {pipeline_mode = #tpu.pipeline_mode<synchronous>, transform_indices = @transform_2, window_bounds = array<i64: 1, 128>}, {transform_indices = @transform_3, window_bounds = array<i64: 128, 128>}]} {
    %c0 = arith.constant 0 : index
    %c0_0 = arith.constant 0 : index
    %0 = vector.load %arg1[%c0, %c0_0] : memref<128x128xbf16, #tpu.memory_space<vmem>>, vector<128x128xbf16>
    %c0_1 = arith.constant 0 : index
    %c0_2 = arith.constant 0 : index
    %1 = vector.load %arg2[%c0_1, %c0_2] : memref<128x128xbf16, #tpu.memory_space<vmem>>, vector<128x128xbf16>
    %cst = arith.constant dense<0.000000e+00> : vector<128x128xf32>
    %2 = tpu.matmul %0, %1, %cst {dimension_numbers = #tpu.dot_dimension_numbers<[1], [0], [0], [1], [0, 0, 1, 1], [], []>} : vector<128x128xbf16>, vector<128x128xbf16>, vector<128x128xf32> -> vector<128x128xf32>
    %c0_3 = arith.constant 0 : index
    %c0_4 = arith.constant 0 : index
    %3 = vector.load %arg3[%c0_3, %c0_4] : memref<1x128xf32, #tpu.memory_space<vmem>>, vector<1x128xf32>
    %4 = vector.broadcast %3 : vector<1x128xf32> to vector<128x128xf32>
    %5 = arith.addf %2, %4 : vector<128x128xf32>
    %cst_5 = arith.constant 0.000000e+00 : f32
    %6 = vector.broadcast %cst_5 : f32 to vector<128x128xf32>
    %7 = arith.cmpf ogt, %5, %6 : vector<128x128xf32>
    %cst_6 = arith.constant 2.000000e-01 : f32
    %8 = vector.broadcast %cst_6 : f32 to vector<128x128xf32>
    %9 = arith.mulf %8, %5 : vector<128x128xf32>
    %10 = arith.select %7, %5, %9 : vector<128x128xi1>, vector<128x128xf32>
    %11 = arith.truncf %10 : vector<128x128xf32> to vector<128x128xbf16>
    %c0_7 = arith.constant 0 : index
    %c0_8 = arith.constant 0 : index
    %12 = vector.load %arg4[%c0_7, %c0_8] : memref<128x128xbf16, #tpu.memory_space<vmem>>, vector<128x128xbf16>
    tpu.vector_store %arg4[%c0_7, %c0_8], %11 {strides = array<i32>} : memref<128x128xbf16, #tpu.memory_space<vmem>>, vector<128x128xbf16>,
    return
  }
  func.func @transform_0(%arg0: i32) -> (i32, i32) {
    %c0_i32 = arith.constant 0 : i32
    %c0_i32_0 = arith.constant 0 : i32
    return %arg0, %c0_i32 : i32, i32
  }
  func.func @transform_1(%arg0: i32) -> (i32, i32) {
    %c0_i32 = arith.constant 0 : i32
    %c0_i32_0 = arith.constant 0 : i32
    %c0_i32_1 = arith.constant 0 : i32
    return %c0_i32, %c0_i32_0 : i32, i32
  }
  func.func @transform_2(%arg0: i32) -> (i32, i32) {
    %c0_i32 = arith.constant 0 : i32
    %c0_i32_0 = arith.constant 0 : i32
    %c0_i32_1 = arith.constant 0 : i32
    return %c0_i32, %c0_i32_0 : i32, i32
  }
  func.func @transform_3(%arg0: i32) -> (i32, i32) {
    %c0_i32 = arith.constant 0 : i32
    %c0_i32_0 = arith.constant 0 : i32
    return %arg0, %c0_i32 : i32, i32
  }
}

module attributes {stable_mosaic.version = 11 : i64} {
  func.func @_conv_stats_kernel(%arg0: i32, %arg1: memref<32x1024xbf16, #tpu.memory_space<vmem>>, %arg2: memref<1024x128xbf16, #tpu.memory_space<vmem>>, %arg3: memref<32x128xbf16, #tpu.memory_space<vmem>>, %arg4: memref<1x1x128xf32, #tpu.memory_space<vmem>>, %arg5: memref<1x1x128xf32, #tpu.memory_space<vmem>>) attributes {dimension_semantics = [#tpu.dimension_semantics<parallel>], iteration_bounds = array<i64: 1>, scalar_prefetch = 0 : i64, scratch_operands = 0 : i64, tpu.core_type = #tpu.core_type<tc>, window_params = [{transform_indices = @transform_0, window_bounds = array<i64: 32, 1024>}, {pipeline_mode = #tpu.pipeline_mode<synchronous>, transform_indices = @transform_1, window_bounds = array<i64: 1024, 128>}, {transform_indices = @transform_2, window_bounds = array<i64: 32, 128>}, {transform_indices = @transform_3, window_bounds = array<i64: 1, 1, 128>}, {transform_indices = @transform_4, window_bounds = array<i64: 1, 1, 128>}]} {
    %c0 = arith.constant 0 : index
    %c0_0 = arith.constant 0 : index
    %0 = vector.load %arg1[%c0, %c0_0] : memref<32x1024xbf16, #tpu.memory_space<vmem>>, vector<32x1024xbf16>
    %c0_1 = arith.constant 0 : index
    %c0_2 = arith.constant 0 : index
    %1 = vector.load %arg2[%c0_1, %c0_2] : memref<1024x128xbf16, #tpu.memory_space<vmem>>, vector<1024x128xbf16>
    %cst = arith.constant dense<0.000000e+00> : vector<32x128xf32>
    %2 = tpu.matmul %0, %1, %cst {dimension_numbers = #tpu.dot_dimension_numbers<[1], [0], [0], [1], [0, 0, 1, 1], [], []>} : vector<32x1024xbf16>, vector<1024x128xbf16>, vector<32x128xf32> -> vector<32x128xf32>
    %3 = arith.truncf %2 : vector<32x128xf32> to vector<32x128xbf16>
    %c0_3 = arith.constant 0 : index
    %c0_4 = arith.constant 0 : index
    %4 = vector.load %arg3[%c0_3, %c0_4] : memref<32x128xbf16, #tpu.memory_space<vmem>>, vector<32x128xbf16>
    tpu.vector_store %arg3[%c0_3, %c0_4], %3 {strides = array<i32>} : memref<32x128xbf16, #tpu.memory_space<vmem>>, vector<32x128xbf16>,
    %cst_5 = arith.constant dense<0.000000e+00> : vector<128xf32>
    %5 = vector.multi_reduction <add>, %2, %cst_5 [0] : vector<32x128xf32> to vector<128xf32>
    %6 = vector.shape_cast %5 : vector<128xf32> to vector<1x128xf32>
    %7 = arith.mulf %2, %2 : vector<32x128xf32>
    %cst_6 = arith.constant dense<0.000000e+00> : vector<128xf32>
    %8 = vector.multi_reduction <add>, %7, %cst_6 [0] : vector<32x128xf32> to vector<128xf32>
    %9 = vector.shape_cast %8 : vector<128xf32> to vector<1x128xf32>
    %10 = vector.shape_cast %6 : vector<1x128xf32> to vector<1x1x128xf32>
    %c0_7 = arith.constant 0 : index
    %c0_8 = arith.constant 0 : index
    %c0_9 = arith.constant 0 : index
    %11 = vector.load %arg4[%c0_7, %c0_8, %c0_9] : memref<1x1x128xf32, #tpu.memory_space<vmem>>, vector<1x1x128xf32>
    tpu.vector_store %arg4[%c0_7, %c0_8, %c0_9], %10 {strides = array<i32>} : memref<1x1x128xf32, #tpu.memory_space<vmem>>, vector<1x1x128xf32>,
    %12 = vector.shape_cast %9 : vector<1x128xf32> to vector<1x1x128xf32>
    %c0_10 = arith.constant 0 : index
    %c0_11 = arith.constant 0 : index
    %c0_12 = arith.constant 0 : index
    %13 = vector.load %arg5[%c0_10, %c0_11, %c0_12] : memref<1x1x128xf32, #tpu.memory_space<vmem>>, vector<1x1x128xf32>
    tpu.vector_store %arg5[%c0_10, %c0_11, %c0_12], %12 {strides = array<i32>} : memref<1x1x128xf32, #tpu.memory_space<vmem>>, vector<1x1x128xf32>,
    return
  }
  func.func @transform_0(%arg0: i32) -> (i32, i32) {
    %c0_i32 = arith.constant 0 : i32
    %c0_i32_0 = arith.constant 0 : i32
    return %arg0, %c0_i32 : i32, i32
  }
  func.func @transform_1(%arg0: i32) -> (i32, i32) {
    %c0_i32 = arith.constant 0 : i32
    %c0_i32_0 = arith.constant 0 : i32
    %c0_i32_1 = arith.constant 0 : i32
    return %c0_i32, %c0_i32_0 : i32, i32
  }
  func.func @transform_2(%arg0: i32) -> (i32, i32) {
    %c0_i32 = arith.constant 0 : i32
    %c0_i32_0 = arith.constant 0 : i32
    return %arg0, %c0_i32 : i32, i32
  }
  func.func @transform_3(%arg0: i32) -> (i32, i32, i32) {
    %c0_i32 = arith.constant 0 : i32
    %c0_i32_0 = arith.constant 0 : i32
    %c0_i32_1 = arith.constant 0 : i32
    return %arg0, %c0_i32, %c0_i32_0 : i32, i32, i32
  }
  func.func @transform_4(%arg0: i32) -> (i32, i32, i32) {
    %c0_i32 = arith.constant 0 : i32
    %c0_i32_0 = arith.constant 0 : i32
    %c0_i32_1 = arith.constant 0 : i32
    return %arg0, %c0_i32, %c0_i32_0 : i32, i32, i32
  }
}

module attributes {stable_mosaic.version = 11 : i64} {
  func.func @_bn_act_kernel(%arg0: i32, %arg1: memref<32x128xbf16, #tpu.memory_space<vmem>>, %arg2: memref<1x128xf32, #tpu.memory_space<vmem>>, %arg3: memref<1x128xf32, #tpu.memory_space<vmem>>, %arg4: memref<32x128xbf16, #tpu.memory_space<vmem>>) attributes {dimension_semantics = [#tpu.dimension_semantics<parallel>], iteration_bounds = array<i64: 1>, scalar_prefetch = 0 : i64, scratch_operands = 0 : i64, tpu.core_type = #tpu.core_type<tc>, window_params = [{transform_indices = @transform_0, window_bounds = array<i64: 32, 128>}, {pipeline_mode = #tpu.pipeline_mode<synchronous>, transform_indices = @transform_1, window_bounds = array<i64: 1, 128>}, {pipeline_mode = #tpu.pipeline_mode<synchronous>, transform_indices = @transform_2, window_bounds = array<i64: 1, 128>}, {transform_indices = @transform_3, window_bounds = array<i64: 32, 128>}]} {
    %c0 = arith.constant 0 : index
    %c0_0 = arith.constant 0 : index
    %0 = vector.load %arg1[%c0, %c0_0] : memref<32x128xbf16, #tpu.memory_space<vmem>>, vector<32x128xbf16>
    %1 = arith.extf %0 : vector<32x128xbf16> to vector<32x128xf32>
    %c0_1 = arith.constant 0 : index
    %c0_2 = arith.constant 0 : index
    %2 = vector.load %arg2[%c0_1, %c0_2] : memref<1x128xf32, #tpu.memory_space<vmem>>, vector<1x128xf32>
    %3 = vector.broadcast %2 : vector<1x128xf32> to vector<32x128xf32>
    %4 = arith.mulf %1, %3 : vector<32x128xf32>
    %c0_3 = arith.constant 0 : index
    %c0_4 = arith.constant 0 : index
    %5 = vector.load %arg3[%c0_3, %c0_4] : memref<1x128xf32, #tpu.memory_space<vmem>>, vector<1x128xf32>
    %6 = vector.broadcast %5 : vector<1x128xf32> to vector<32x128xf32>
    %7 = arith.addf %4, %6 : vector<32x128xf32>
    %cst = arith.constant 0.000000e+00 : f32
    %8 = vector.broadcast %cst : f32 to vector<32x128xf32>
    %9 = arith.cmpf ogt, %7, %8 : vector<32x128xf32>
    %cst_5 = arith.constant 2.000000e-01 : f32
    %10 = vector.broadcast %cst_5 : f32 to vector<32x128xf32>
    %11 = arith.mulf %10, %7 : vector<32x128xf32>
    %12 = arith.select %9, %7, %11 : vector<32x128xi1>, vector<32x128xf32>
    %13 = arith.truncf %12 : vector<32x128xf32> to vector<32x128xbf16>
    %c0_6 = arith.constant 0 : index
    %c0_7 = arith.constant 0 : index
    %14 = vector.load %arg4[%c0_6, %c0_7] : memref<32x128xbf16, #tpu.memory_space<vmem>>, vector<32x128xbf16>
    tpu.vector_store %arg4[%c0_6, %c0_7], %13 {strides = array<i32>} : memref<32x128xbf16, #tpu.memory_space<vmem>>, vector<32x128xbf16>,
    return
  }
  func.func @transform_0(%arg0: i32) -> (i32, i32) {
    %c0_i32 = arith.constant 0 : i32
    %c0_i32_0 = arith.constant 0 : i32
    return %arg0, %c0_i32 : i32, i32
  }
  func.func @transform_1(%arg0: i32) -> (i32, i32) {
    %c0_i32 = arith.constant 0 : i32
    %c0_i32_0 = arith.constant 0 : i32
    %c0_i32_1 = arith.constant 0 : i32
    return %c0_i32, %c0_i32_0 : i32, i32
  }
  func.func @transform_2(%arg0: i32) -> (i32, i32) {
    %c0_i32 = arith.constant 0 : i32
    %c0_i32_0 = arith.constant 0 : i32
    %c0_i32_1 = arith.constant 0 : i32
    return %c0_i32, %c0_i32_0 : i32, i32
  }
  func.func @transform_3(%arg0: i32) -> (i32, i32) {
    %c0_i32 = arith.constant 0 : i32
    %c0_i32_0 = arith.constant 0 : i32
    return %arg0, %c0_i32 : i32, i32
  }
}

module attributes {stable_mosaic.version = 11 : i64} {
  func.func @_conv_stats_kernel(%arg0: i32, %arg1: memref<8x2048xbf16, #tpu.memory_space<vmem>>, %arg2: memref<2048x256xbf16, #tpu.memory_space<vmem>>, %arg3: memref<8x256xbf16, #tpu.memory_space<vmem>>, %arg4: memref<1x1x256xf32, #tpu.memory_space<vmem>>, %arg5: memref<1x1x256xf32, #tpu.memory_space<vmem>>) attributes {dimension_semantics = [#tpu.dimension_semantics<parallel>], iteration_bounds = array<i64: 1>, scalar_prefetch = 0 : i64, scratch_operands = 0 : i64, tpu.core_type = #tpu.core_type<tc>, window_params = [{transform_indices = @transform_0, window_bounds = array<i64: 8, 2048>}, {pipeline_mode = #tpu.pipeline_mode<synchronous>, transform_indices = @transform_1, window_bounds = array<i64: 2048, 256>}, {transform_indices = @transform_2, window_bounds = array<i64: 8, 256>}, {transform_indices = @transform_3, window_bounds = array<i64: 1, 1, 256>}, {transform_indices = @transform_4, window_bounds = array<i64: 1, 1, 256>}]} {
    %c0 = arith.constant 0 : index
    %c0_0 = arith.constant 0 : index
    %0 = vector.load %arg1[%c0, %c0_0] : memref<8x2048xbf16, #tpu.memory_space<vmem>>, vector<8x2048xbf16>
    %c0_1 = arith.constant 0 : index
    %c0_2 = arith.constant 0 : index
    %1 = vector.load %arg2[%c0_1, %c0_2] : memref<2048x256xbf16, #tpu.memory_space<vmem>>, vector<2048x256xbf16>
    %cst = arith.constant dense<0.000000e+00> : vector<8x256xf32>
    %2 = tpu.matmul %0, %1, %cst {dimension_numbers = #tpu.dot_dimension_numbers<[1], [0], [0], [1], [0, 0, 1, 1], [], []>} : vector<8x2048xbf16>, vector<2048x256xbf16>, vector<8x256xf32> -> vector<8x256xf32>
    %3 = arith.truncf %2 : vector<8x256xf32> to vector<8x256xbf16>
    %c0_3 = arith.constant 0 : index
    %c0_4 = arith.constant 0 : index
    %4 = vector.load %arg3[%c0_3, %c0_4] : memref<8x256xbf16, #tpu.memory_space<vmem>>, vector<8x256xbf16>
    tpu.vector_store %arg3[%c0_3, %c0_4], %3 {strides = array<i32>} : memref<8x256xbf16, #tpu.memory_space<vmem>>, vector<8x256xbf16>,
    %cst_5 = arith.constant dense<0.000000e+00> : vector<256xf32>
    %5 = vector.multi_reduction <add>, %2, %cst_5 [0] : vector<8x256xf32> to vector<256xf32>
    %6 = vector.shape_cast %5 : vector<256xf32> to vector<1x256xf32>
    %7 = arith.mulf %2, %2 : vector<8x256xf32>
    %cst_6 = arith.constant dense<0.000000e+00> : vector<256xf32>
    %8 = vector.multi_reduction <add>, %7, %cst_6 [0] : vector<8x256xf32> to vector<256xf32>
    %9 = vector.shape_cast %8 : vector<256xf32> to vector<1x256xf32>
    %10 = vector.shape_cast %6 : vector<1x256xf32> to vector<1x1x256xf32>
    %c0_7 = arith.constant 0 : index
    %c0_8 = arith.constant 0 : index
    %c0_9 = arith.constant 0 : index
    %11 = vector.load %arg4[%c0_7, %c0_8, %c0_9] : memref<1x1x256xf32, #tpu.memory_space<vmem>>, vector<1x1x256xf32>
    tpu.vector_store %arg4[%c0_7, %c0_8, %c0_9], %10 {strides = array<i32>} : memref<1x1x256xf32, #tpu.memory_space<vmem>>, vector<1x1x256xf32>,
    %12 = vector.shape_cast %9 : vector<1x256xf32> to vector<1x1x256xf32>
    %c0_10 = arith.constant 0 : index
    %c0_11 = arith.constant 0 : index
    %c0_12 = arith.constant 0 : index
    %13 = vector.load %arg5[%c0_10, %c0_11, %c0_12] : memref<1x1x256xf32, #tpu.memory_space<vmem>>, vector<1x1x256xf32>
    tpu.vector_store %arg5[%c0_10, %c0_11, %c0_12], %12 {strides = array<i32>} : memref<1x1x256xf32, #tpu.memory_space<vmem>>, vector<1x1x256xf32>,
    return
  }
  func.func @transform_0(%arg0: i32) -> (i32, i32) {
    %c0_i32 = arith.constant 0 : i32
    %c0_i32_0 = arith.constant 0 : i32
    return %arg0, %c0_i32 : i32, i32
  }
  func.func @transform_1(%arg0: i32) -> (i32, i32) {
    %c0_i32 = arith.constant 0 : i32
    %c0_i32_0 = arith.constant 0 : i32
    %c0_i32_1 = arith.constant 0 : i32
    return %c0_i32, %c0_i32_0 : i32, i32
  }
  func.func @transform_2(%arg0: i32) -> (i32, i32) {
    %c0_i32 = arith.constant 0 : i32
    %c0_i32_0 = arith.constant 0 : i32
    return %arg0, %c0_i32 : i32, i32
  }
  func.func @transform_3(%arg0: i32) -> (i32, i32, i32) {
    %c0_i32 = arith.constant 0 : i32
    %c0_i32_0 = arith.constant 0 : i32
    %c0_i32_1 = arith.constant 0 : i32
    return %arg0, %c0_i32, %c0_i32_0 : i32, i32, i32
  }
  func.func @transform_4(%arg0: i32) -> (i32, i32, i32) {
    %c0_i32 = arith.constant 0 : i32
    %c0_i32_0 = arith.constant 0 : i32
    %c0_i32_1 = arith.constant 0 : i32
    return %arg0, %c0_i32, %c0_i32_0 : i32, i32, i32
  }
}

module attributes {stable_mosaic.version = 11 : i64} {
  func.func @_bn_act_kernel(%arg0: i32, %arg1: memref<8x256xbf16, #tpu.memory_space<vmem>>, %arg2: memref<1x256xf32, #tpu.memory_space<vmem>>, %arg3: memref<1x256xf32, #tpu.memory_space<vmem>>, %arg4: memref<8x256xbf16, #tpu.memory_space<vmem>>) attributes {dimension_semantics = [#tpu.dimension_semantics<parallel>], iteration_bounds = array<i64: 1>, scalar_prefetch = 0 : i64, scratch_operands = 0 : i64, tpu.core_type = #tpu.core_type<tc>, window_params = [{transform_indices = @transform_0, window_bounds = array<i64: 8, 256>}, {pipeline_mode = #tpu.pipeline_mode<synchronous>, transform_indices = @transform_1, window_bounds = array<i64: 1, 256>}, {pipeline_mode = #tpu.pipeline_mode<synchronous>, transform_indices = @transform_2, window_bounds = array<i64: 1, 256>}, {transform_indices = @transform_3, window_bounds = array<i64: 8, 256>}]} {
    %c0 = arith.constant 0 : index
    %c0_0 = arith.constant 0 : index
    %0 = vector.load %arg1[%c0, %c0_0] : memref<8x256xbf16, #tpu.memory_space<vmem>>, vector<8x256xbf16>
    %1 = arith.extf %0 : vector<8x256xbf16> to vector<8x256xf32>
    %c0_1 = arith.constant 0 : index
    %c0_2 = arith.constant 0 : index
    %2 = vector.load %arg2[%c0_1, %c0_2] : memref<1x256xf32, #tpu.memory_space<vmem>>, vector<1x256xf32>
    %3 = vector.broadcast %2 : vector<1x256xf32> to vector<8x256xf32>
    %4 = arith.mulf %1, %3 : vector<8x256xf32>
    %c0_3 = arith.constant 0 : index
    %c0_4 = arith.constant 0 : index
    %5 = vector.load %arg3[%c0_3, %c0_4] : memref<1x256xf32, #tpu.memory_space<vmem>>, vector<1x256xf32>
    %6 = vector.broadcast %5 : vector<1x256xf32> to vector<8x256xf32>
    %7 = arith.addf %4, %6 : vector<8x256xf32>
    %cst = arith.constant 0.000000e+00 : f32
    %8 = vector.broadcast %cst : f32 to vector<8x256xf32>
    %9 = arith.cmpf ogt, %7, %8 : vector<8x256xf32>
    %cst_5 = arith.constant 2.000000e-01 : f32
    %10 = vector.broadcast %cst_5 : f32 to vector<8x256xf32>
    %11 = arith.mulf %10, %7 : vector<8x256xf32>
    %12 = arith.select %9, %7, %11 : vector<8x256xi1>, vector<8x256xf32>
    %13 = arith.truncf %12 : vector<8x256xf32> to vector<8x256xbf16>
    %c0_6 = arith.constant 0 : index
    %c0_7 = arith.constant 0 : index
    %14 = vector.load %arg4[%c0_6, %c0_7] : memref<8x256xbf16, #tpu.memory_space<vmem>>, vector<8x256xbf16>
    tpu.vector_store %arg4[%c0_6, %c0_7], %13 {strides = array<i32>} : memref<8x256xbf16, #tpu.memory_space<vmem>>, vector<8x256xbf16>,
    return
  }
  func.func @transform_0(%arg0: i32) -> (i32, i32) {
    %c0_i32 = arith.constant 0 : i32
    %c0_i32_0 = arith.constant 0 : i32
    return %arg0, %c0_i32 : i32, i32
  }
  func.func @transform_1(%arg0: i32) -> (i32, i32) {
    %c0_i32 = arith.constant 0 : i32
    %c0_i32_0 = arith.constant 0 : i32
    %c0_i32_1 = arith.constant 0 : i32
    return %c0_i32, %c0_i32_0 : i32, i32
  }
  func.func @transform_2(%arg0: i32) -> (i32, i32) {
    %c0_i32 = arith.constant 0 : i32
    %c0_i32_0 = arith.constant 0 : i32
    %c0_i32_1 = arith.constant 0 : i32
    return %c0_i32, %c0_i32_0 : i32, i32
  }
  func.func @transform_3(%arg0: i32) -> (i32, i32) {
    %c0_i32 = arith.constant 0 : i32
    %c0_i32_0 = arith.constant 0 : i32
    return %arg0, %c0_i32 : i32, i32
  }
}

module attributes {stable_mosaic.version = 11 : i64} {
  func.func @_conv_bias_act_kernel(%arg0: i32, %arg1: memref<8x4096xbf16, #tpu.memory_space<vmem>>, %arg2: memref<4096x128xbf16, #tpu.memory_space<vmem>>, %arg3: memref<1x128xf32, #tpu.memory_space<vmem>>, %arg4: memref<8x128xf32, #tpu.memory_space<vmem>>) attributes {dimension_semantics = [#tpu.dimension_semantics<parallel>], iteration_bounds = array<i64: 1>, scalar_prefetch = 0 : i64, scratch_operands = 0 : i64, tpu.core_type = #tpu.core_type<tc>, window_params = [{transform_indices = @transform_0, window_bounds = array<i64: 8, 4096>}, {pipeline_mode = #tpu.pipeline_mode<synchronous>, transform_indices = @transform_1, window_bounds = array<i64: 4096, 128>}, {pipeline_mode = #tpu.pipeline_mode<synchronous>, transform_indices = @transform_2, window_bounds = array<i64: 1, 128>}, {transform_indices = @transform_3, window_bounds = array<i64: 8, 128>}]} {
    %c0 = arith.constant 0 : index
    %c0_0 = arith.constant 0 : index
    %0 = vector.load %arg1[%c0, %c0_0] : memref<8x4096xbf16, #tpu.memory_space<vmem>>, vector<8x4096xbf16>
    %c0_1 = arith.constant 0 : index
    %c0_2 = arith.constant 0 : index
    %1 = vector.load %arg2[%c0_1, %c0_2] : memref<4096x128xbf16, #tpu.memory_space<vmem>>, vector<4096x128xbf16>
    %cst = arith.constant dense<0.000000e+00> : vector<8x128xf32>
    %2 = tpu.matmul %0, %1, %cst {dimension_numbers = #tpu.dot_dimension_numbers<[1], [0], [0], [1], [0, 0, 1, 1], [], []>} : vector<8x4096xbf16>, vector<4096x128xbf16>, vector<8x128xf32> -> vector<8x128xf32>
    %c0_3 = arith.constant 0 : index
    %c0_4 = arith.constant 0 : index
    %3 = vector.load %arg3[%c0_3, %c0_4] : memref<1x128xf32, #tpu.memory_space<vmem>>, vector<1x128xf32>
    %4 = vector.broadcast %3 : vector<1x128xf32> to vector<8x128xf32>
    %5 = arith.addf %2, %4 : vector<8x128xf32>
    %c0_5 = arith.constant 0 : index
    %c0_6 = arith.constant 0 : index
    %6 = vector.load %arg4[%c0_5, %c0_6] : memref<8x128xf32, #tpu.memory_space<vmem>>, vector<8x128xf32>
    tpu.vector_store %arg4[%c0_5, %c0_6], %5 {strides = array<i32>} : memref<8x128xf32, #tpu.memory_space<vmem>>, vector<8x128xf32>,
    return
  }
  func.func @transform_0(%arg0: i32) -> (i32, i32) {
    %c0_i32 = arith.constant 0 : i32
    %c0_i32_0 = arith.constant 0 : i32
    return %arg0, %c0_i32 : i32, i32
  }
  func.func @transform_1(%arg0: i32) -> (i32, i32) {
    %c0_i32 = arith.constant 0 : i32
    %c0_i32_0 = arith.constant 0 : i32
    %c0_i32_1 = arith.constant 0 : i32
    return %c0_i32, %c0_i32_0 : i32, i32
  }
  func.func @transform_2(%arg0: i32) -> (i32, i32) {
    %c0_i32 = arith.constant 0 : i32
    %c0_i32_0 = arith.constant 0 : i32
    %c0_i32_1 = arith.constant 0 : i32
    return %c0_i32, %c0_i32_0 : i32, i32
  }
  func.func @transform_3(%arg0: i32) -> (i32, i32) {
    %c0_i32 = arith.constant 0 : i32
    %c0_i32_0 = arith.constant 0 : i32
    return %arg0, %c0_i32 : i32, i32
  }
}

</mosaic_0001>

<bundles_post_ra>
// kernel: discriminator_forward.6
= control target key start
LH: loop header
LB: loop body
LE: loop exit
PB: predicated region body
PF: predicated region fallthrough
CT: control target
= control target key end

     0   :  { %s674_s1 = inlined_call_operand.vmem [shape: bf16[128,128], index: 1, kind: input, shape index: {}]   ;;  %s675_s0 = inlined_call_operand.vmem [shape: bf16[128,128], index: 0, kind: input, shape index: {}]   ;;  %s676_s2 = inlined_call_operand.vmem [shape: f32[1,128], index: 2, kind: input, shape index: {}]   ;;  %s677_s3 = inlined_call_operand.vmem [shape: bf16[128,128], index: 3, kind: output, shape index: {}]  }
   0x1   :  { %v539_v0 = vld [vmem:[%s674_s1 + $0x38] sm:$0xff]   ;;  %v540_v1 = vld [vmem:[%s674_s1 + $0x30] sm:$0xff]   ;;  %v541_v2 = vld [vmem:[%s674_s1 + $0x28] sm:$0xff]  }
   0x2   :  { %491 = vmatprep.subr.bf16.mxu0 %v539_v0  ;;  %523 = vmatprep.subr.bf16.mxu1 %v539_v0  ;;  %v542_v3 = vld [vmem:[%s674_s1 + $0x20] sm:$0xff]   ;;  %v543_v6 = vld [vmem:[%s674_s1 + $0x18] sm:$0xff]   ;;  %v544_v7 = vld [vmem:[%s674_s1 + $0x10] sm:$0xff]  }
   0x3   :  { %492 = vmatpush3.bf16.msra.mxu0 %v539_v0  ;;  %531 = vmatpush3.bf16.msra.mxu1 %v539_v0  ;;  %v547_v4 = vld [vmem:[%s675_s0] sm:$0xff]   ;;  %v545_v8 = vld [vmem:[%s674_s1 + $0x8] sm:$0xff]   ;;  %v551_v12 = vld [vmem:[%s675_s0 + $0x10] sm:$0xff]  }
   0x4   :  { %493 = vmatprep.subr.bf16.mxu0 %v540_v1  ;;  %524 = vmatprep.subr.bf16.mxu1 %v540_v1  ;;  %v548_v5 = vld [vmem:[%s675_s0 + $0x20] sm:$0xff]   ;;  %v549_v10 = vld [vmem:[%s675_s0 + $0x8] sm:$0xff]   ;;  %v552_v13 = vld [vmem:[%s675_s0 + $0x30] sm:$0xff]  }
   0x5   :  { %507 = vmatprep.mubr.bf16.mxu0 %v547_v4  ;;  %515 = vmatprep.mubr.bf16.mxu1 %v548_v5  ;;  %v546_v9 = vld [vmem:[%s674_s1] sm:$0xff]   ;;  %v550_v11 = vld [vmem:[%s675_s0 + $0x28] sm:$0xff]   ;;  %v553_v14 = vld [vmem:[%s675_s0 + $0x18] sm:$0xff]  }
   0x6   :  { %v554_v15 = vld [vmem:[%s675_s0 + $0x38] sm:$0xff]   ;;  %v626_v16 = vld [vmem:[%s676_s2] ss:$0 sm:$0xff] }
   0x7   :  { %494 = vmatpush3.bf16.msra.mxu0 %v540_v1  ;;  %532 = vmatpush3.bf16.msra.mxu1 %v540_v1 }
   0x8   :  { %495 = vmatprep.subr.bf16.mxu0 %v541_v2  ;;  %525 = vmatprep.subr.bf16.mxu1 %v541_v2 }
   0xb   :  { %496 = vmatpush3.bf16.msra.mxu0 %v541_v2  ;;  %533 = vmatpush3.bf16.msra.mxu1 %v541_v2 }
   0xc   :  { %497 = vmatprep.subr.bf16.mxu0 %v542_v3  ;;  %526 = vmatprep.subr.bf16.mxu1 %v542_v3 }
   0xf   :  { %498 = vmatpush3.bf16.msra.mxu0 %v542_v3  ;;  %534 = vmatpush3.bf16.msra.mxu1 %v542_v3 }
  0x10   :  { %499 = vmatprep.subr.bf16.mxu0 %v543_v6  ;;  %527 = vmatprep.subr.bf16.mxu1 %v543_v6 }
  0x13   :  { %500 = vmatpush3.bf16.msra.mxu0 %v543_v6  ;;  %535 = vmatpush3.bf16.msra.mxu1 %v543_v6 }
  0x14   :  { %501 = vmatprep.subr.bf16.mxu0 %v544_v7  ;;  %528 = vmatprep.subr.bf16.mxu1 %v544_v7 }
  0x17   :  { %502 = vmatpush3.bf16.msra.mxu0 %v544_v7  ;;  %536 = vmatpush3.bf16.msra.mxu1 %v544_v7 }
  0x18   :  { %503 = vmatprep.subr.bf16.mxu0 %v545_v8  ;;  %529 = vmatprep.subr.bf16.mxu1 %v545_v8 }
  0x1b   :  { %504 = vmatpush3.bf16.msra.mxu0 %v545_v8  ;;  %537 = vmatpush3.bf16.msra.mxu1 %v545_v8 }
  0x1c   :  { %505 = vmatprep.subr.bf16.mxu0 %v546_v9  ;;  %530 = vmatprep.subr.bf16.mxu1 %v546_v9 }
  0x1f   :  { %506 = vmatpush3.bf16.msra.mxu0 %v546_v9  ;;  %538 = vmatpush3.bf16.msra.mxu1 %v546_v9 }
  0x22   :  { %508 = vmatmul.mubr.bf16.vlgmr.msra.gmra.mxu0 %v549_v10  ;;  %516 = vmatmul.mubr.bf16.vlgmr.msra.gmra.mxu1 %v550_v11 }
  0x23   :  { %511 = vmatprep.mubr.bf16.mxu0 %v551_v12  ;;  %519 = vmatprep.mubr.bf16.mxu1 %v552_v13 }
  0x2a   :  { %512 = vmatmul.mubr.bf16.gmra.mxu0 %v553_v14  ;;  %520 = vmatmul.mubr.bf16.gmra.mxu1 %v554_v15 }
  0xe2   :  { %v509_v17 = vpop.f32.mrf.mxu0  ;;  %v517_v18 = vpop.f32.mrf.mxu1 }
  0xe3   :  { %v193_v19 = vadd.f32 %v509_v17, %v626_v16  ;;  %v225_v20 = vadd.f32 %v517_v18, %v626_v16 }
  0xe4   :  { %v184_v21 = vpop.f32.mrf.mxu0  ;;  %v216_v22 = vpop.f32.mrf.mxu1 }
  0xe5   :  { %vm249_vm0 = vcmp.gt.f32.partialorder %v193_v19, 0.0  ;;  %v265_v23 = vmul.f32 0.2, %v193_v19  ;;  %vm257_vm1 = vcmp.gt.f32.partialorder %v225_v20, 0.0  ;;  %v273_v24 = vmul.f32 0.2, %v225_v20 }
  0xe6   :  { %v185_v25 = vadd.f32 %v626_v16, %v184_v21  ;;  %v217_v26 = vadd.f32 %v626_v16, %v216_v22  ;;  %v510_v27 = vpop.f32.mrf.mxu0  ;;  %v518_v28 = vpop.f32.mrf.mxu1 }
  0xe7   :  { %v196_v29 = vadd.f32 %v510_v27, %v626_v16  ;;  %v228_v30 = vadd.f32 %v518_v28, %v626_v16  ;;  %v281_v31 = vsel %vm249_vm0, %v193_v19, %v265_v23  ;;  %v289_v32 = vsel %vm257_vm1, %v225_v20, %v273_v24 }
  0xe8   :  { %vm247_vm2 = vcmp.gt.f32.partialorder %v185_v25, 0.0  ;;  %v263_v33 = vmul.f32 0.2, %v185_v25  ;;  %v187_v34 = vpop.f32.mrf.mxu0  ;;  %v219_v35 = vpop.f32.mrf.mxu1  ;;  %vm255_vm5 = vcmp.gt.f32.partialorder %v217_v26, 0.0  ;;  %v271_v38 = vmul.f32 0.2, %v217_v26 }
  0xe9   :  { %vm250_vm3 = vcmp.gt.f32.partialorder %v196_v29, 0.0  ;;  %v266_v36 = vmul.f32 0.2, %v196_v29  ;;  %vm258_vm4 = vcmp.gt.f32.partialorder %v228_v30, 0.0  ;;  %v274_v37 = vmul.f32 0.2, %v228_v30 }
  0xea   :  { %v188_v39 = vadd.f32 %v626_v16, %v187_v34  ;;  %v220_v40 = vadd.f32 %v626_v16, %v219_v35  ;;  %v513_v41 = vpop.f32.mrf.mxu0  ;;  %v521_v42 = vpop.f32.mrf.mxu1  ;;  %v279_v53 = vsel %vm247_vm2, %v185_v25, %v263_v33  ;;  %v287_v58 = vsel %vm255_vm5, %v217_v26, %v271_v38 }
  0xeb   :  { %v282_v43 = vsel %vm250_vm3, %v196_v29, %v266_v36  ;;  %v290_v44 = vsel %vm258_vm4, %v228_v30, %v274_v37  ;;  %v209_v45 = vadd.f32 %v513_v41, %v626_v16  ;;  %v241_v46 = vadd.f32 %v521_v42, %v626_v16 }
  0xec   :  { %v436_v47 = vpack.c.bf16 %v282_v43, %v281_v31  ;;  %v456_v48 = vpack.c.bf16 %v290_v44, %v289_v32  ;;  %vm248_vm6 = vcmp.gt.f32.partialorder %v188_v39, 0.0  ;;  %v264_v49 = vmul.f32 0.2, %v188_v39  ;;  %v200_v50 = vpop.f32.mrf.mxu0  ;;  %v232_v51 = vpop.f32.mrf.mxu1 }
  0xed   :  { %vm256_vm7 = vcmp.gt.f32.partialorder %v220_v40, 0.0  ;;  %v272_v52 = vmul.f32 0.2, %v220_v40  ;;  %v201_v55 = vadd.f32 %v626_v16, %v200_v50  ;;  %v233_v61 = vadd.f32 %v626_v16, %v232_v51 }
  0xee   :  { %468 = vst [vmem:[%s677_s3 + $0x8] sm:$0xff] %v436_v47   ;;  %472 = vst [vmem:[%s677_s3 + $0x28] sm:$0xff] %v456_v48   ;;  %v280_v54 = vsel %vm248_vm6, %v188_v39, %v264_v49  ;;  %v514_v56 = vpop.f32.mrf.mxu0  ;;  %v522_v57 = vpop.f32.mrf.mxu1  ;;  %vm253_vm8 = vcmp.gt.f32.partialorder %v209_v45, 0.0  ;;  %v269_v63 = vmul.f32 0.2, %v209_v45  ;;  %vm261_vm9 = vcmp.gt.f32.partialorder %v241_v46, 0.0 }
  0xef   :  { %v431_v59 = vpack.c.bf16 %v280_v54, %v279_v53  ;;  %v288_v60 = vsel %vm256_vm7, %v220_v40, %v272_v52  ;;  %v277_v2 = vmul.f32 0.2, %v241_v46  ;;  %vm251_vm10 = vcmp.gt.f32.partialorder %v201_v55, 0.0 }
  0xf0   :  { %v451_v62 = vpack.c.bf16 %v288_v60, %v287_v58  ;;  %v203_v0 = vpop.f32.mrf.mxu0  ;;  %v235_v1 = vpop.f32.mrf.mxu1  ;;  %v212_v3 = vadd.f32 %v514_v56, %v626_v16  ;;  %v244_v4 = vadd.f32 %v522_v57, %v626_v16  ;;  %v267_v5 = vmul.f32 0.2, %v201_v55 }
  0xf1   :  { %432 = vst [vmem:[%s677_s3] sm:$0xff] %v431_v59   ;;  %vm259_vm11 = vcmp.gt.f32.partialorder %v233_v61, 0.0  ;;  %v204_v6 = vadd.f32 %v626_v16, %v203_v0  ;;  %v236_v7 = vadd.f32 %v626_v16, %v235_v1  ;;  %v275_v8 = vmul.f32 0.2, %v233_v61 }
  0xf2   :  { %471 = vst [vmem:[%s677_s3 + $0x20] sm:$0xff] %v451_v62   ;;  %vm254_vm12 = vcmp.gt.f32.partialorder %v212_v3, 0.0  ;;  %v270_v9 = vmul.f32 0.2, %v212_v3  ;;  %vm262_vm13 = vcmp.gt.f32.partialorder %v244_v4, 0.0  ;;  %v285_v12 = vsel %vm253_vm8, %v209_v45, %v269_v63 }
  0xf3   :  { %v278_v10 = vmul.f32 0.2, %v244_v4  ;;  %vm252_vm14 = vcmp.gt.f32.partialorder %v204_v6, 0.0  ;;  %v268_v11 = vmul.f32 0.2, %v204_v6  ;;  %vm260_vm15 = vcmp.gt.f32.partialorder %v236_v7, 0.0 }
  0xf4   :  { %v293_v13 = vsel %vm261_vm9, %v241_v46, %v277_v2  ;;  %v286_v14 = vsel %vm254_vm12, %v212_v3, %v270_v9  ;;  %v276_v15 = vmul.f32 0.2, %v236_v7  ;;  %v283_v17 = vsel %vm251_vm10, %v201_v55, %v267_v5 }
  0xf5   :  { %v446_v18 = vpack.c.bf16 %v286_v14, %v285_v12  ;;  %v294_v19 = vsel %vm262_vm13, %v244_v4, %v278_v10  ;;  %v284_v20 = vsel %vm252_vm14, %v204_v6, %v268_v11  ;;  %v291_v16 = vsel %vm259_vm11, %v233_v61, %v275_v8 }
  0xf6   :  { %v466_v21 = vpack.c.bf16 %v294_v19, %v293_v13  ;;  %v441_v22 = vpack.c.bf16 %v284_v20, %v283_v17  ;;  %v292_v23 = vsel %vm260_vm15, %v236_v7, %v276_v15 }
  0xf7   :  { %470 = vst [vmem:[%s677_s3 + $0x18] sm:$0xff] %v446_v18   ;;  %v461_v24 = vpack.c.bf16 %v292_v23, %v291_v16 }
  0xf8   :  { %474 = vst [vmem:[%s677_s3 + $0x38] sm:$0xff] %v466_v21   ;;  %469 = vst [vmem:[%s677_s3 + $0x10] sm:$0xff] %v441_v22  }
  0xf9   :  { %473 = vst [vmem:[%s677_s3 + $0x30] sm:$0xff] %v461_v24  }

// kernel: discriminator_forward.8
= control target key start
LH: loop header
LB: loop body
LE: loop exit
PB: predicated region body
PF: predicated region fallthrough
CT: control target
= control target key end

     0   :  { %s148_s0 = inlined_call_operand.vmem [shape: bf16[32,128], index: 0, kind: input, shape index: {}]   ;;  %s149_s1 = inlined_call_operand.vmem [shape: f32[1,128], index: 1, kind: input, shape index: {}]   ;;  %s150_s2 = inlined_call_operand.vmem [shape: f32[1,128], index: 2, kind: input, shape index: {}]   ;;  %s151_s3 = inlined_call_operand.vmem [shape: bf16[32,128], index: 3, kind: output, shape index: {}]  }
   0x1   :  { %v91_v0 = vld [vmem:[%s148_s0] sm:$0xff]   ;;  %v108_v4 = vld [vmem:[%s148_s0 + $0x8] sm:$0xff]  }
   0x2   :  { %v80_v1 = vld [vmem:[%s149_s1] ss:$0 sm:$0xff]  ;;  %v92_v2 = vunpack.c.l.bf16 %v91_v0  ;;  %v93_v3 = vunpack.c.h.bf16 %v91_v0  ;;  %v96_v6 = vunpack.c.l.bf16 %v108_v4  ;;  %v97_v7 = vunpack.c.h.bf16 %v108_v4 }
   0x3   :  { %v81_v5 = vld [vmem:[%s150_s2] ss:$0 sm:$0xff] }
   0x4   :  { %v29_v8 = vmul.f32 %v92_v2, %v80_v1  ;;  %v30_v9 = vmul.f32 %v93_v3, %v80_v1  ;;  %v31_v10 = vmul.f32 %v96_v6, %v80_v1  ;;  %v32_v11 = vmul.f32 %v97_v7, %v80_v1 }
   0x6   :  { %v40_v12 = vadd.f32 %v81_v5, %v29_v8  ;;  %v41_v13 = vadd.f32 %v81_v5, %v30_v9  ;;  %v42_v14 = vadd.f32 %v81_v5, %v31_v10  ;;  %v43_v15 = vadd.f32 %v81_v5, %v32_v11 }
   0x8   :  { %vm44_vm0 = vcmp.gt.f32.partialorder %v40_v12, 0.0  ;;  %vm45_vm1 = vcmp.gt.f32.partialorder %v41_v13, 0.0  ;;  %v48_v16 = vmul.f32 0.2, %v40_v12  ;;  %v49_v17 = vmul.f32 0.2, %v41_v13 }
   0x9   :  { %vm46_vm2 = vcmp.gt.f32.partialorder %v42_v14, 0.0  ;;  %vm47_vm3 = vcmp.gt.f32.partialorder %v43_v15, 0.0  ;;  %v50_v18 = vmul.f32 0.2, %v42_v14  ;;  %v51_v19 = vmul.f32 0.2, %v43_v15 }
   0xa   :  { %v52_v20 = vsel %vm44_vm0, %v40_v12, %v48_v16  ;;  %v53_v21 = vsel %vm45_vm1, %v41_v13, %v49_v17 }
   0xb   :  { %v101_v22 = vpack.c.bf16 %v53_v21, %v52_v20  ;;  %v54_v23 = vsel %vm46_vm2, %v42_v14, %v50_v18  ;;  %v55_v24 = vsel %vm47_vm3, %v43_v15, %v51_v19 }
   0xc   :  { %v106_v25 = vpack.c.bf16 %v55_v24, %v54_v23 }
   0xd   :  { %102 = vst [vmem:[%s151_s3] sm:$0xff] %v101_v22  }
   0xe   :  { %109 = vst [vmem:[%s151_s3 + $0x8] sm:$0xff] %v106_v25  }

// kernel: discriminator_forward.7
= control target key start
LH: loop header
LB: loop body
LE: loop exit
PB: predicated region body
PF: predicated region fallthrough
CT: control target
= control target key end

     0   :  { %s1427_s1 = inlined_call_operand.vmem [shape: bf16[1024,128], index: 1, kind: input, shape index: {}]   ;;  %s1428_s0 = inlined_call_operand.vmem [shape: bf16[32,1024], index: 0, kind: input, shape index: {}]   ;;  %s1429_s2 = inlined_call_operand.vmem [shape: bf16[32,128], index: 2, kind: output, shape index: {0}]   ;;  %s1430_s3 = inlined_call_operand.vmem [shape: f32[1,1,128], index: 3, kind: output, shape index: {1}]   ;;  %s1431_s4 = inlined_call_operand.vmem [shape: f32[1,1,128], index: 4, kind: output, shape index: {2}]  }
   0x1   :  { %v1086_v0 = vld [vmem:[%s1427_s1 + $0x78] sm:$0xff]   ;;  %v1090_v4 = vld [vmem:[%s1427_s1 + $0x70] sm:$0xff]   ;;  %v1094_v8 = vld [vmem:[%s1427_s1 + $0x68] sm:$0xff]  }
   0x2   :  { %v1087_v1 = vld [vmem:[%s1427_s1 + $0xf8] sm:$0xff]   ;;  %974 = vmatprep.subr.bf16.mxu0 %v1086_v0  ;;  %v1091_v5 = vld [vmem:[%s1427_s1 + $0xf0] sm:$0xff]   ;;  %v1095_v9 = vld [vmem:[%s1427_s1 + $0xe8] sm:$0xff]  }
   0x3   :  { %v1088_v2 = vld [vmem:[%s1427_s1 + $0x38] sm:$0xff]   ;;  %1002 = vmatprep.subr.bf16.mxu1 %v1087_v1  ;;  %v1092_v6 = vld [vmem:[%s1427_s1 + $0x30] sm:$0xff]   ;;  %v1096_v10 = vld [vmem:[%s1427_s1 + $0x28] sm:$0xff]  }
   0x4   :  { %v1089_v3 = vld [vmem:[%s1427_s1 + $0xb8] sm:$0xff]   ;;  %975 = vmatpush3.bf16.msra.mxu0 %v1088_v2  ;;  %v1093_v7 = vld [vmem:[%s1427_s1 + $0xb0] sm:$0xff]   ;;  %v1097_v11 = vld [vmem:[%s1427_s1 + $0xa8] sm:$0xff]  }
   0x5   :  { %1003 = vmatpush3.bf16.msra.mxu1 %v1089_v3  ;;  %976 = vmatprep.subr.bf16.mxu0 %v1090_v4  ;;  %v1098_v12 = vld [vmem:[%s1427_s1 + $0x60] sm:$0xff]   ;;  %v1102_v16 = vld [vmem:[%s1427_s1 + $0x58] sm:$0xff]   ;;  %v1106_v20 = vld [vmem:[%s1427_s1 + $0x50] sm:$0xff]  }
   0x6   :  { %1004 = vmatprep.subr.bf16.mxu1 %v1091_v5  ;;  %v1099_v13 = vld [vmem:[%s1427_s1 + $0xe0] sm:$0xff]   ;;  %v1103_v17 = vld [vmem:[%s1427_s1 + $0xd8] sm:$0xff]   ;;  %v1107_v21 = vld [vmem:[%s1427_s1 + $0xd0] sm:$0xff]  }
   0x7   :  { %v1100_v14 = vld [vmem:[%s1427_s1 + $0x20] sm:$0xff]   ;;  %v1104_v18 = vld [vmem:[%s1427_s1 + $0x18] sm:$0xff]   ;;  %v1108_v22 = vld [vmem:[%s1427_s1 + $0x10] sm:$0xff]  }
   0x8   :  { %977 = vmatpush3.bf16.msra.mxu0 %v1092_v6  ;;  %v1101_v15 = vld [vmem:[%s1427_s1 + $0xa0] sm:$0xff]   ;;  %v1105_v19 = vld [vmem:[%s1427_s1 + $0x98] sm:$0xff]   ;;  %v1109_v23 = vld [vmem:[%s1427_s1 + $0x90] sm:$0xff]  }
   0x9   :  { %1005 = vmatpush3.bf16.msra.mxu1 %v1093_v7  ;;  %978 = vmatprep.subr.bf16.mxu0 %v1094_v8  ;;  %v1110_v24 = vld [vmem:[%s1427_s1 + $0x48] sm:$0xff]   ;;  %v1114_v28 = vld [vmem:[%s1427_s1 + $0x40] sm:$0xff]   ;;  %v1118_v40 = vld [vmem:[%s1427_s1 + $0x178] sm:$0xff]  }
   0xa   :  { %1006 = vmatprep.subr.bf16.mxu1 %v1095_v9  ;;  %v1111_v25 = vld [vmem:[%s1427_s1 + $0xc8] sm:$0xff]   ;;  %v1115_v29 = vld [vmem:[%s1427_s1 + $0xc0] sm:$0xff]   ;;  %v1119_v41 = vld [vmem:[%s1427_s1 + $0x1f8] sm:$0xff]  }
   0xb   :  { %v1112_v26 = vld [vmem:[%s1427_s1 + $0x8] sm:$0xff]   ;;  %v1116_v30 = vld [vmem:[%s1427_s1] sm:$0xff]   ;;  %v1120_v42 = vld [vmem:[%s1427_s1 + $0x138] sm:$0xff]  }
   0xc   :  { %979 = vmatpush3.bf16.msra.mxu0 %v1096_v10  ;;  %v1113_v27 = vld [vmem:[%s1427_s1 + $0x88] sm:$0xff]   ;;  %v1117_v31 = vld [vmem:[%s1427_s1 + $0x80] sm:$0xff]   ;;  %v1121_v43 = vld [vmem:[%s1427_s1 + $0x1b8] sm:$0xff]  }
   0xd   :  { %1007 = vmatpush3.bf16.msra.mxu1 %v1097_v11  ;;  %980 = vmatprep.subr.bf16.mxu0 %v1098_v12  ;;  %v15_v32 = vld [vmem:[%s1428_s0] sm:$0xff]  ;;  %v16_v34 = vld [vmem:[%s1428_s0 + $0x8] sm:$0xff]  ;;  %v1122_v44 = vld [vmem:[%s1427_s1 + $0x170] sm:$0xff]  }
   0xe   :  { %1008 = vmatprep.subr.bf16.mxu1 %v1099_v13  ;;  %v19_v33 = vld [vmem:[%s1428_s0 + $0x20] sm:$0xff]  ;;  %v20_v37 = vld [vmem:[%s1428_s0 + $0x28] sm:$0xff]  ;;  %v1123_v45 = vld [vmem:[%s1427_s1 + $0x1f0] sm:$0xff]  }
   0xf   :  { %v875_v35 = vcombine.low %v15_v32, %v19_v33  ;;  %v876_v36 = vcombine.high %v15_v32, %v19_v33  ;;  %v877_v38 = vcombine.low %v16_v34, %v20_v37  ;;  %v878_v39 = vcombine.high %v16_v34, %v20_v37  ;;  %v1124_v46 = vld [vmem:[%s1427_s1 + $0x130] sm:$0xff]   ;;  %v1126_v48 = vld [vmem:[%s1427_s1 + $0x168] sm:$0xff]   ;;  %v1130_v52 = vld [vmem:[%s1427_s1 + $0x160] sm:$0xff]  }
  0x10   :  { %981 = vmatpush3.bf16.msra.mxu0 %v1100_v14  ;;  %v1125_v47 = vld [vmem:[%s1427_s1 + $0x1b0] sm:$0xff]   ;;  %v1127_v49 = vld [vmem:[%s1427_s1 + $0x1e8] sm:$0xff]   ;;  %v1131_v53 = vld [vmem:[%s1427_s1 + $0x1e0] sm:$0xff]  }
  0x11   :  { %1009 = vmatpush3.bf16.msra.mxu1 %v1101_v15  ;;  %982 = vmatprep.subr.bf16.mxu0 %v1102_v16  ;;  %v1128_v50 = vld [vmem:[%s1427_s1 + $0x128] sm:$0xff]   ;;  %v1132_v54 = vld [vmem:[%s1427_s1 + $0x120] sm:$0xff]   ;;  %v1134_v56 = vld [vmem:[%s1427_s1 + $0x158] sm:$0xff]  }
  0x12   :  { %1010 = vmatprep.subr.bf16.mxu1 %v1103_v17  ;;  %655 = vmatprep.mubr.bf16.mxu0 %v876_v36  ;;  %v1129_v51 = vld [vmem:[%s1427_s1 + $0x1a8] sm:$0xff]   ;;  %v1133_v55 = vld [vmem:[%s1427_s1 + $0x1a0] sm:$0xff]   ;;  %v1135_v57 = vld [vmem:[%s1427_s1 + $0x1d8] sm:$0xff]  }
  0x13   :  { %704 = vmatprep.mubr.bf16.mxu1 %v878_v39  ;;  %v23_v58 = vld [vmem:[%s1428_s0 + $0x40] sm:$0xff]  ;;  %v24_v61 = vld [vmem:[%s1428_s0 + $0x48] sm:$0xff]  ;;  %v1136_v1 = vld [vmem:[%s1427_s1 + $0x118] sm:$0xff]  }
  0x14   :  { %983 = vmatpush3.bf16.msra.mxu0 %v1104_v18  ;;  %v27_v59 = vld [vmem:[%s1428_s0 + $0x60] sm:$0xff]  ;;  %v28_v62 = vld [vmem:[%s1428_s0 + $0x68] sm:$0xff]  ;;  %v1137_v3 = vld [vmem:[%s1427_s1 + $0x198] sm:$0xff]  }
  0x15   :  { %1011 = vmatpush3.bf16.msra.mxu1 %v1105_v19  ;;  %984 = vmatprep.subr.bf16.mxu0 %v1106_v20  ;;  %v884_v60 = vcombine.high %v23_v58, %v27_v59  ;;  %v883_v63 = vcombine.low %v23_v58, %v27_v59  ;;  %v886_v0 = vcombine.high %v24_v61, %v28_v62  ;;  %v1138_v4 = vld [vmem:[%s1427_s1 + $0x150] sm:$0xff]   ;;  %v1142_v8 = vld [vmem:[%s1427_s1 + $0x148] sm:$0xff]   ;;  %v1146_v12 = vld [vmem:[%s1427_s1 + $0x140] sm:$0xff]  }
  0x16   :  { %1012 = vmatprep.subr.bf16.mxu1 %v1107_v21  ;;  %v885_v2 = vcombine.low %v24_v61, %v28_v62  ;;  %v1139_v5 = vld [vmem:[%s1427_s1 + $0x1d0] sm:$0xff]   ;;  %v1143_v9 = vld [vmem:[%s1427_s1 + $0x1c8] sm:$0xff]   ;;  %v1147_v13 = vld [vmem:[%s1427_s1 + $0x1c0] sm:$0xff]  }
  0x17   :  { %v1140_v6 = vld [vmem:[%s1427_s1 + $0x110] sm:$0xff]   ;;  %v1144_v10 = vld [vmem:[%s1427_s1 + $0x108] sm:$0xff]   ;;  %v1148_v14 = vld [vmem:[%s1427_s1 + $0x100] sm:$0xff]  }
  0x18   :  { %985 = vmatpush3.bf16.msra.mxu0 %v1108_v22  ;;  %v1141_v7 = vld [vmem:[%s1427_s1 + $0x190] sm:$0xff]   ;;  %v1145_v11 = vld [vmem:[%s1427_s1 + $0x188] sm:$0xff]   ;;  %v1149_v15 = vld [vmem:[%s1427_s1 + $0x180] sm:$0xff]  }
  0x19   :  { %1013 = vmatpush3.bf16.msra.mxu1 %v1109_v23  ;;  %986 = vmatprep.subr.bf16.mxu0 %v1110_v24  ;;  %v17_v16 = vld [vmem:[%s1428_s0 + $0x10] sm:$0xff]  ;;  %v18_v18 = vld [vmem:[%s1428_s0 + $0x18] sm:$0xff] }
  0x1a   :  { %1014 = vmatprep.subr.bf16.mxu1 %v1111_v25  ;;  %v21_v17 = vld [vmem:[%s1428_s0 + $0x30] sm:$0xff]  ;;  %v22_v19 = vld [vmem:[%s1428_s0 + $0x38] sm:$0xff] }
  0x1b   :  { %v879_v20 = vcombine.low %v17_v16, %v21_v17  ;;  %v880_v21 = vcombine.high %v17_v16, %v21_v17  ;;  %v881_v22 = vcombine.low %v18_v18, %v22_v19  ;;  %v882_v23 = vcombine.high %v18_v18, %v22_v19  ;;  %v25_v24 = vld [vmem:[%s1428_s0 + $0x50] sm:$0xff] }
  0x1c   :  { %987 = vmatpush3.bf16.msra.mxu0 %v1112_v26  ;;  %v29_v25 = vld [vmem:[%s1428_s0 + $0x70] sm:$0xff]  ;;  %v26_v26 = vld [vmem:[%s1428_s0 + $0x58] sm:$0xff] }
  0x1d   :  { %1015 = vmatpush3.bf16.msra.mxu1 %v1113_v27  ;;  %988 = vmatprep.subr.bf16.mxu0 %v1114_v28  ;;  %v888_v27 = vcombine.high %v25_v24, %v29_v25  ;;  %v30_v28 = vld [vmem:[%s1428_s0 + $0x78] sm:$0xff] }
  0x1e   :  { %1016 = vmatprep.subr.bf16.mxu1 %v1115_v29  ;;  %v890_v29 = vcombine.high %v26_v26, %v30_v28 }
  0x20   :  { %989 = vmatpush3.bf16.msra.mxu0 %v1116_v30  ;;  %v887_v30 = vcombine.low %v25_v24, %v29_v25 }
  0x21   :  { %1017 = vmatpush3.bf16.msra.mxu1 %v1117_v31  ;;  %1030 = vmatprep.subr.bf16.mxu0 %v1118_v40  ;;  %v889_v31 = vcombine.low %v26_v26, %v30_v28 }
  0x22   :  { %1058 = vmatprep.subr.bf16.mxu1 %v1119_v41 }
  0x23   :  { %656 = vmatmul.mubr.bf16.vlgmr.msra.gmra.mxu0 %v875_v35 }
  0x24   :  { %705 = vmatmul.mubr.bf16.vlgmr.msra.gmra.mxu1 %v877_v38  ;;  %1031 = vmatpush3.bf16.msra.mxu0 %v1120_v42 }
  0x25   :  { %1059 = vmatpush3.bf16.msra.mxu1 %v1121_v43  ;;  %1032 = vmatprep.subr.bf16.mxu0 %v1122_v44 }
  0x26   :  { %1060 = vmatprep.subr.bf16.mxu1 %v1123_v45  ;;  %663 = vmatprep.mubr.bf16.mxu0 %v884_v60 }
  0x27   :  { %712 = vmatprep.mubr.bf16.mxu1 %v886_v0 }
  0x28   :  { %1033 = vmatpush3.bf16.msra.mxu0 %v1124_v46 }
  0x29   :  { %1061 = vmatpush3.bf16.msra.mxu1 %v1125_v47  ;;  %1034 = vmatprep.subr.bf16.mxu0 %v1126_v48 }
  0x2a   :  { %1062 = vmatprep.subr.bf16.mxu1 %v1127_v49 }
  0x2b   :  { %664 = vmatmul.mubr.bf16.gmra.mxu0 %v883_v63 }
  0x2c   :  { %1035 = vmatpush3.bf16.msra.mxu0 %v1128_v50  ;;  %713 = vmatmul.mubr.bf16.gmra.mxu1 %v885_v2 }
  0x2d   :  { %1063 = vmatpush3.bf16.msra.mxu1 %v1129_v51  ;;  %1036 = vmatprep.subr.bf16.mxu0 %v1130_v52 }
  0x2e   :  { %1064 = vmatprep.subr.bf16.mxu1 %v1131_v53  ;;  %753 = vmatprep.mubr.bf16.mxu0 %v880_v21 }
  0x2f   :  { %802 = vmatprep.mubr.bf16.mxu1 %v882_v23 }
  0x30   :  { %1037 = vmatpush3.bf16.msra.mxu0 %v1132_v54 }
  0x31   :  { %1065 = vmatpush3.bf16.msra.mxu1 %v1133_v55  ;;  %1038 = vmatprep.subr.bf16.mxu0 %v1134_v56 }
  0x32   :  { %1066 = vmatprep.subr.bf16.mxu1 %v1135_v57 }
  0x34   :  { %1039 = vmatpush3.bf16.msra.mxu0 %v1136_v1 }
  0x35   :  { %1067 = vmatpush3.bf16.msra.mxu1 %v1137_v3  ;;  %1040 = vmatprep.subr.bf16.mxu0 %v1138_v4 }
  0x36   :  { %1068 = vmatprep.subr.bf16.mxu1 %v1139_v5 }
  0x38   :  { %1041 = vmatpush3.bf16.msra.mxu0 %v1140_v6 }
  0x39   :  { %1069 = vmatpush3.bf16.msra.mxu1 %v1141_v7  ;;  %1042 = vmatprep.subr.bf16.mxu0 %v1142_v8 }
  0x3a   :  { %1070 = vmatprep.subr.bf16.mxu1 %v1143_v9 }
  0x3c   :  { %1043 = vmatpush3.bf16.msra.mxu0 %v1144_v10 }
  0x3d   :  { %1071 = vmatpush3.bf16.msra.mxu1 %v1145_v11  ;;  %1044 = vmatprep.subr.bf16.mxu0 %v1146_v12 }
  0x3e   :  { %1072 = vmatprep.subr.bf16.mxu1 %v1147_v13 }
  0x40   :  { %1045 = vmatpush3.bf16.msra.mxu0 %v1148_v14 }
  0x41   :  { %1073 = vmatpush3.bf16.msra.mxu1 %v1149_v15 }
  0x43   :  { %754 = vmatmul.mubr.bf16.vlgmr.msra.gmra.mxu0 %v879_v20 }
  0x44   :  { %803 = vmatmul.mubr.bf16.vlgmr.msra.gmra.mxu1 %v881_v22  ;;  %761 = vmatprep.mubr.bf16.mxu0 %v888_v27 }
  0x45   :  { %810 = vmatprep.mubr.bf16.mxu1 %v890_v29 }
  0x4b   :  { %762 = vmatmul.mubr.bf16.gmra.mxu0 %v887_v30 }
  0x4c   :  { %811 = vmatmul.mubr.bf16.gmra.mxu1 %v889_v31 }
  0xe3   :  { %v990_v32 = vpop.f32.mrf.mxu0 }
  0xe4   :  { %v1018_v33 = vpop.f32.mrf.mxu1 }
  0xe5   :  { %v991_v34 = vpop.f32.mrf.mxu0 }
  0xe6   :  { %v1019_v35 = vpop.f32.mrf.mxu1  ;;  %v992_v50 = vadd.f32 %v991_v34, %v990_v32 }
  0xe7   :  { %v993_v36 = vpop.f32.mrf.mxu0  ;;  %v1020_v51 = vadd.f32 %v1019_v35, %v1018_v33 }
  0xe8   :  { %v1021_v37 = vpop.f32.mrf.mxu1 }
  0xe9   :  { %v994_v38 = vpop.f32.mrf.mxu0  ;;  %v707_v59 = vadd.f32 %v1020_v51, %v992_v50 }
  0xea   :  { %v1022_v39 = vpop.f32.mrf.mxu1  ;;  %v995_v54 = vadd.f32 %v994_v38, %v993_v36 }
  0xeb   :  { %v996_v40 = vpop.f32.mrf.mxu0  ;;  %v1023_v55 = vadd.f32 %v1022_v39, %v1021_v37 }
  0xec   :  { %v1024_v41 = vpop.f32.mrf.mxu1 }
  0xed   :  { %v997_v42 = vpop.f32.mrf.mxu0  ;;  %v710_v0 = vadd.f32 %v1023_v55, %v995_v54 }
  0xee   :  { %v1025_v43 = vpop.f32.mrf.mxu1  ;;  %v998_v60 = vadd.f32 %v997_v42, %v996_v40 }
  0xef   :  { %v999_v44 = vpop.f32.mrf.mxu0  ;;  %v1026_v61 = vadd.f32 %v1025_v43, %v1024_v41 }
  0xf0   :  { %v1027_v45 = vpop.f32.mrf.mxu1 }
  0xf1   :  { %v1000_v46 = vpop.f32.mrf.mxu0  ;;  %v715_v8 = vadd.f32 %v1026_v61, %v998_v60 }
  0xf2   :  { %v1028_v47 = vpop.f32.mrf.mxu1  ;;  %v1001_v9 = vadd.f32 %v1000_v46, %v999_v44 }
  0xf3   :  { %v1029_v12 = vadd.f32 %v1028_v47, %v1027_v45 }
  0xf5   :  { %v718_v23 = vadd.f32 %v1029_v12, %v1001_v9 }
 0x103   :  { %v1046_v48 = vpop.f32.mrf.mxu0 }
 0x104   :  { %v1074_v49 = vpop.f32.mrf.mxu1 }
 0x105   :  { %v1047_v52 = vpop.f32.mrf.mxu0 }
 0x106   :  { %v1075_v53 = vpop.f32.mrf.mxu1  ;;  %v1048_v56 = vadd.f32 %v1047_v52, %v1046_v48 }
 0x107   :  { %v1049_v57 = vpop.f32.mrf.mxu0  ;;  %v1076_v5 = vadd.f32 %v1075_v53, %v1074_v49 }
 0x108   :  { %v1077_v58 = vpop.f32.mrf.mxu1  ;;  %v756_v1 = vadd.f32 %v1048_v56, %v707_v59 }
 0x109   :  { %v1050_v62 = vpop.f32.mrf.mxu0 }
 0x10a   :  { %v1078_v63 = vpop.f32.mrf.mxu1  ;;  %v1051_v2 = vadd.f32 %v1050_v62, %v1049_v57  ;;  %v805_v13 = vadd.f32 %v1076_v5, %v756_v1 }
 0x10b   :  { %v1052_v3 = vpop.f32.mrf.mxu0  ;;  %v1079_v7 = vadd.f32 %v1078_v63, %v1077_v58 }
 0x10c   :  { %v1080_v4 = vpop.f32.mrf.mxu1  ;;  %v759_v6 = vadd.f32 %v1051_v2, %v710_v0  ;;  %v848_v27 = vmul.f32 %v805_v13, %v805_v13 }
 0x10d   :  { %v1053_v10 = vpop.f32.mrf.mxu0 }
 0x10e   :  { %v1081_v11 = vpop.f32.mrf.mxu1  ;;  %v808_v14 = vadd.f32 %v1079_v7, %v759_v6  ;;  %v1054_v15 = vadd.f32 %v1053_v10, %v1052_v3 }
 0x10f   :  { %v1055_v16 = vpop.f32.mrf.mxu0  ;;  %v1082_v20 = vadd.f32 %v1081_v11, %v1080_v4 }
 0x110   :  { %v1083_v17 = vpop.f32.mrf.mxu1  ;;  %v966_v18 = vpack.c.bf16 %v808_v14, %v805_v13  ;;  %v764_v19 = vadd.f32 %v1054_v15, %v715_v8  ;;  %v849_v24 = vmul.f32 %v808_v14, %v808_v14  ;;  %v839_v28 = vadd.f32 %v808_v14, %v805_v13 }
 0x111   :  { %v1056_v21 = vpop.f32.mrf.mxu0 }
 0x112   :  { %v1084_v22 = vpop.f32.mrf.mxu1  ;;  %967 = vst [vmem:[%s1429_s2] sm:$0xff] %v966_v18   ;;  %v813_v25 = vadd.f32 %v1082_v20, %v764_v19  ;;  %v1057_v26 = vadd.f32 %v1056_v21, %v1055_v16  ;;  %v852_v32 = vadd.f32 %v849_v24, %v848_v27 }
 0x113   :  { %v1085_v31 = vadd.f32 %v1084_v22, %v1083_v17 }
 0x114   :  { %v850_v29 = vmul.f32 %v813_v25, %v813_v25  ;;  %v767_v30 = vadd.f32 %v1057_v26, %v718_v23  ;;  %v840_v33 = vadd.f32 %v839_v28, %v813_v25 }
 0x116   :  { %v816_v34 = vadd.f32 %v1085_v31, %v767_v30  ;;  %v853_v35 = vadd.f32 %v852_v32, %v850_v29 }
 0x118   :  { %v971_v36 = vpack.c.bf16 %v816_v34, %v813_v25  ;;  %v841_v37 = vadd.f32 %v840_v33, %v816_v34  ;;  %v851_v38 = vmul.f32 %v816_v34, %v816_v34 }
 0x11a   :  { %973 = vst [vmem:[%s1429_s2 + $0x8] sm:$0xff] %v971_v36   ;;  %v842_v39 = vrot.slane %v841_v37, 4  ;;  %v854_v40 = vadd.f32 %v853_v35, %v851_v38 }
 0x11c   :  { %v843_v41 = vadd.f32 %v842_v39, %v841_v37  ;;  %v855_v42 = vrot.slane %v854_v40, 4 }
 0x11e   :  { %v844_v43 = vrot.slane %v843_v41, 2  ;;  %v856_v44 = vadd.f32 %v855_v42, %v854_v40 }
 0x120   :  { %v845_v45 = vadd.f32 %v844_v43, %v843_v41  ;;  %v857_v46 = vrot.slane %v856_v44, 2 }
 0x122   :  { %v846_v47 = vrot.slane %v845_v45, 1  ;;  %v858_v48 = vadd.f32 %v857_v46, %v856_v44 }
 0x124   :  { %v847_v49 = vadd.f32 %v846_v47, %v845_v45  ;;  %v859_v50 = vrot.slane %v858_v48, 1 }
 0x126   :  { %v860_v51 = vadd.f32 %v859_v50, %v858_v48  ;;  %861 = vst [vmem:[%s1430_s3] sm:$0x1] %v847_v49 }
 0x128   :  { %862 = vst [vmem:[%s1431_s4] sm:$0x1] %v860_v51 }

// kernel: discriminator_forward.10
= control target key start
LH: loop header
LB: loop body
LE: loop exit
PB: predicated region body
PF: predicated region fallthrough
CT: control target
= control target key end

     0   :  { %v19_v0 = vlaneseq  ;;  %s98_s0 = inlined_call_operand.vmem [shape: bf16[8,256], index: 0, kind: input, shape index: {}]   ;;  %s99_s1 = inlined_call_operand.vmem [shape: f32[1,256], index: 1, kind: input, shape index: {}]   ;;  %s100_s2 = inlined_call_operand.vmem [shape: f32[1,256], index: 2, kind: input, shape index: {}]   ;;  %s101_s3 = inlined_call_operand.vmem [shape: bf16[8,256], index: 3, kind: output, shape index: {}]  }
   0x1   :  { %v14_v1 = vld [vmem:[%s98_s0] sm:$0xff] }
   0x2   :  { %v20_v2 = vshrl.u32 %v19_v0, 7  ;;  %v17_v3 = vld [vmem:[%s99_s1] sm:$0x3]  ;;  %v15_v5 = vunpack.c.l.bf16 %v14_v1  ;;  %v16_v6 = vunpack.c.h.bf16 %v14_v1 }
   0x3   :  { %v31_v4 = vld [vmem:[%s100_s2] sm:$0x3] }
   0x4   :  { %v21_v7 = vsub.s32 0, %v20_v2  ;;  %v25_v8 = vsub.s32 1, %v20_v2 }
   0x6   :  { %v22_v9 = vrot.slane %v17_v3, %v21_v7  ;;  %v26_v10 = vrot.slane %v17_v3, %v25_v8  ;;  %v36_v11 = vrot.slane %v31_v4, %v21_v7  ;;  %v40_v12 = vrot.slane %v31_v4, %v25_v8 }
   0x8   :  { %v29_v13 = vmul.f32 %v22_v9, %v15_v5  ;;  %v30_v14 = vmul.f32 %v26_v10, %v16_v6 }
   0xa   :  { %v43_v15 = vadd.f32 %v36_v11, %v29_v13  ;;  %v44_v16 = vadd.f32 %v40_v12, %v30_v14 }
   0xc   :  { %vm45_vm0 = vcmp.gt.f32.partialorder %v43_v15, 0.0  ;;  %vm46_vm1 = vcmp.gt.f32.partialorder %v44_v16, 0.0  ;;  %v47_v17 = vmul.f32 0.2, %v43_v15  ;;  %v48_v18 = vmul.f32 0.2, %v44_v16 }
   0xe   :  { %v49_v19 = vsel %vm45_vm0, %v43_v15, %v47_v17  ;;  %v50_v20 = vsel %vm46_vm1, %v44_v16, %v48_v18 }
   0xf   :  { %v65_v21 = vpack.c.bf16 %v50_v20, %v49_v19 }
  0x11   :  { %59 = vst [vmem:[%s101_s3] sm:$0xff] %v65_v21 }

// kernel: discriminator_forward.9
= control target key start
LH: loop header
LB: loop body
LE: loop exit
PB: predicated region body
PF: predicated region fallthrough
CT: control target
= control target key end

     0   :  { %s3569_s1 = inlined_call_operand.vmem [shape: bf16[2048,256], index: 1, kind: input, shape index: {}]   ;;  %s3570_s0 = inlined_call_operand.vmem [shape: bf16[8,2048], index: 0, kind: input, shape index: {}]   ;;  %s3571_s2 = inlined_call_operand.vmem [shape: bf16[8,256], index: 2, kind: output, shape index: {0}]   ;;  %s3572_s3 = inlined_call_operand.vmem [shape: f32[1,1,256], index: 3, kind: output, shape index: {1}]   ;;  %s3573_s4 = inlined_call_operand.vmem [shape: f32[1,1,256], index: 4, kind: output, shape index: {2}]  }
   0x1   :  { %v2306_v0 = vld [vmem:[%s3569_s1 + $0x74] ss:$8 sps:$4 sm:$0xff]   ;;  %v2310_v2 = vld [vmem:[%s3569_s1 + $0x70] ss:$8 sps:$4 sm:$0xff]   ;;  %v2312_v4 = vld [vmem:[%s3569_s1 + $0x64] ss:$8 sps:$4 sm:$0xff]  }
   0x2   :  { %v2308_v1 = vld [vmem:[%s3569_s1 + $0x174] ss:$8 sps:$4 sm:$0xff]   ;;  %1614 = vmatprep.subr.bf16.mxu0 %v2306_v0  ;;  %v2311_v3 = vld [vmem:[%s3569_s1 + $0x170] ss:$8 sps:$4 sm:$0xff]   ;;  %v2314_v5 = vld [vmem:[%s3569_s1 + $0x164] ss:$8 sps:$4 sm:$0xff]  }
   0x3   :  { %1655 = vmatprep.subr.bf16.mxu1 %v2308_v1  ;;  %1615 = vmatpush1.bf16.msra.mxu0 %v2310_v2  ;;  %v2316_v6 = vld [vmem:[%s3569_s1 + $0x60] ss:$8 sps:$4 sm:$0xff]   ;;  %v2318_v8 = vld [vmem:[%s3569_s1 + $0x54] ss:$8 sps:$4 sm:$0xff]   ;;  %v2322_v10 = vld [vmem:[%s3569_s1 + $0x50] ss:$8 sps:$4 sm:$0xff]  }
   0x4   :  { %1656 = vmatpush1.bf16.msra.mxu1 %v2311_v3  ;;  %1616 = vmatprep.subr.bf16.mxu0 %v2312_v4  ;;  %v2317_v7 = vld [vmem:[%s3569_s1 + $0x160] ss:$8 sps:$4 sm:$0xff]   ;;  %v2320_v9 = vld [vmem:[%s3569_s1 + $0x154] ss:$8 sps:$4 sm:$0xff]   ;;  %v2323_v11 = vld [vmem:[%s3569_s1 + $0x150] ss:$8 sps:$4 sm:$0xff]  }
   0x5   :  { %1657 = vmatprep.subr.bf16.mxu1 %v2314_v5  ;;  %v2324_v12 = vld [vmem:[%s3569_s1 + $0x44] ss:$8 sps:$4 sm:$0xff]   ;;  %v2328_v14 = vld [vmem:[%s3569_s1 + $0x40] ss:$8 sps:$4 sm:$0xff]   ;;  %v2330_v16 = vld [vmem:[%s3569_s1 + $0x34] ss:$8 sps:$4 sm:$0xff]  }
   0x6   :  { %v2326_v13 = vld [vmem:[%s3569_s1 + $0x144] ss:$8 sps:$4 sm:$0xff]   ;;  %v2329_v15 = vld [vmem:[%s3569_s1 + $0x140] ss:$8 sps:$4 sm:$0xff]   ;;  %v2332_v17 = vld [vmem:[%s3569_s1 + $0x134] ss:$8 sps:$4 sm:$0xff]  }
   0x7   :  { %1617 = vmatpush1.bf16.msra.mxu0 %v2316_v6  ;;  %v2334_v18 = vld [vmem:[%s3569_s1 + $0x30] ss:$8 sps:$4 sm:$0xff]   ;;  %v2336_v20 = vld [vmem:[%s3569_s1 + $0x24] ss:$8 sps:$4 sm:$0xff]   ;;  %v2340_v22 = vld [vmem:[%s3569_s1 + $0x20] ss:$8 sps:$4 sm:$0xff]  }
   0x8   :  { %1658 = vmatpush1.bf16.msra.mxu1 %v2317_v7  ;;  %1618 = vmatprep.subr.bf16.mxu0 %v2318_v8  ;;  %v2335_v19 = vld [vmem:[%s3569_s1 + $0x130] ss:$8 sps:$4 sm:$0xff]   ;;  %v2338_v21 = vld [vmem:[%s3569_s1 + $0x124] ss:$8 sps:$4 sm:$0xff]   ;;  %v2341_v23 = vld [vmem:[%s3569_s1 + $0x120] ss:$8 sps:$4 sm:$0xff]  }
   0x9   :  { %1659 = vmatprep.subr.bf16.mxu1 %v2320_v9  ;;  %v2342_v24 = vld [vmem:[%s3569_s1 + $0x14] ss:$8 sps:$4 sm:$0xff]   ;;  %v2346_v26 = vld [vmem:[%s3569_s1 + $0x10] ss:$8 sps:$4 sm:$0xff]   ;;  %v2348_v28 = vld [vmem:[%s3569_s1 + $0x4] ss:$8 sps:$4 sm:$0xff]  }
   0xa   :  { %v2344_v25 = vld [vmem:[%s3569_s1 + $0x114] ss:$8 sps:$4 sm:$0xff]   ;;  %v2347_v27 = vld [vmem:[%s3569_s1 + $0x110] ss:$8 sps:$4 sm:$0xff]   ;;  %v2350_v29 = vld [vmem:[%s3569_s1 + $0x104] ss:$8 sps:$4 sm:$0xff]  }
   0xb   :  { %1619 = vmatpush1.bf16.msra.mxu0 %v2322_v10  ;;  %v2352_v30 = vld [vmem:[%s3569_s1] ss:$8 sps:$4 sm:$0xff]   ;;  %v2354_v32 = vld [vmem:[%s3569_s1 + $0xf4] ss:$8 sps:$4 sm:$0xff]   ;;  %v2358_v34 = vld [vmem:[%s3569_s1 + $0xf0] ss:$8 sps:$4 sm:$0xff]  }
   0xc   :  { %1660 = vmatpush1.bf16.msra.mxu1 %v2323_v11  ;;  %1620 = vmatprep.subr.bf16.mxu0 %v2324_v12  ;;  %v2353_v31 = vld [vmem:[%s3569_s1 + $0x100] ss:$8 sps:$4 sm:$0xff]   ;;  %v2356_v33 = vld [vmem:[%s3569_s1 + $0x1f4] ss:$8 sps:$4 sm:$0xff]   ;;  %v2359_v35 = vld [vmem:[%s3569_s1 + $0x1f0] ss:$8 sps:$4 sm:$0xff]  }
   0xd   :  { %1661 = vmatprep.subr.bf16.mxu1 %v2326_v13  ;;  %v2360_v36 = vld [vmem:[%s3569_s1 + $0xe4] ss:$8 sps:$4 sm:$0xff]   ;;  %v2364_v38 = vld [vmem:[%s3569_s1 + $0xe0] ss:$8 sps:$4 sm:$0xff]   ;;  %v2366_v40 = vld [vmem:[%s3569_s1 + $0xd4] ss:$8 sps:$4 sm:$0xff]  }
   0xe   :  { %v2362_v37 = vld [vmem:[%s3569_s1 + $0x1e4] ss:$8 sps:$4 sm:$0xff]   ;;  %v2365_v39 = vld [vmem:[%s3569_s1 + $0x1e0] ss:$8 sps:$4 sm:$0xff]   ;;  %v2368_v41 = vld [vmem:[%s3569_s1 + $0x1d4] ss:$8 sps:$4 sm:$0xff]  }
   0xf   :  { %1621 = vmatpush1.bf16.msra.mxu0 %v2328_v14  ;;  %v2370_v42 = vld [vmem:[%s3569_s1 + $0xd0] ss:$8 sps:$4 sm:$0xff]   ;;  %v2372_v44 = vld [vmem:[%s3569_s1 + $0xc4] ss:$8 sps:$4 sm:$0xff]   ;;  %v2376_v49 = vld [vmem:[%s3569_s1 + $0xc0] ss:$8 sps:$4 sm:$0xff]  }
  0x10   :  { %1662 = vmatpush1.bf16.msra.mxu1 %v2329_v15  ;;  %1622 = vmatprep.subr.bf16.mxu0 %v2330_v16  ;;  %v2371_v43 = vld [vmem:[%s3569_s1 + $0x1d0] ss:$8 sps:$4 sm:$0xff]   ;;  %v2374_v45 = vld [vmem:[%s3569_s1 + $0x1c4] ss:$8 sps:$4 sm:$0xff]   ;;  %v2377_v50 = vld [vmem:[%s3569_s1 + $0x1c0] ss:$8 sps:$4 sm:$0xff]  }
  0x11   :  { %1663 = vmatprep.subr.bf16.mxu1 %v2332_v17  ;;  %v14_v46 = vld [vmem:[%s3570_s0] sm:$0xff]  ;;  %v15_v48 = vld [vmem:[%s3570_s0 + $0x8] sm:$0xff]  ;;  %v2378_v52 = vld [vmem:[%s3569_s1 + $0xb4] ss:$8 sps:$4 sm:$0xff]  }
  0x12   :  { %v2032_v47 = vcombine.high %v14_v46, %v14_v46  ;;  %v2034_v51 = vcombine.high %v15_v48, %v15_v48  ;;  %v2380_v53 = vld [vmem:[%s3569_s1 + $0x1b4] ss:$8 sps:$4 sm:$0xff]   ;;  %v2382_v54 = vld [vmem:[%s3569_s1 + $0xb0] ss:$8 sps:$4 sm:$0xff]   ;;  %v2384_v56 = vld [vmem:[%s3569_s1 + $0xa4] ss:$8 sps:$4 sm:$0xff]   ;;  %v2031_v6 = vcombine.low %v14_v46, %v14_v46  ;;  %v2033_v7 = vcombine.low %v15_v48, %v15_v48 }
  0x13   :  { %1623 = vmatpush1.bf16.msra.mxu0 %v2334_v18  ;;  %v2383_v55 = vld [vmem:[%s3569_s1 + $0x1b0] ss:$8 sps:$4 sm:$0xff]   ;;  %v2386_v57 = vld [vmem:[%s3569_s1 + $0x1a4] ss:$8 sps:$4 sm:$0xff]   ;;  %v2388_v58 = vld [vmem:[%s3569_s1 + $0xa0] ss:$8 sps:$4 sm:$0xff]  }
  0x14   :  { %1664 = vmatpush1.bf16.msra.mxu1 %v2335_v19  ;;  %1624 = vmatprep.subr.bf16.mxu0 %v2336_v20  ;;  %v2389_v59 = vld [vmem:[%s3569_s1 + $0x1a0] ss:$8 sps:$4 sm:$0xff]   ;;  %v2390_v60 = vld [vmem:[%s3569_s1 + $0x94] ss:$8 sps:$4 sm:$0xff]   ;;  %v2394_v62 = vld [vmem:[%s3569_s1 + $0x90] ss:$8 sps:$4 sm:$0xff]  }
  0x15   :  { %1665 = vmatprep.subr.bf16.mxu1 %v2338_v21  ;;  %1646 = vmatprep.mubr.bf16.mxu0 %v2032_v47  ;;  %v2392_v61 = vld [vmem:[%s3569_s1 + $0x194] ss:$8 sps:$4 sm:$0xff]   ;;  %v2395_v63 = vld [vmem:[%s3569_s1 + $0x190] ss:$8 sps:$4 sm:$0xff]   ;;  %v2396_v0 = vld [vmem:[%s3569_s1 + $0x84] ss:$8 sps:$4 sm:$0xff]  }
  0x16   :  { %1687 = vmatprep.mubr.bf16.mxu1 %v2034_v51  ;;  %v2398_v1 = vld [vmem:[%s3569_s1 + $0x184] ss:$8 sps:$4 sm:$0xff]   ;;  %v2400_v2 = vld [vmem:[%s3569_s1 + $0x80] ss:$8 sps:$4 sm:$0xff]   ;;  %v2408_v4 = vld [vmem:[%s3569_s1 + $0x274] ss:$8 sps:$4 sm:$0xff]  }
  0x17   :  { %1625 = vmatpush1.bf16.msra.mxu0 %v2340_v22  ;;  %v2401_v3 = vld [vmem:[%s3569_s1 + $0x180] ss:$8 sps:$4 sm:$0xff]   ;;  %v2411_v5 = vld [vmem:[%s3569_s1 + $0x374] ss:$8 sps:$4 sm:$0xff]   ;;  %v2406_v8 = vld [vmem:[%s3569_s1 + $0x270] ss:$8 sps:$4 sm:$0xff]  }
  0x18   :  { %1666 = vmatpush1.bf16.msra.mxu1 %v2341_v23  ;;  %1626 = vmatprep.subr.bf16.mxu0 %v2342_v24  ;;  %v2409_v9 = vld [vmem:[%s3569_s1 + $0x370] ss:$8 sps:$4 sm:$0xff]   ;;  %v2414_v10 = vld [vmem:[%s3569_s1 + $0x264] ss:$8 sps:$4 sm:$0xff]   ;;  %v2412_v12 = vld [vmem:[%s3569_s1 + $0x260] ss:$8 sps:$4 sm:$0xff]  }
  0x19   :  { %1667 = vmatprep.subr.bf16.mxu1 %v2344_v25  ;;  %v2417_v11 = vld [vmem:[%s3569_s1 + $0x364] ss:$8 sps:$4 sm:$0xff]   ;;  %v2415_v13 = vld [vmem:[%s3569_s1 + $0x360] ss:$8 sps:$4 sm:$0xff]   ;;  %v2420_v14 = vld [vmem:[%s3569_s1 + $0x254] ss:$8 sps:$4 sm:$0xff]  }
  0x1a   :  { %v2423_v15 = vld [vmem:[%s3569_s1 + $0x354] ss:$8 sps:$4 sm:$0xff]   ;;  %v2418_v16 = vld [vmem:[%s3569_s1 + $0x250] ss:$8 sps:$4 sm:$0xff]   ;;  %v2426_v18 = vld [vmem:[%s3569_s1 + $0x244] ss:$8 sps:$4 sm:$0xff]  }
  0x1b   :  { %1627 = vmatpush1.bf16.msra.mxu0 %v2346_v26  ;;  %v2421_v17 = vld [vmem:[%s3569_s1 + $0x350] ss:$8 sps:$4 sm:$0xff]   ;;  %v2429_v19 = vld [vmem:[%s3569_s1 + $0x344] ss:$8 sps:$4 sm:$0xff]   ;;  %v2424_v20 = vld [vmem:[%s3569_s1 + $0x240] ss:$8 sps:$4 sm:$0xff]  }
  0x1c   :  { %1668 = vmatpush1.bf16.msra.mxu1 %v2347_v27  ;;  %1628 = vmatprep.subr.bf16.mxu0 %v2348_v28  ;;  %v2427_v21 = vld [vmem:[%s3569_s1 + $0x340] ss:$8 sps:$4 sm:$0xff]   ;;  %v2432_v22 = vld [vmem:[%s3569_s1 + $0x234] ss:$8 sps:$4 sm:$0xff]   ;;  %v2430_v24 = vld [vmem:[%s3569_s1 + $0x230] ss:$8 sps:$4 sm:$0xff]  }
  0x1d   :  { %1669 = vmatprep.subr.bf16.mxu1 %v2350_v29  ;;  %v2435_v23 = vld [vmem:[%s3569_s1 + $0x334] ss:$8 sps:$4 sm:$0xff]   ;;  %v2433_v25 = vld [vmem:[%s3569_s1 + $0x330] ss:$8 sps:$4 sm:$0xff]   ;;  %v2438_v26 = vld [vmem:[%s3569_s1 + $0x224] ss:$8 sps:$4 sm:$0xff]  }
  0x1e   :  { %v2441_v27 = vld [vmem:[%s3569_s1 + $0x324] ss:$8 sps:$4 sm:$0xff]   ;;  %v2436_v28 = vld [vmem:[%s3569_s1 + $0x220] ss:$8 sps:$4 sm:$0xff]   ;;  %v2471_v51 = vld [vmem:[%s3569_s1 + $0x3d4] ss:$8 sps:$4 sm:$0xff]  }
  0x1f   :  { %1629 = vmatpush1.bf16.msra.mxu0 %v2352_v30  ;;  %v2439_v29 = vld [vmem:[%s3569_s1 + $0x320] ss:$8 sps:$4 sm:$0xff]   ;;  %v2444_v30 = vld [vmem:[%s3569_s1 + $0x214] ss:$8 sps:$4 sm:$0xff]   ;;  %v2462_v46 = vld [vmem:[%s3569_s1 + $0x2e4] ss:$8 sps:$4 sm:$0xff]  }
  0x20   :  { %1670 = vmatpush1.bf16.msra.mxu1 %v2353_v31  ;;  %1630 = vmatprep.subr.bf16.mxu0 %v2354_v32  ;;  %v2447_v31 = vld [vmem:[%s3569_s1 + $0x314] ss:$8 sps:$4 sm:$0xff]   ;;  %v2465_v47 = vld [vmem:[%s3569_s1 + $0x3e4] ss:$8 sps:$4 sm:$0xff]   ;;  %v2460_v48 = vld [vmem:[%s3569_s1 + $0x2e0] ss:$8 sps:$4 sm:$0xff]  }
  0x21   :  { %1671 = vmatprep.subr.bf16.mxu1 %v2356_v33  ;;  %v3011_v32 = vld [vmem:[%s3570_s0 + $0x10] sm:$0xff]  ;;  %v3016_v33 = vld [vmem:[%s3570_s0 + $0x18] sm:$0xff] }
  0x23   :  { %1631 = vmatpush2.bf16.msra.mxu0 %v2358_v34  ;;  %v2442_v34 = vld [vmem:[%s3569_s1 + $0x210] ss:$8 sps:$4 sm:$0xff]  }
  0x24   :  { %1672 = vmatpush2.bf16.msra.mxu1 %v2359_v35  ;;  %1632 = vmatprep.subr.bf16.mxu0 %v2360_v36  ;;  %v2445_v35 = vld [vmem:[%s3569_s1 + $0x310] ss:$8 sps:$4 sm:$0xff]   ;;  %v2036_v36 = vcombine.high %v3011_v32, %v3011_v32 }
  0x25   :  { %1673 = vmatprep.subr.bf16.mxu1 %v2362_v37  ;;  %v2038_v37 = vcombine.high %v3016_v33, %v3016_v33 }
  0x27   :  { %1633 = vmatpush2.bf16.msra.mxu0 %v2364_v38  ;;  %v2450_v38 = vld [vmem:[%s3569_s1 + $0x204] ss:$8 sps:$4 sm:$0xff]  }
  0x28   :  { %1674 = vmatpush2.bf16.msra.mxu1 %v2365_v39  ;;  %1634 = vmatprep.subr.bf16.mxu0 %v2366_v40  ;;  %v2453_v39 = vld [vmem:[%s3569_s1 + $0x304] ss:$8 sps:$4 sm:$0xff]   ;;  %v2448_v40 = vld [vmem:[%s3569_s1 + $0x200] ss:$8 sps:$4 sm:$0xff]  }
  0x29   :  { %1675 = vmatprep.subr.bf16.mxu1 %v2368_v41  ;;  %v2451_v41 = vld [vmem:[%s3569_s1 + $0x300] ss:$8 sps:$4 sm:$0xff]  }
  0x2b   :  { %1635 = vmatpush2.bf16.msra.mxu0 %v2370_v42  ;;  %v2456_v42 = vld [vmem:[%s3569_s1 + $0x2f4] ss:$8 sps:$4 sm:$0xff]  }
  0x2c   :  { %1676 = vmatpush2.bf16.msra.mxu1 %v2371_v43  ;;  %1636 = vmatprep.subr.bf16.mxu0 %v2372_v44  ;;  %v2459_v43 = vld [vmem:[%s3569_s1 + $0x3f4] ss:$8 sps:$4 sm:$0xff]   ;;  %v2454_v44 = vld [vmem:[%s3569_s1 + $0x2f0] ss:$8 sps:$4 sm:$0xff]  }
  0x2d   :  { %1677 = vmatprep.subr.bf16.mxu1 %v2374_v45  ;;  %v2457_v45 = vld [vmem:[%s3569_s1 + $0x3f0] ss:$8 sps:$4 sm:$0xff]  }
  0x2f   :  { %1637 = vmatpush2.bf16.msra.mxu0 %v2376_v49  ;;  %v2463_v49 = vld [vmem:[%s3569_s1 + $0x3e0] ss:$8 sps:$4 sm:$0xff]  }
  0x30   :  { %1678 = vmatpush2.bf16.msra.mxu1 %v2377_v50  ;;  %1638 = vmatprep.subr.bf16.mxu0 %v2378_v52  ;;  %v2468_v50 = vld [vmem:[%s3569_s1 + $0x2d4] ss:$8 sps:$4 sm:$0xff]   ;;  %v2466_v52 = vld [vmem:[%s3569_s1 + $0x2d0] ss:$8 sps:$4 sm:$0xff]  }
  0x31   :  { %1679 = vmatprep.subr.bf16.mxu1 %v2380_v53  ;;  %v2469_v53 = vld [vmem:[%s3569_s1 + $0x3d0] ss:$8 sps:$4 sm:$0xff]  }
  0x33   :  { %1639 = vmatpush2.bf16.msra.mxu0 %v2382_v54  ;;  %v2474_v54 = vld [vmem:[%s3569_s1 + $0x2c4] ss:$8 sps:$4 sm:$0xff]  }
  0x34   :  { %1680 = vmatpush2.bf16.msra.mxu1 %v2383_v55  ;;  %1640 = vmatprep.subr.bf16.mxu0 %v2384_v56  ;;  %v2477_v55 = vld [vmem:[%s3569_s1 + $0x3c4] ss:$8 sps:$4 sm:$0xff]   ;;  %v2472_v56 = vld [vmem:[%s3569_s1 + $0x2c0] ss:$8 sps:$4 sm:$0xff]  }
  0x35   :  { %1681 = vmatprep.subr.bf16.mxu1 %v2386_v57  ;;  %v2475_v57 = vld [vmem:[%s3569_s1 + $0x3c0] ss:$8 sps:$4 sm:$0xff]  }
  0x37   :  { %1641 = vmatpush2.bf16.msra.mxu0 %v2388_v58  ;;  %v2480_v58 = vld [vmem:[%s3569_s1 + $0x2b4] ss:$8 sps:$4 sm:$0xff]  }
  0x38   :  { %1682 = vmatpush2.bf16.msra.mxu1 %v2389_v59  ;;  %1642 = vmatprep.subr.bf16.mxu0 %v2390_v60  ;;  %v2483_v59 = vld [vmem:[%s3569_s1 + $0x3b4] ss:$8 sps:$4 sm:$0xff]   ;;  %v2478_v60 = vld [vmem:[%s3569_s1 + $0x2b0] ss:$8 sps:$4 sm:$0xff]  }
  0x39   :  { %1683 = vmatprep.subr.bf16.mxu1 %v2392_v61  ;;  %v2481_v61 = vld [vmem:[%s3569_s1 + $0x3b0] ss:$8 sps:$4 sm:$0xff]  }
  0x3b   :  { %1643 = vmatpush2.bf16.msra.mxu0 %v2394_v62  ;;  %v2486_v62 = vld [vmem:[%s3569_s1 + $0x2a4] ss:$8 sps:$4 sm:$0xff]  }
  0x3c   :  { %1684 = vmatpush2.bf16.msra.mxu1 %v2395_v63  ;;  %1644 = vmatprep.subr.bf16.mxu0 %v2396_v0  ;;  %v2489_v63 = vld [vmem:[%s3569_s1 + $0x3a4] ss:$8 sps:$4 sm:$0xff]   ;;  %v2484_v0 = vld [vmem:[%s3569_s1 + $0x2a0] ss:$8 sps:$4 sm:$0xff]  }
  0x3d   :  { %1685 = vmatprep.subr.bf16.mxu1 %v2398_v1  ;;  %v2487_v1 = vld [vmem:[%s3569_s1 + $0x3a0] ss:$8 sps:$4 sm:$0xff]  }
  0x3f   :  { %1645 = vmatpush2.bf16.msra.mxu0 %v2400_v2  ;;  %v2492_v2 = vld [vmem:[%s3569_s1 + $0x294] ss:$8 sps:$4 sm:$0xff]  }
  0x40   :  { %1686 = vmatpush2.bf16.msra.mxu1 %v2401_v3  ;;  %1696 = vmatprep.subr.bf16.mxu0 %v2408_v4  ;;  %v2495_v3 = vld [vmem:[%s3569_s1 + $0x394] ss:$8 sps:$4 sm:$0xff]   ;;  %v2490_v4 = vld [vmem:[%s3569_s1 + $0x290] ss:$8 sps:$4 sm:$0xff]  }
  0x41   :  { %1737 = vmatprep.subr.bf16.mxu1 %v2411_v5  ;;  %v2493_v5 = vld [vmem:[%s3569_s1 + $0x390] ss:$8 sps:$4 sm:$0xff]  }
  0x42   :  { %1647 = vmatmul.mubr.bf16.vlgmr.msra.gmra.mxu0 %v2031_v6  ;;  %v2498_v6 = vld [vmem:[%s3569_s1 + $0x284] ss:$8 sps:$4 sm:$0xff]  }
  0x43   :  { %1688 = vmatmul.mubr.bf16.vlgmr.msra.gmra.mxu1 %v2033_v7  ;;  %1697 = vmatpush1.bf16.msra.mxu0 %v2406_v8  ;;  %v2501_v7 = vld [vmem:[%s3569_s1 + $0x384] ss:$8 sps:$4 sm:$0xff]   ;;  %v2496_v8 = vld [vmem:[%s3569_s1 + $0x280] ss:$8 sps:$4 sm:$0xff]  }
  0x44   :  { %1738 = vmatpush1.bf16.msra.mxu1 %v2409_v9  ;;  %1698 = vmatprep.subr.bf16.mxu0 %v2414_v10  ;;  %v2499_v9 = vld [vmem:[%s3569_s1 + $0x380] ss:$8 sps:$4 sm:$0xff]   ;;  %v2508_v10 = vld [vmem:[%s3569_s1 + $0x474] ss:$8 sps:$4 sm:$0xff]  }
  0x45   :  { %1739 = vmatprep.subr.bf16.mxu1 %v2417_v11  ;;  %1728 = vmatprep.mubr.bf16.mxu0 %v2036_v36  ;;  %v2511_v11 = vld [vmem:[%s3569_s1 + $0x574] ss:$8 sps:$4 sm:$0xff]   ;;  %v2538_v36 = vld [vmem:[%s3569_s1 + $0x424] ss:$8 sps:$4 sm:$0xff]  }
  0x46   :  { %1769 = vmatprep.mubr.bf16.mxu1 %v2038_v37  ;;  %v2541_v37 = vld [vmem:[%s3569_s1 + $0x524] ss:$8 sps:$4 sm:$0xff]  }
  0x47   :  { %1699 = vmatpush1.bf16.msra.mxu0 %v2412_v12  ;;  %v2035_v12 = vcombine.low %v3011_v32, %v3011_v32  ;;  %v2532_v32 = vld [vmem:[%s3569_s1 + $0x434] ss:$8 sps:$4 sm:$0xff]  }
  0x48   :  { %1740 = vmatpush1.bf16.msra.mxu1 %v2415_v13  ;;  %1700 = vmatprep.subr.bf16.mxu0 %v2420_v14  ;;  %v2037_v13 = vcombine.low %v3016_v33, %v3016_v33  ;;  %v2506_v14 = vld [vmem:[%s3569_s1 + $0x470] ss:$8 sps:$4 sm:$0xff]   ;;  %v2535_v33 = vld [vmem:[%s3569_s1 + $0x534] ss:$8 sps:$4 sm:$0xff]  }
  0x49   :  { %1741 = vmatprep.subr.bf16.mxu1 %v2423_v15  ;;  %v2509_v15 = vld [vmem:[%s3569_s1 + $0x570] ss:$8 sps:$4 sm:$0xff]  }
  0x4b   :  { %1701 = vmatpush1.bf16.msra.mxu0 %v2418_v16  ;;  %v2514_v16 = vld [vmem:[%s3569_s1 + $0x464] ss:$8 sps:$4 sm:$0xff]  }
  0x4c   :  { %1742 = vmatpush1.bf16.msra.mxu1 %v2421_v17  ;;  %1702 = vmatprep.subr.bf16.mxu0 %v2426_v18  ;;  %v2517_v17 = vld [vmem:[%s3569_s1 + $0x564] ss:$8 sps:$4 sm:$0xff]  }
  0x4d   :  { %1743 = vmatprep.subr.bf16.mxu1 %v2429_v19  ;;  %v3161_v18 = vld [vmem:[%s3570_s0 + $0x20] sm:$0xff]  ;;  %v3166_v19 = vld [vmem:[%s3570_s0 + $0x28] sm:$0xff] }
  0x4f   :  { %1703 = vmatpush1.bf16.msra.mxu0 %v2424_v20  ;;  %v2040_v20 = vcombine.high %v3161_v18, %v3161_v18 }
  0x50   :  { %1744 = vmatpush1.bf16.msra.mxu1 %v2427_v21  ;;  %1704 = vmatprep.subr.bf16.mxu0 %v2432_v22  ;;  %v2042_v21 = vcombine.high %v3166_v19, %v3166_v19  ;;  %v2512_v22 = vld [vmem:[%s3569_s1 + $0x460] ss:$8 sps:$4 sm:$0xff]  }
  0x51   :  { %1745 = vmatprep.subr.bf16.mxu1 %v2435_v23  ;;  %v2515_v23 = vld [vmem:[%s3569_s1 + $0x560] ss:$8 sps:$4 sm:$0xff]  }
  0x53   :  { %1705 = vmatpush1.bf16.msra.mxu0 %v2430_v24  ;;  %v2520_v24 = vld [vmem:[%s3569_s1 + $0x454] ss:$8 sps:$4 sm:$0xff]  }
  0x54   :  { %1746 = vmatpush1.bf16.msra.mxu1 %v2433_v25  ;;  %1706 = vmatprep.subr.bf16.mxu0 %v2438_v26  ;;  %v2523_v25 = vld [vmem:[%s3569_s1 + $0x554] ss:$8 sps:$4 sm:$0xff]   ;;  %v2518_v26 = vld [vmem:[%s3569_s1 + $0x450] ss:$8 sps:$4 sm:$0xff]  }
  0x55   :  { %1747 = vmatprep.subr.bf16.mxu1 %v2441_v27  ;;  %v2521_v27 = vld [vmem:[%s3569_s1 + $0x550] ss:$8 sps:$4 sm:$0xff]  }
  0x57   :  { %1707 = vmatpush1.bf16.msra.mxu0 %v2436_v28  ;;  %v2526_v28 = vld [vmem:[%s3569_s1 + $0x444] ss:$8 sps:$4 sm:$0xff]  }
  0x58   :  { %1748 = vmatpush1.bf16.msra.mxu1 %v2439_v29  ;;  %1708 = vmatprep.subr.bf16.mxu0 %v2444_v30  ;;  %v2529_v29 = vld [vmem:[%s3569_s1 + $0x544] ss:$8 sps:$4 sm:$0xff]   ;;  %v2524_v30 = vld [vmem:[%s3569_s1 + $0x440] ss:$8 sps:$4 sm:$0xff]  }
  0x59   :  { %1749 = vmatprep.subr.bf16.mxu1 %v2447_v31  ;;  %v2527_v31 = vld [vmem:[%s3569_s1 + $0x540] ss:$8 sps:$4 sm:$0xff]  }
  0x5b   :  { %1709 = vmatpush1.bf16.msra.mxu0 %v2442_v34  ;;  %v2530_v34 = vld [vmem:[%s3569_s1 + $0x430] ss:$8 sps:$4 sm:$0xff]  }
  0x5c   :  { %1750 = vmatpush1.bf16.msra.mxu1 %v2445_v35  ;;  %1710 = vmatprep.subr.bf16.mxu0 %v2450_v38  ;;  %v2533_v35 = vld [vmem:[%s3569_s1 + $0x530] ss:$8 sps:$4 sm:$0xff]   ;;  %v2536_v38 = vld [vmem:[%s3569_s1 + $0x420] ss:$8 sps:$4 sm:$0xff]  }
  0x5d   :  { %1751 = vmatprep.subr.bf16.mxu1 %v2453_v39  ;;  %v2539_v39 = vld [vmem:[%s3569_s1 + $0x520] ss:$8 sps:$4 sm:$0xff]  }
  0x5f   :  { %1711 = vmatpush1.bf16.msra.mxu0 %v2448_v40  ;;  %v2544_v40 = vld [vmem:[%s3569_s1 + $0x414] ss:$8 sps:$4 sm:$0xff]  }
  0x60   :  { %1752 = vmatpush1.bf16.msra.mxu1 %v2451_v41  ;;  %1712 = vmatprep.subr.bf16.mxu0 %v2456_v42  ;;  %v2547_v41 = vld [vmem:[%s3569_s1 + $0x514] ss:$8 sps:$4 sm:$0xff]   ;;  %v2542_v42 = vld [vmem:[%s3569_s1 + $0x410] ss:$8 sps:$4 sm:$0xff]  }
  0x61   :  { %1753 = vmatprep.subr.bf16.mxu1 %v2459_v43  ;;  %v2545_v43 = vld [vmem:[%s3569_s1 + $0x510] ss:$8 sps:$4 sm:$0xff]  }
  0x63   :  { %1713 = vmatpush2.bf16.msra.mxu0 %v2454_v44  ;;  %v2550_v44 = vld [vmem:[%s3569_s1 + $0x404] ss:$8 sps:$4 sm:$0xff]  }
  0x64   :  { %1754 = vmatpush2.bf16.msra.mxu1 %v2457_v45  ;;  %1714 = vmatprep.subr.bf16.mxu0 %v2462_v46  ;;  %v2553_v45 = vld [vmem:[%s3569_s1 + $0x504] ss:$8 sps:$4 sm:$0xff]   ;;  %v2548_v46 = vld [vmem:[%s3569_s1 + $0x400] ss:$8 sps:$4 sm:$0xff]  }
  0x65   :  { %1755 = vmatprep.subr.bf16.mxu1 %v2465_v47  ;;  %v2551_v47 = vld [vmem:[%s3569_s1 + $0x500] ss:$8 sps:$4 sm:$0xff]  }
  0x67   :  { %1715 = vmatpush2.bf16.msra.mxu0 %v2460_v48  ;;  %v2556_v48 = vld [vmem:[%s3569_s1 + $0x4f4] ss:$8 sps:$4 sm:$0xff]  }
  0x68   :  { %1756 = vmatpush2.bf16.msra.mxu1 %v2463_v49  ;;  %1716 = vmatprep.subr.bf16.mxu0 %v2468_v50  ;;  %v2559_v49 = vld [vmem:[%s3569_s1 + $0x5f4] ss:$8 sps:$4 sm:$0xff]   ;;  %v2554_v50 = vld [vmem:[%s3569_s1 + $0x4f0] ss:$8 sps:$4 sm:$0xff]  }
  0x69   :  { %1757 = vmatprep.subr.bf16.mxu1 %v2471_v51  ;;  %v2557_v51 = vld [vmem:[%s3569_s1 + $0x5f0] ss:$8 sps:$4 sm:$0xff]  }
  0x6b   :  { %1717 = vmatpush2.bf16.msra.mxu0 %v2466_v52  ;;  %v2562_v52 = vld [vmem:[%s3569_s1 + $0x4e4] ss:$8 sps:$4 sm:$0xff]  }
  0x6c   :  { %1758 = vmatpush2.bf16.msra.mxu1 %v2469_v53  ;;  %1718 = vmatprep.subr.bf16.mxu0 %v2474_v54  ;;  %v2565_v53 = vld [vmem:[%s3569_s1 + $0x5e4] ss:$8 sps:$4 sm:$0xff]   ;;  %v2560_v54 = vld [vmem:[%s3569_s1 + $0x4e0] ss:$8 sps:$4 sm:$0xff]  }
  0x6d   :  { %1759 = vmatprep.subr.bf16.mxu1 %v2477_v55  ;;  %v2563_v55 = vld [vmem:[%s3569_s1 + $0x5e0] ss:$8 sps:$4 sm:$0xff]  }
  0x6f   :  { %1719 = vmatpush2.bf16.msra.mxu0 %v2472_v56  ;;  %v2568_v56 = vld [vmem:[%s3569_s1 + $0x4d4] ss:$8 sps:$4 sm:$0xff]  }
  0x70   :  { %1760 = vmatpush2.bf16.msra.mxu1 %v2475_v57  ;;  %1720 = vmatprep.subr.bf16.mxu0 %v2480_v58  ;;  %v2571_v57 = vld [vmem:[%s3569_s1 + $0x5d4] ss:$8 sps:$4 sm:$0xff]   ;;  %v2566_v58 = vld [vmem:[%s3569_s1 + $0x4d0] ss:$8 sps:$4 sm:$0xff]  }
  0x71   :  { %1761 = vmatprep.subr.bf16.mxu1 %v2483_v59  ;;  %v2569_v59 = vld [vmem:[%s3569_s1 + $0x5d0] ss:$8 sps:$4 sm:$0xff]  }
  0x73   :  { %1721 = vmatpush2.bf16.msra.mxu0 %v2478_v60  ;;  %v2574_v60 = vld [vmem:[%s3569_s1 + $0x4c4] ss:$8 sps:$4 sm:$0xff]  }
  0x74   :  { %1762 = vmatpush2.bf16.msra.mxu1 %v2481_v61  ;;  %1722 = vmatprep.subr.bf16.mxu0 %v2486_v62  ;;  %v2577_v61 = vld [vmem:[%s3569_s1 + $0x5c4] ss:$8 sps:$4 sm:$0xff]   ;;  %v2572_v62 = vld [vmem:[%s3569_s1 + $0x4c0] ss:$8 sps:$4 sm:$0xff]  }
  0x75   :  { %1763 = vmatprep.subr.bf16.mxu1 %v2489_v63  ;;  %v2575_v63 = vld [vmem:[%s3569_s1 + $0x5c0] ss:$8 sps:$4 sm:$0xff]  }
  0x77   :  { %1723 = vmatpush2.bf16.msra.mxu0 %v2484_v0  ;;  %v2580_v0 = vld [vmem:[%s3569_s1 + $0x4b4] ss:$8 sps:$4 sm:$0xff]  }
  0x78   :  { %1764 = vmatpush2.bf16.msra.mxu1 %v2487_v1  ;;  %1724 = vmatprep.subr.bf16.mxu0 %v2492_v2  ;;  %v2583_v1 = vld [vmem:[%s3569_s1 + $0x5b4] ss:$8 sps:$4 sm:$0xff]   ;;  %v2578_v2 = vld [vmem:[%s3569_s1 + $0x4b0] ss:$8 sps:$4 sm:$0xff]  }
  0x79   :  { %1765 = vmatprep.subr.bf16.mxu1 %v2495_v3  ;;  %v2581_v3 = vld [vmem:[%s3569_s1 + $0x5b0] ss:$8 sps:$4 sm:$0xff]  }
  0x7b   :  { %1725 = vmatpush2.bf16.msra.mxu0 %v2490_v4  ;;  %v2586_v4 = vld [vmem:[%s3569_s1 + $0x4a4] ss:$8 sps:$4 sm:$0xff]  }
  0x7c   :  { %1766 = vmatpush2.bf16.msra.mxu1 %v2493_v5  ;;  %1726 = vmatprep.subr.bf16.mxu0 %v2498_v6  ;;  %v2589_v5 = vld [vmem:[%s3569_s1 + $0x5a4] ss:$8 sps:$4 sm:$0xff]   ;;  %v2584_v6 = vld [vmem:[%s3569_s1 + $0x4a0] ss:$8 sps:$4 sm:$0xff]  }
  0x7d   :  { %1767 = vmatprep.subr.bf16.mxu1 %v2501_v7  ;;  %v2587_v7 = vld [vmem:[%s3569_s1 + $0x5a0] ss:$8 sps:$4 sm:$0xff]  }
  0x7f   :  { %1727 = vmatpush2.bf16.msra.mxu0 %v2496_v8  ;;  %v2592_v8 = vld [vmem:[%s3569_s1 + $0x494] ss:$8 sps:$4 sm:$0xff]  }
  0x80   :  { %1768 = vmatpush2.bf16.msra.mxu1 %v2499_v9  ;;  %1778 = vmatprep.subr.bf16.mxu0 %v2508_v10  ;;  %v2595_v9 = vld [vmem:[%s3569_s1 + $0x594] ss:$8 sps:$4 sm:$0xff]   ;;  %v2590_v10 = vld [vmem:[%s3569_s1 + $0x490] ss:$8 sps:$4 sm:$0xff]  }
  0x81   :  { %1819 = vmatprep.subr.bf16.mxu1 %v2511_v11  ;;  %v2593_v11 = vld [vmem:[%s3569_s1 + $0x590] ss:$8 sps:$4 sm:$0xff]  }
  0x82   :  { %1729 = vmatmul.mubr.bf16.vlgmr.msra.gmra.mxu0 %v2035_v12  ;;  %v2598_v12 = vld [vmem:[%s3569_s1 + $0x484] ss:$8 sps:$4 sm:$0xff]  }
  0x83   :  { %1770 = vmatmul.mubr.bf16.vlgmr.msra.gmra.mxu1 %v2037_v13  ;;  %1779 = vmatpush1.bf16.msra.mxu0 %v2506_v14  ;;  %v2601_v13 = vld [vmem:[%s3569_s1 + $0x584] ss:$8 sps:$4 sm:$0xff]   ;;  %v2596_v14 = vld [vmem:[%s3569_s1 + $0x480] ss:$8 sps:$4 sm:$0xff]  }
  0x84   :  { %1820 = vmatpush1.bf16.msra.mxu1 %v2509_v15  ;;  %1780 = vmatprep.subr.bf16.mxu0 %v2514_v16  ;;  %v2599_v15 = vld [vmem:[%s3569_s1 + $0x580] ss:$8 sps:$4 sm:$0xff]   ;;  %v2608_v16 = vld [vmem:[%s3569_s1 + $0x674] ss:$8 sps:$4 sm:$0xff]  }
  0x85   :  { %1821 = vmatprep.subr.bf16.mxu1 %v2517_v17  ;;  %1810 = vmatprep.mubr.bf16.mxu0 %v2040_v20  ;;  %v2611_v17 = vld [vmem:[%s3569_s1 + $0x774] ss:$8 sps:$4 sm:$0xff]   ;;  %v2039_v20 = vcombine.low %v3161_v18, %v3161_v18  ;;  %v2609_v18 = vld [vmem:[%s3569_s1 + $0x770] ss:$8 sps:$4 sm:$0xff]  }
  0x86   :  { %1851 = vmatprep.mubr.bf16.mxu1 %v2042_v21  ;;  %v2041_v21 = vcombine.low %v3166_v19, %v3166_v19  ;;  %v2614_v19 = vld [vmem:[%s3569_s1 + $0x664] ss:$8 sps:$4 sm:$0xff]  }
  0x87   :  { %1781 = vmatpush1.bf16.msra.mxu0 %v2512_v22  ;;  %v3359_v22 = vld [vmem:[%s3570_s0 + $0x30] sm:$0xff] }
  0x88   :  { %1822 = vmatpush1.bf16.msra.mxu1 %v2515_v23  ;;  %1782 = vmatprep.subr.bf16.mxu0 %v2520_v24  ;;  %v3364_v23 = vld [vmem:[%s3570_s0 + $0x38] sm:$0xff] }
  0x89   :  { %1823 = vmatprep.subr.bf16.mxu1 %v2523_v25  ;;  %v2606_v24 = vld [vmem:[%s3569_s1 + $0x670] ss:$8 sps:$4 sm:$0xff]   ;;  %v2617_v25 = vld [vmem:[%s3569_s1 + $0x764] ss:$8 sps:$4 sm:$0xff]  }
  0x8b   :  { %1783 = vmatpush1.bf16.msra.mxu0 %v2518_v26  ;;  %v2044_v26 = vcombine.high %v3359_v22, %v3359_v22 }
  0x8c   :  { %1824 = vmatpush1.bf16.msra.mxu1 %v2521_v27  ;;  %1784 = vmatprep.subr.bf16.mxu0 %v2526_v28  ;;  %v2046_v27 = vcombine.high %v3364_v23, %v3364_v23  ;;  %v2612_v28 = vld [vmem:[%s3569_s1 + $0x660] ss:$8 sps:$4 sm:$0xff]  }
  0x8d   :  { %1825 = vmatprep.subr.bf16.mxu1 %v2529_v29  ;;  %v2615_v29 = vld [vmem:[%s3569_s1 + $0x760] ss:$8 sps:$4 sm:$0xff]  }
  0x8f   :  { %1785 = vmatpush1.bf16.msra.mxu0 %v2524_v30  ;;  %v2620_v30 = vld [vmem:[%s3569_s1 + $0x654] ss:$8 sps:$4 sm:$0xff]  }
  0x90   :  { %1826 = vmatpush1.bf16.msra.mxu1 %v2527_v31  ;;  %1786 = vmatprep.subr.bf16.mxu0 %v2532_v32  ;;  %v2623_v31 = vld [vmem:[%s3569_s1 + $0x754] ss:$8 sps:$4 sm:$0xff]   ;;  %v2618_v32 = vld [vmem:[%s3569_s1 + $0x650] ss:$8 sps:$4 sm:$0xff]  }
  0x91   :  { %1827 = vmatprep.subr.bf16.mxu1 %v2535_v33  ;;  %v2621_v33 = vld [vmem:[%s3569_s1 + $0x750] ss:$8 sps:$4 sm:$0xff]  }
  0x93   :  { %1787 = vmatpush1.bf16.msra.mxu0 %v2530_v34  ;;  %v2626_v34 = vld [vmem:[%s3569_s1 + $0x644] ss:$8 sps:$4 sm:$0xff]  }
  0x94   :  { %1828 = vmatpush1.bf16.msra.mxu1 %v2533_v35  ;;  %1788 = vmatprep.subr.bf16.mxu0 %v2538_v36  ;;  %v2629_v35 = vld [vmem:[%s3569_s1 + $0x744] ss:$8 sps:$4 sm:$0xff]   ;;  %v2624_v36 = vld [vmem:[%s3569_s1 + $0x640] ss:$8 sps:$4 sm:$0xff]  }
  0x95   :  { %1829 = vmatprep.subr.bf16.mxu1 %v2541_v37  ;;  %v2627_v37 = vld [vmem:[%s3569_s1 + $0x740] ss:$8 sps:$4 sm:$0xff]  }
  0x97   :  { %1789 = vmatpush1.bf16.msra.mxu0 %v2536_v38  ;;  %v2632_v38 = vld [vmem:[%s3569_s1 + $0x634] ss:$8 sps:$4 sm:$0xff]  }
  0x98   :  { %1830 = vmatpush1.bf16.msra.mxu1 %v2539_v39  ;;  %1790 = vmatprep.subr.bf16.mxu0 %v2544_v40  ;;  %v2635_v39 = vld [vmem:[%s3569_s1 + $0x734] ss:$8 sps:$4 sm:$0xff]   ;;  %v2630_v40 = vld [vmem:[%s3569_s1 + $0x630] ss:$8 sps:$4 sm:$0xff]  }
  0x99   :  { %1831 = vmatprep.subr.bf16.mxu1 %v2547_v41  ;;  %v2633_v41 = vld [vmem:[%s3569_s1 + $0x730] ss:$8 sps:$4 sm:$0xff]  }
  0x9b   :  { %1791 = vmatpush1.bf16.msra.mxu0 %v2542_v42  ;;  %v2638_v42 = vld [vmem:[%s3569_s1 + $0x624] ss:$8 sps:$4 sm:$0xff]  }
  0x9c   :  { %1832 = vmatpush1.bf16.msra.mxu1 %v2545_v43  ;;  %1792 = vmatprep.subr.bf16.mxu0 %v2550_v44  ;;  %v2641_v43 = vld [vmem:[%s3569_s1 + $0x724] ss:$8 sps:$4 sm:$0xff]   ;;  %v2636_v44 = vld [vmem:[%s3569_s1 + $0x620] ss:$8 sps:$4 sm:$0xff]  }
  0x9d   :  { %1833 = vmatprep.subr.bf16.mxu1 %v2553_v45  ;;  %v2639_v45 = vld [vmem:[%s3569_s1 + $0x720] ss:$8 sps:$4 sm:$0xff]  }
  0x9f   :  { %1793 = vmatpush1.bf16.msra.mxu0 %v2548_v46  ;;  %v2644_v46 = vld [vmem:[%s3569_s1 + $0x614] ss:$8 sps:$4 sm:$0xff]  }
  0xa0   :  { %1834 = vmatpush1.bf16.msra.mxu1 %v2551_v47  ;;  %1794 = vmatprep.subr.bf16.mxu0 %v2556_v48  ;;  %v2647_v47 = vld [vmem:[%s3569_s1 + $0x714] ss:$8 sps:$4 sm:$0xff]   ;;  %v2642_v48 = vld [vmem:[%s3569_s1 + $0x610] ss:$8 sps:$4 sm:$0xff]  }
  0xa1   :  { %1835 = vmatprep.subr.bf16.mxu1 %v2559_v49  ;;  %v2645_v49 = vld [vmem:[%s3569_s1 + $0x710] ss:$8 sps:$4 sm:$0xff]  }
  0xa3   :  { %1795 = vmatpush2.bf16.msra.mxu0 %v2554_v50  ;;  %v2650_v50 = vld [vmem:[%s3569_s1 + $0x604] ss:$8 sps:$4 sm:$0xff]  }
  0xa4   :  { %1836 = vmatpush2.bf16.msra.mxu1 %v2557_v51  ;;  %1796 = vmatprep.subr.bf16.mxu0 %v2562_v52  ;;  %v2653_v51 = vld [vmem:[%s3569_s1 + $0x704] ss:$8 sps:$4 sm:$0xff]   ;;  %v2648_v52 = vld [vmem:[%s3569_s1 + $0x600] ss:$8 sps:$4 sm:$0xff]  }
  0xa5   :  { %1837 = vmatprep.subr.bf16.mxu1 %v2565_v53  ;;  %v2651_v53 = vld [vmem:[%s3569_s1 + $0x700] ss:$8 sps:$4 sm:$0xff]  }
  0xa7   :  { %1797 = vmatpush2.bf16.msra.mxu0 %v2560_v54  ;;  %v2656_v54 = vld [vmem:[%s3569_s1 + $0x6f4] ss:$8 sps:$4 sm:$0xff]  }
  0xa8   :  { %1838 = vmatpush2.bf16.msra.mxu1 %v2563_v55  ;;  %1798 = vmatprep.subr.bf16.mxu0 %v2568_v56  ;;  %v2659_v55 = vld [vmem:[%s3569_s1 + $0x7f4] ss:$8 sps:$4 sm:$0xff]   ;;  %v2654_v56 = vld [vmem:[%s3569_s1 + $0x6f0] ss:$8 sps:$4 sm:$0xff]  }
  0xa9   :  { %1839 = vmatprep.subr.bf16.mxu1 %v2571_v57  ;;  %v2657_v57 = vld [vmem:[%s3569_s1 + $0x7f0] ss:$8 sps:$4 sm:$0xff]  }
  0xab   :  { %1799 = vmatpush2.bf16.msra.mxu0 %v2566_v58  ;;  %v2662_v58 = vld [vmem:[%s3569_s1 + $0x6e4] ss:$8 sps:$4 sm:$0xff]  }
  0xac   :  { %1840 = vmatpush2.bf16.msra.mxu1 %v2569_v59  ;;  %1800 = vmatprep.subr.bf16.mxu0 %v2574_v60  ;;  %v2665_v59 = vld [vmem:[%s3569_s1 + $0x7e4] ss:$8 sps:$4 sm:$0xff]   ;;  %v2660_v60 = vld [vmem:[%s3569_s1 + $0x6e0] ss:$8 sps:$4 sm:$0xff]  }
  0xad   :  { %1841 = vmatprep.subr.bf16.mxu1 %v2577_v61  ;;  %v2663_v61 = vld [vmem:[%s3569_s1 + $0x7e0] ss:$8 sps:$4 sm:$0xff]  }
  0xaf   :  { %1801 = vmatpush2.bf16.msra.mxu0 %v2572_v62  ;;  %v2668_v62 = vld [vmem:[%s3569_s1 + $0x6d4] ss:$8 sps:$4 sm:$0xff]  }
  0xb0   :  { %1842 = vmatpush2.bf16.msra.mxu1 %v2575_v63  ;;  %1802 = vmatprep.subr.bf16.mxu0 %v2580_v0  ;;  %v2671_v63 = vld [vmem:[%s3569_s1 + $0x7d4] ss:$8 sps:$4 sm:$0xff]   ;;  %v2666_v0 = vld [vmem:[%s3569_s1 + $0x6d0] ss:$8 sps:$4 sm:$0xff]  }
  0xb1   :  { %1843 = vmatprep.subr.bf16.mxu1 %v2583_v1  ;;  %v2669_v1 = vld [vmem:[%s3569_s1 + $0x7d0] ss:$8 sps:$4 sm:$0xff]  }
  0xb3   :  { %1803 = vmatpush2.bf16.msra.mxu0 %v2578_v2  ;;  %v2674_v2 = vld [vmem:[%s3569_s1 + $0x6c4] ss:$8 sps:$4 sm:$0xff]  }
  0xb4   :  { %1844 = vmatpush2.bf16.msra.mxu1 %v2581_v3  ;;  %1804 = vmatprep.subr.bf16.mxu0 %v2586_v4  ;;  %v2677_v3 = vld [vmem:[%s3569_s1 + $0x7c4] ss:$8 sps:$4 sm:$0xff]   ;;  %v2672_v4 = vld [vmem:[%s3569_s1 + $0x6c0] ss:$8 sps:$4 sm:$0xff]  }
  0xb5   :  { %1845 = vmatprep.subr.bf16.mxu1 %v2589_v5  ;;  %v2675_v5 = vld [vmem:[%s3569_s1 + $0x7c0] ss:$8 sps:$4 sm:$0xff]  }
  0xb7   :  { %1805 = vmatpush2.bf16.msra.mxu0 %v2584_v6  ;;  %v2680_v6 = vld [vmem:[%s3569_s1 + $0x6b4] ss:$8 sps:$4 sm:$0xff]  }
  0xb8   :  { %1846 = vmatpush2.bf16.msra.mxu1 %v2587_v7  ;;  %1806 = vmatprep.subr.bf16.mxu0 %v2592_v8  ;;  %v2683_v7 = vld [vmem:[%s3569_s1 + $0x7b4] ss:$8 sps:$4 sm:$0xff]   ;;  %v2678_v8 = vld [vmem:[%s3569_s1 + $0x6b0] ss:$8 sps:$4 sm:$0xff]  }
  0xb9   :  { %1847 = vmatprep.subr.bf16.mxu1 %v2595_v9  ;;  %v2681_v9 = vld [vmem:[%s3569_s1 + $0x7b0] ss:$8 sps:$4 sm:$0xff]  }
  0xbb   :  { %1807 = vmatpush2.bf16.msra.mxu0 %v2590_v10  ;;  %v2686_v10 = vld [vmem:[%s3569_s1 + $0x6a4] ss:$8 sps:$4 sm:$0xff]  }
  0xbc   :  { %1848 = vmatpush2.bf16.msra.mxu1 %v2593_v11  ;;  %1808 = vmatprep.subr.bf16.mxu0 %v2598_v12  ;;  %v2689_v11 = vld [vmem:[%s3569_s1 + $0x7a4] ss:$8 sps:$4 sm:$0xff]   ;;  %v2684_v12 = vld [vmem:[%s3569_s1 + $0x6a0] ss:$8 sps:$4 sm:$0xff]  }
  0xbd   :  { %1849 = vmatprep.subr.bf16.mxu1 %v2601_v13  ;;  %v2687_v13 = vld [vmem:[%s3569_s1 + $0x7a0] ss:$8 sps:$4 sm:$0xff]  }
  0xbf   :  { %1809 = vmatpush2.bf16.msra.mxu0 %v2596_v14  ;;  %v2692_v14 = vld [vmem:[%s3569_s1 + $0x694] ss:$8 sps:$4 sm:$0xff]  }
  0xc0   :  { %1850 = vmatpush2.bf16.msra.mxu1 %v2599_v15  ;;  %1860 = vmatprep.subr.bf16.mxu0 %v2608_v16  ;;  %v2695_v15 = vld [vmem:[%s3569_s1 + $0x794] ss:$8 sps:$4 sm:$0xff]   ;;  %v2690_v16 = vld [vmem:[%s3569_s1 + $0x690] ss:$8 sps:$4 sm:$0xff]  }
  0xc1   :  { %1901 = vmatprep.subr.bf16.mxu1 %v2611_v17  ;;  %v2693_v17 = vld [vmem:[%s3569_s1 + $0x790] ss:$8 sps:$4 sm:$0xff]  }
  0xc2   :  { %1811 = vmatmul.mubr.bf16.vlgmr.msra.gmra.mxu0 %v2039_v20  ;;  %v2698_v20 = vld [vmem:[%s3569_s1 + $0x684] ss:$8 sps:$4 sm:$0xff]  }
  0xc3   :  { %1852 = vmatmul.mubr.bf16.vlgmr.msra.gmra.mxu1 %v2041_v21  ;;  %1861 = vmatpush1.bf16.msra.mxu0 %v2606_v24  ;;  %v2701_v21 = vld [vmem:[%s3569_s1 + $0x784] ss:$8 sps:$4 sm:$0xff]   ;;  %v2696_v24 = vld [vmem:[%s3569_s1 + $0x680] ss:$8 sps:$4 sm:$0xff]  }
  0xc4   :  { %1902 = vmatpush1.bf16.msra.mxu1 %v2609_v18  ;;  %1862 = vmatprep.subr.bf16.mxu0 %v2614_v19  ;;  %v2699_v18 = vld [vmem:[%s3569_s1 + $0x780] ss:$8 sps:$4 sm:$0xff]   ;;  %v2043_v19 = vcombine.low %v3359_v22, %v3359_v22 }
  0xc5   :  { %1903 = vmatprep.subr.bf16.mxu1 %v2617_v25  ;;  %1892 = vmatprep.mubr.bf16.mxu0 %v2044_v26  ;;  %v2045_v25 = vcombine.low %v3364_v23, %v3364_v23 }
  0xc6   :  { %1933 = vmatprep.mubr.bf16.mxu1 %v2046_v27 }
  0xc7   :  { %1863 = vmatpush1.bf16.msra.mxu0 %v2612_v28 }
  0xc8   :  { %1904 = vmatpush1.bf16.msra.mxu1 %v2615_v29  ;;  %1864 = vmatprep.subr.bf16.mxu0 %v2620_v30 }
  0xc9   :  { %1905 = vmatprep.subr.bf16.mxu1 %v2623_v31 }
  0xcb   :  { %1865 = vmatpush1.bf16.msra.mxu0 %v2618_v32 }
  0xcc   :  { %1906 = vmatpush1.bf16.msra.mxu1 %v2621_v33  ;;  %1866 = vmatprep.subr.bf16.mxu0 %v2626_v34 }
  0xcd   :  { %1907 = vmatprep.subr.bf16.mxu1 %v2629_v35 }
  0xcf   :  { %1867 = vmatpush1.bf16.msra.mxu0 %v2624_v36 }
  0xd0   :  { %1908 = vmatpush1.bf16.msra.mxu1 %v2627_v37  ;;  %1868 = vmatprep.subr.bf16.mxu0 %v2632_v38 }
  0xd1   :  { %1909 = vmatprep.subr.bf16.mxu1 %v2635_v39 }
  0xd3   :  { %1869 = vmatpush1.bf16.msra.mxu0 %v2630_v40 }
  0xd4   :  { %1910 = vmatpush1.bf16.msra.mxu1 %v2633_v41  ;;  %1870 = vmatprep.subr.bf16.mxu0 %v2638_v42 }
  0xd5   :  { %1911 = vmatprep.subr.bf16.mxu1 %v2641_v43 }
  0xd7   :  { %1871 = vmatpush1.bf16.msra.mxu0 %v2636_v44 }
  0xd8   :  { %1912 = vmatpush1.bf16.msra.mxu1 %v2639_v45  ;;  %1872 = vmatprep.subr.bf16.mxu0 %v2644_v46 }
  0xd9   :  { %1913 = vmatprep.subr.bf16.mxu1 %v2647_v47 }
  0xdb   :  { %1873 = vmatpush1.bf16.msra.mxu0 %v2642_v48 }
  0xdc   :  { %1914 = vmatpush1.bf16.msra.mxu1 %v2645_v49  ;;  %1874 = vmatprep.subr.bf16.mxu0 %v2650_v50 }
  0xdd   :  { %1915 = vmatprep.subr.bf16.mxu1 %v2653_v51 }
  0xdf   :  { %1875 = vmatpush1.bf16.msra.mxu0 %v2648_v52 }
  0xe0   :  { %1916 = vmatpush1.bf16.msra.mxu1 %v2651_v53  ;;  %1876 = vmatprep.subr.bf16.mxu0 %v2656_v54 }
  0xe1   :  { %1917 = vmatprep.subr.bf16.mxu1 %v2659_v55 }
  0xe3   :  { %1877 = vmatpush2.bf16.msra.mxu0 %v2654_v56 }
  0xe4   :  { %1918 = vmatpush2.bf16.msra.mxu1 %v2657_v57  ;;  %1878 = vmatprep.subr.bf16.mxu0 %v2662_v58 }
  0xe5   :  { %1919 = vmatprep.subr.bf16.mxu1 %v2665_v59 }
  0xe7   :  { %1879 = vmatpush2.bf16.msra.mxu0 %v2660_v60 }
  0xe8   :  { %1920 = vmatpush2.bf16.msra.mxu1 %v2663_v61  ;;  %1880 = vmatprep.subr.bf16.mxu0 %v2668_v62 }
  0xe9   :  { %1921 = vmatprep.subr.bf16.mxu1 %v2671_v63 }
  0xeb   :  { %1881 = vmatpush2.bf16.msra.mxu0 %v2666_v0 }
  0xec   :  { %1922 = vmatpush2.bf16.msra.mxu1 %v2669_v1  ;;  %1882 = vmatprep.subr.bf16.mxu0 %v2674_v2 }
  0xed   :  { %1923 = vmatprep.subr.bf16.mxu1 %v2677_v3 }
  0xef   :  { %1883 = vmatpush2.bf16.msra.mxu0 %v2672_v4 }
  0xf0   :  { %1924 = vmatpush2.bf16.msra.mxu1 %v2675_v5  ;;  %1884 = vmatprep.subr.bf16.mxu0 %v2680_v6 }
  0xf1   :  { %1925 = vmatprep.subr.bf16.mxu1 %v2683_v7 }
  0xf3   :  { %1885 = vmatpush2.bf16.msra.mxu0 %v2678_v8 }
  0xf4   :  { %1926 = vmatpush2.bf16.msra.mxu1 %v2681_v9  ;;  %1886 = vmatprep.subr.bf16.mxu0 %v2686_v10 }
  0xf5   :  { %1927 = vmatprep.subr.bf16.mxu1 %v2689_v11 }
  0xf7   :  { %1887 = vmatpush2.bf16.msra.mxu0 %v2684_v12 }
  0xf8   :  { %1928 = vmatpush2.bf16.msra.mxu1 %v2687_v13  ;;  %1888 = vmatprep.subr.bf16.mxu0 %v2692_v14  ;;  %v2706_v13 = vmov 1966171168  }
  0xf9   :  { %1929 = vmatprep.subr.bf16.mxu1 %v2695_v15  ;;  %v1981_v14 = vunpack.c.l.s4 %v2706_v13 }
  0xfb   :  { %1889 = vmatpush2.bf16.msra.mxu0 %v2690_v16 }
  0xfc   :  { %1930 = vmatpush2.bf16.msra.mxu1 %v2693_v17  ;;  %1890 = vmatprep.subr.bf16.mxu0 %v2698_v20  ;;  %v1983_v20 = vlaneseq }
  0xfd   :  { %1931 = vmatprep.subr.bf16.mxu1 %v2701_v21 }
  0xfe   :  { %vm1997_vm0 = vcmp.lt.s32.totalorder %v1983_v20, 256 }
  0xff   :  { %1891 = vmatpush2.bf16.msra.mxu0 %v2696_v24 }
 0x100   :  { %1932 = vmatpush2.bf16.msra.mxu1 %v2699_v18 }
 0x102   :  { %v1648_v26 = vpop.f32.mrf.mxu0  ;;  %1893 = vmatmul.mubr.bf16.vlgmr.msra.gmra.mxu0 %v2043_v19 }
 0x103   :  { %v1689_v27 = vpop.f32.mrf.mxu1  ;;  %1934 = vmatmul.mubr.bf16.vlgmr.msra.gmra.mxu1 %v2045_v25 }
 0x104   :  { %v1690_v28 = vadd.f32 %v1689_v27, %v1648_v26  ;;  %v1650_v29 = vpop.f32.mrf.mxu0  ;;  %v1982_v26 = vunpack.c.0.s8 %v1981_v14 }
 0x105   :  { %v1691_v30 = vpop.f32.mrf.mxu1 }
 0x106   :  { %v1692_v31 = vadd.f32 %v1691_v30, %v1650_v29  ;;  %v1652_v32 = vpop.f32.mrf.mxu0  ;;  %v1984_v30 = vshrl.u32 %v1983_v20, 7 }
 0x107   :  { %v1693_v33 = vpop.f32.mrf.mxu1 }
 0x108   :  { %v1653_v34 = vpop.f32.mrf.mxu0 }
 0x109   :  { %v1694_v35 = vpop.f32.mrf.mxu1 }
 0x142   :  { %v1730_v36 = vpop.f32.mrf.mxu0 }
 0x143   :  { %v1771_v37 = vpop.f32.mrf.mxu1  ;;  %v1731_v22 = vadd.f32 %v1730_v36, %v1690_v28 }
 0x144   :  { %v1732_v38 = vpop.f32.mrf.mxu0 }
 0x145   :  { %v1773_v39 = vpop.f32.mrf.mxu1  ;;  %v1772_v23 = vadd.f32 %v1771_v37, %v1731_v22  ;;  %v1733_v40 = vadd.f32 %v1732_v38, %v1692_v31  ;;  %v1985_v37 = vsub.s32 %v1982_v26, %v1984_v30 }
 0x146   :  { %v1734_v41 = vpop.f32.mrf.mxu0 }
 0x147   :  { %v1775_v42 = vpop.f32.mrf.mxu1  ;;  %v1774_v43 = vadd.f32 %v1773_v39, %v1733_v40 }
 0x148   :  { %v1735_v44 = vpop.f32.mrf.mxu0 }
 0x149   :  { %v1776_v45 = vpop.f32.mrf.mxu1 }
 0x182   :  { %v1812_v46 = vpop.f32.mrf.mxu0 }
 0x183   :  { %v1853_v47 = vpop.f32.mrf.mxu1  ;;  %v1813_v48 = vadd.f32 %v1812_v46, %v1772_v23 }
 0x184   :  { %v1814_v49 = vpop.f32.mrf.mxu0 }
 0x185   :  { %v1855_v50 = vpop.f32.mrf.mxu1  ;;  %v1854_v51 = vadd.f32 %v1853_v47, %v1813_v48  ;;  %v1815_v56 = vadd.f32 %v1814_v49, %v1774_v43 }
 0x186   :  { %v1816_v52 = vpop.f32.mrf.mxu0 }
 0x187   :  { %v1857_v53 = vpop.f32.mrf.mxu1  ;;  %v1856_v59 = vadd.f32 %v1855_v50, %v1815_v56 }
 0x188   :  { %v1817_v54 = vpop.f32.mrf.mxu0 }
 0x189   :  { %v1858_v55 = vpop.f32.mrf.mxu1 }
 0x1c2   :  { %v1894_v57 = vpop.f32.mrf.mxu0 }
 0x1c3   :  { %v1935_v58 = vpop.f32.mrf.mxu1  ;;  %v1895_v60 = vadd.f32 %v1894_v57, %v1854_v51 }
 0x1c4   :  { %v1896_v61 = vpop.f32.mrf.mxu0 }
 0x1c5   :  { %v1937_v62 = vpop.f32.mrf.mxu1  ;;  %v1936_v63 = vadd.f32 %v1935_v58, %v1895_v60  ;;  %v1897_v0 = vadd.f32 %v1896_v61, %v1856_v59 }
 0x1c6   :  { %v1898_v1 = vpop.f32.mrf.mxu0 }
 0x1c7   :  { %v1939_v2 = vpop.f32.mrf.mxu1  ;;  %v1951_v3 = vrot.slane %v1936_v63, 4  ;;  %v1963_v4 = vmul.f32 %v1936_v63, %v1936_v63  ;;  %v1938_v5 = vadd.f32 %v1937_v62, %v1897_v0 }
 0x1c8   :  { %v1899_v6 = vpop.f32.mrf.mxu0 }
 0x1c9   :  { %v1940_v7 = vpop.f32.mrf.mxu1  ;;  %v1952_v8 = vadd.f32 %v1951_v3, %v1936_v63  ;;  %v1965_v9 = vrot.slane %v1963_v4, 4  ;;  %v2304_v10 = vpack.c.bf16 %v1938_v5, %v1936_v63  ;;  %v1957_v11 = vrot.slane %v1938_v5, 4 }
 0x1ca   :  { %v1964_v12 = vmul.f32 %v1938_v5, %v1938_v5 }
 0x1cb   :  { %v1953_v15 = vrot.slane %v1952_v8, 2  ;;  %v1966_v16 = vadd.f32 %v1965_v9, %v1963_v4  ;;  %1950 = vst [vmem:[%s3571_s2] sm:$0xff] %v2304_v10  ;;  %v1958_v17 = vadd.f32 %v1957_v11, %v1938_v5 }
 0x1cc   :  { %v1971_v21 = vrot.slane %v1964_v12, 4 }
 0x1cd   :  { %v1954_v24 = vadd.f32 %v1953_v15, %v1952_v8  ;;  %v1967_v18 = vrot.slane %v1966_v16, 2  ;;  %v1959_v19 = vrot.slane %v1958_v17, 2 }
 0x1ce   :  { %v1972_v25 = vadd.f32 %v1971_v21, %v1964_v12 }
 0x1cf   :  { %v1955_v27 = vrot.slane %v1954_v24, 1  ;;  %v1968_v28 = vadd.f32 %v1967_v18, %v1966_v16  ;;  %v1960_v29 = vadd.f32 %v1959_v19, %v1958_v17 }
 0x1d0   :  { %v1973_v31 = vrot.slane %v1972_v25, 2 }
 0x1d1   :  { %v1961_v32 = vrot.slane %v1960_v29, 1  ;;  %v1969_v33 = vrot.slane %v1968_v28, 1  ;;  %v1956_v35 = vadd.f32 %v1955_v27, %v1954_v24 }
 0x1d2   :  { %v1974_v34 = vadd.f32 %v1973_v31, %v1972_v25 }
 0x1d3   :  { %v1962_v36 = vadd.f32 %v1961_v32, %v1960_v29  ;;  %v1970_v39 = vadd.f32 %v1969_v33, %v1968_v28 }
 0x1d4   :  { %v1975_v22 = vrot.slane %v1974_v34, 1 }
 0x1d5   :  { %v1979_v38 = vcombine.low %v1956_v35, %v1962_v36 }
 0x1d6   :  { %v1976_v23 = vadd.f32 %v1975_v22, %v1974_v34 }
 0x1d7   :  { %v1986_v40 = vrot.slane %v1979_v38, %v1985_v37 }
 0x1d8   :  { %v2002_v41 = vcombine.low %v1970_v39, %v1976_v23 }
 0x1d9   :  { %v1993_v42 = vrot.slane %v1986_v40, %v1985_v37 }
 0x1da   :  { %v2009_v43 = vrot.slane %v2002_v41, %v1985_v37 }
 0x1db   :  { %1999 = vst.msk [vmem:[%s3572_s3] sm:$0x3] %vm1997_vm0, %v1993_v42 }
 0x1dc   :  { %v2016_v44 = vrot.slane %v2009_v43, %v1985_v37 }
 0x1de   :  { %2018 = vst.msk [vmem:[%s3573_s4] sm:$0x3] %vm1997_vm0, %v2016_v44 }

// kernel: discriminator_forward.11
= control target key start
LH: loop header
LB: loop body
LE: loop exit
PB: predicated region body
PF: predicated region fallthrough
CT: control target
= control target key end

     0   :  { %s4617_s1 = inlined_call_operand.vmem [shape: bf16[4096,128], index: 1, kind: input, shape index: {}]   ;;  %s4618_s0 = inlined_call_operand.vmem [shape: bf16[8,4096], index: 0, kind: input, shape index: {}]   ;;  %s4619_s2 = inlined_call_operand.vmem [shape: f32[1,128], index: 2, kind: input, shape index: {}]   ;;  %s4620_s3 = inlined_call_operand.vmem [shape: f32[8,128], index: 3, kind: output, shape index: {}]  }
   0x1   :  { %v3484_v0 = vld [vmem:[%s4617_s1 + $0x78] sm:$0xff]   ;;  %v3488_v4 = vld [vmem:[%s4617_s1 + $0x70] sm:$0xff]   ;;  %v3492_v8 = vld [vmem:[%s4617_s1 + $0x68] sm:$0xff]  }
   0x2   :  { %v3485_v1 = vld [vmem:[%s4617_s1 + $0xf8] sm:$0xff]   ;;  %3132 = vmatprep.subr.bf16.mxu0 %v3484_v0  ;;  %v3489_v5 = vld [vmem:[%s4617_s1 + $0xf0] sm:$0xff]   ;;  %v3493_v9 = vld [vmem:[%s4617_s1 + $0xe8] sm:$0xff]  }
   0x3   :  { %v3486_v2 = vld [vmem:[%s4617_s1 + $0x38] sm:$0xff]   ;;  %3154 = vmatprep.subr.bf16.mxu1 %v3485_v1  ;;  %v3490_v6 = vld [vmem:[%s4617_s1 + $0x30] sm:$0xff]   ;;  %v3494_v10 = vld [vmem:[%s4617_s1 + $0x28] sm:$0xff]  }
   0x4   :  { %v3487_v3 = vld [vmem:[%s4617_s1 + $0xb8] sm:$0xff]   ;;  %3133 = vmatpush3.bf16.msra.mxu0 %v3486_v2  ;;  %v3491_v7 = vld [vmem:[%s4617_s1 + $0xb0] sm:$0xff]   ;;  %v3495_v11 = vld [vmem:[%s4617_s1 + $0xa8] sm:$0xff]  }
   0x5   :  { %3155 = vmatpush3.bf16.msra.mxu1 %v3487_v3  ;;  %3134 = vmatprep.subr.bf16.mxu0 %v3488_v4  ;;  %v3496_v12 = vld [vmem:[%s4617_s1 + $0x60] sm:$0xff]   ;;  %v3500_v16 = vld [vmem:[%s4617_s1 + $0x58] sm:$0xff]   ;;  %v3504_v20 = vld [vmem:[%s4617_s1 + $0x50] sm:$0xff]  }
   0x6   :  { %3156 = vmatprep.subr.bf16.mxu1 %v3489_v5  ;;  %v3497_v13 = vld [vmem:[%s4617_s1 + $0xe0] sm:$0xff]   ;;  %v3501_v17 = vld [vmem:[%s4617_s1 + $0xd8] sm:$0xff]   ;;  %v3505_v21 = vld [vmem:[%s4617_s1 + $0xd0] sm:$0xff]  }
   0x7   :  { %v3498_v14 = vld [vmem:[%s4617_s1 + $0x20] sm:$0xff]   ;;  %v3502_v18 = vld [vmem:[%s4617_s1 + $0x18] sm:$0xff]   ;;  %v3506_v22 = vld [vmem:[%s4617_s1 + $0x10] sm:$0xff]  }
   0x8   :  { %3135 = vmatpush3.bf16.msra.mxu0 %v3490_v6  ;;  %v3499_v15 = vld [vmem:[%s4617_s1 + $0xa0] sm:$0xff]   ;;  %v3503_v19 = vld [vmem:[%s4617_s1 + $0x98] sm:$0xff]   ;;  %v3507_v23 = vld [vmem:[%s4617_s1 + $0x90] sm:$0xff]  }
   0x9   :  { %3157 = vmatpush3.bf16.msra.mxu1 %v3491_v7  ;;  %3136 = vmatprep.subr.bf16.mxu0 %v3492_v8  ;;  %v3508_v24 = vld [vmem:[%s4617_s1 + $0x48] sm:$0xff]   ;;  %v3512_v28 = vld [vmem:[%s4617_s1 + $0x40] sm:$0xff]   ;;  %v3520_v38 = vld [vmem:[%s4617_s1 + $0x178] sm:$0xff]  }
   0xa   :  { %3158 = vmatprep.subr.bf16.mxu1 %v3493_v9  ;;  %v3509_v25 = vld [vmem:[%s4617_s1 + $0xc8] sm:$0xff]   ;;  %v3513_v29 = vld [vmem:[%s4617_s1 + $0xc0] sm:$0xff]   ;;  %v3521_v39 = vld [vmem:[%s4617_s1 + $0x1f8] sm:$0xff]  }
   0xb   :  { %v3510_v26 = vld [vmem:[%s4617_s1 + $0x8] sm:$0xff]   ;;  %v3514_v30 = vld [vmem:[%s4617_s1] sm:$0xff]   ;;  %v3522_v40 = vld [vmem:[%s4617_s1 + $0x138] sm:$0xff]  }
   0xc   :  { %3137 = vmatpush3.bf16.msra.mxu0 %v3494_v10  ;;  %v3511_v27 = vld [vmem:[%s4617_s1 + $0x88] sm:$0xff]   ;;  %v3515_v31 = vld [vmem:[%s4617_s1 + $0x80] sm:$0xff]   ;;  %v3523_v41 = vld [vmem:[%s4617_s1 + $0x1b8] sm:$0xff]  }
   0xd   :  { %3159 = vmatpush3.bf16.msra.mxu1 %v3495_v11  ;;  %3138 = vmatprep.subr.bf16.mxu0 %v3496_v12  ;;  %v15_v32 = vld [vmem:[%s4618_s0] sm:$0xff]  ;;  %v16_v33 = vld [vmem:[%s4618_s0 + $0x8] sm:$0xff]  ;;  %v3524_v42 = vld [vmem:[%s4617_s1 + $0x170] sm:$0xff]  }
   0xe   :  { %3160 = vmatprep.subr.bf16.mxu1 %v3497_v13  ;;  %v2844_v34 = vcombine.low %v15_v32, %v15_v32  ;;  %v2845_v35 = vcombine.high %v15_v32, %v15_v32  ;;  %v2846_v36 = vcombine.low %v16_v33, %v16_v33  ;;  %v2847_v37 = vcombine.high %v16_v33, %v16_v33  ;;  %v3525_v43 = vld [vmem:[%s4617_s1 + $0x1f0] sm:$0xff]   ;;  %v3528_v46 = vld [vmem:[%s4617_s1 + $0x168] sm:$0xff]   ;;  %v3532_v50 = vld [vmem:[%s4617_s1 + $0x160] sm:$0xff]  }
   0xf   :  { %v3526_v44 = vld [vmem:[%s4617_s1 + $0x130] sm:$0xff]   ;;  %v3529_v47 = vld [vmem:[%s4617_s1 + $0x1e8] sm:$0xff]   ;;  %v3533_v51 = vld [vmem:[%s4617_s1 + $0x1e0] sm:$0xff]  }
  0x10   :  { %3139 = vmatpush3.bf16.msra.mxu0 %v3498_v14  ;;  %2230 = vmatprep.mubr.bf16.mxu0 %v2845_v35  ;;  %v3527_v45 = vld [vmem:[%s4617_s1 + $0x1b0] sm:$0xff]   ;;  %v3530_v48 = vld [vmem:[%s4617_s1 + $0x128] sm:$0xff]   ;;  %v3534_v52 = vld [vmem:[%s4617_s1 + $0x120] sm:$0xff]  }
  0x11   :  { %3161 = vmatpush3.bf16.msra.mxu1 %v3499_v15  ;;  %3140 = vmatprep.subr.bf16.mxu0 %v3500_v16  ;;  %v3531_v49 = vld [vmem:[%s4617_s1 + $0x1a8] sm:$0xff]   ;;  %v3535_v53 = vld [vmem:[%s4617_s1 + $0x1a0] sm:$0xff]   ;;  %v3536_v54 = vld [vmem:[%s4617_s1 + $0x158] sm:$0xff]  }
  0x12   :  { %3162 = vmatprep.subr.bf16.mxu1 %v3501_v17  ;;  %2270 = vmatprep.mubr.bf16.mxu1 %v2847_v37  ;;  %v3537_v55 = vld [vmem:[%s4617_s1 + $0x1d8] sm:$0xff]   ;;  %v3540_v58 = vld [vmem:[%s4617_s1 + $0x150] sm:$0xff]   ;;  %v3544_v62 = vld [vmem:[%s4617_s1 + $0x148] sm:$0xff]  }
  0x13   :  { %v3538_v56 = vld [vmem:[%s4617_s1 + $0x118] sm:$0xff]   ;;  %v3541_v59 = vld [vmem:[%s4617_s1 + $0x1d0] sm:$0xff]   ;;  %v3545_v63 = vld [vmem:[%s4617_s1 + $0x1c8] sm:$0xff]  }
  0x14   :  { %3141 = vmatpush3.bf16.msra.mxu0 %v3502_v18  ;;  %v3539_v57 = vld [vmem:[%s4617_s1 + $0x198] sm:$0xff]   ;;  %v3542_v60 = vld [vmem:[%s4617_s1 + $0x110] sm:$0xff]   ;;  %v3546_v0 = vld [vmem:[%s4617_s1 + $0x108] sm:$0xff]  }
  0x15   :  { %3163 = vmatpush3.bf16.msra.mxu1 %v3503_v19  ;;  %3142 = vmatprep.subr.bf16.mxu0 %v3504_v20  ;;  %v3543_v61 = vld [vmem:[%s4617_s1 + $0x190] sm:$0xff]   ;;  %v3547_v1 = vld [vmem:[%s4617_s1 + $0x188] sm:$0xff]   ;;  %v3548_v2 = vld [vmem:[%s4617_s1 + $0x140] sm:$0xff]  }
  0x16   :  { %3164 = vmatprep.subr.bf16.mxu1 %v3505_v21  ;;  %v3549_v3 = vld [vmem:[%s4617_s1 + $0x1c0] sm:$0xff]   ;;  %v17_v6 = vld [vmem:[%s4618_s0 + $0x10] sm:$0xff]  ;;  %v18_v9 = vld [vmem:[%s4618_s0 + $0x18] sm:$0xff] }
  0x17   :  { %v3550_v4 = vld [vmem:[%s4617_s1 + $0x100] sm:$0xff]   ;;  %v2848_v7 = vcombine.low %v17_v6, %v17_v6  ;;  %v2849_v8 = vcombine.high %v17_v6, %v17_v6  ;;  %v2850_v10 = vcombine.low %v18_v9, %v18_v9  ;;  %v2851_v11 = vcombine.high %v18_v9, %v18_v9  ;;  %v3556_v12 = vld [vmem:[%s4617_s1 + $0x278] sm:$0xff]   ;;  %v3560_v16 = vld [vmem:[%s4617_s1 + $0x270] sm:$0xff]  }
  0x18   :  { %3143 = vmatpush3.bf16.msra.mxu0 %v3506_v22  ;;  %v3551_v5 = vld [vmem:[%s4617_s1 + $0x180] sm:$0xff]   ;;  %v3557_v13 = vld [vmem:[%s4617_s1 + $0x2f8] sm:$0xff]   ;;  %v3561_v17 = vld [vmem:[%s4617_s1 + $0x2f0] sm:$0xff]  }
  0x19   :  { %3165 = vmatpush3.bf16.msra.mxu1 %v3507_v23  ;;  %3144 = vmatprep.subr.bf16.mxu0 %v3508_v24  ;;  %v3558_v14 = vld [vmem:[%s4617_s1 + $0x238] sm:$0xff]   ;;  %v3562_v18 = vld [vmem:[%s4617_s1 + $0x230] sm:$0xff]   ;;  %v3564_v20 = vld [vmem:[%s4617_s1 + $0x268] sm:$0xff]  }
  0x1a   :  { %3166 = vmatprep.subr.bf16.mxu1 %v3509_v25  ;;  %v3559_v15 = vld [vmem:[%s4617_s1 + $0x2b8] sm:$0xff]   ;;  %v3563_v19 = vld [vmem:[%s4617_s1 + $0x2b0] sm:$0xff]   ;;  %v3565_v21 = vld [vmem:[%s4617_s1 + $0x2e8] sm:$0xff]  }
  0x1b   :  { %v3566_v22 = vld [vmem:[%s4617_s1 + $0x228] sm:$0xff]   ;;  %v3568_v24 = vld [vmem:[%s4617_s1 + $0x260] sm:$0xff]   ;;  %v3576_v32 = vld [vmem:[%s4617_s1 + $0x250] sm:$0xff]  }
  0x1c   :  { %3145 = vmatpush3.bf16.msra.mxu0 %v3510_v26  ;;  %v3567_v23 = vld [vmem:[%s4617_s1 + $0x2a8] sm:$0xff]   ;;  %v3569_v25 = vld [vmem:[%s4617_s1 + $0x2e0] sm:$0xff]   ;;  %v3577_v33 = vld [vmem:[%s4617_s1 + $0x2d0] sm:$0xff]  }
  0x1d   :  { %3167 = vmatpush3.bf16.msra.mxu1 %v3511_v27  ;;  %3146 = vmatprep.subr.bf16.mxu0 %v3512_v28  ;;  %v3570_v26 = vld [vmem:[%s4617_s1 + $0x220] sm:$0xff]   ;;  %v3572_v28 = vld [vmem:[%s4617_s1 + $0x258] sm:$0xff]   ;;  %v3579_v35 = vld [vmem:[%s4617_s1 + $0x290] sm:$0xff]  }
  0x1e   :  { %3168 = vmatprep.subr.bf16.mxu1 %v3513_v29  ;;  %v3571_v27 = vld [vmem:[%s4617_s1 + $0x2a0] sm:$0xff]   ;;  %v3573_v29 = vld [vmem:[%s4617_s1 + $0x2d8] sm:$0xff]   ;;  %v3581_v37 = vld [vmem:[%s4617_s1 + $0x2c8] sm:$0xff]  }
  0x1f   :  { %v3612_v6 = vld [vmem:[%s4617_s1 + $0x350] sm:$0xff]  }
  0x20   :  { %3147 = vmatpush3.bf16.msra.mxu0 %v3514_v30  ;;  %v3574_v30 = vld [vmem:[%s4617_s1 + $0x218] sm:$0xff]   ;;  %v3615_v9 = vld [vmem:[%s4617_s1 + $0x390] sm:$0xff]  }
  0x21   :  { %3169 = vmatpush3.bf16.msra.mxu1 %v3515_v31  ;;  %3176 = vmatprep.subr.bf16.mxu0 %v3520_v38  ;;  %v3575_v31 = vld [vmem:[%s4617_s1 + $0x298] sm:$0xff]   ;;  %v3582_v38 = vld [vmem:[%s4617_s1 + $0x208] sm:$0xff]  }
  0x22   :  { %3198 = vmatprep.subr.bf16.mxu1 %v3521_v39  ;;  %v3583_v39 = vld [vmem:[%s4617_s1 + $0x288] sm:$0xff]  }
  0x23   :  { %2231 = vmatmul.mubr.bf16.vlgmr.msra.gmra.mxu0 %v2844_v34  ;;  %v3578_v34 = vld [vmem:[%s4617_s1 + $0x210] sm:$0xff]  }
  0x24   :  { %2271 = vmatmul.mubr.bf16.vlgmr.msra.gmra.mxu1 %v2846_v36  ;;  %3177 = vmatpush3.bf16.msra.mxu0 %v3522_v40  ;;  %v3580_v36 = vld [vmem:[%s4617_s1 + $0x248] sm:$0xff]   ;;  %v3584_v40 = vld [vmem:[%s4617_s1 + $0x240] sm:$0xff]  }
  0x25   :  { %3199 = vmatpush3.bf16.msra.mxu1 %v3523_v41  ;;  %3178 = vmatprep.subr.bf16.mxu0 %v3524_v42  ;;  %v3585_v41 = vld [vmem:[%s4617_s1 + $0x2c0] sm:$0xff]  }
  0x26   :  { %3200 = vmatprep.subr.bf16.mxu1 %v3525_v43  ;;  %2310 = vmatprep.mubr.bf16.mxu0 %v2849_v8  ;;  %v3586_v42 = vld [vmem:[%s4617_s1 + $0x200] sm:$0xff]   ;;  %v3614_v8 = vld [vmem:[%s4617_s1 + $0x310] sm:$0xff]  }
  0x27   :  { %2350 = vmatprep.mubr.bf16.mxu1 %v2851_v11  ;;  %v3587_v43 = vld [vmem:[%s4617_s1 + $0x280] sm:$0xff]   ;;  %v3617_v11 = vld [vmem:[%s4617_s1 + $0x3c8] sm:$0xff]  }
  0x28   :  { %3179 = vmatpush3.bf16.msra.mxu0 %v3526_v44  ;;  %v19_v44 = vld [vmem:[%s4618_s0 + $0x20] sm:$0xff] }
  0x29   :  { %3201 = vmatpush3.bf16.msra.mxu1 %v3527_v45  ;;  %3180 = vmatprep.subr.bf16.mxu0 %v3528_v46  ;;  %v20_v45 = vld [vmem:[%s4618_s0 + $0x28] sm:$0xff]  ;;  %v2852_v46 = vcombine.low %v19_v44, %v19_v44 }
  0x2a   :  { %3202 = vmatprep.subr.bf16.mxu1 %v3529_v47  ;;  %v2853_v47 = vcombine.high %v19_v44, %v19_v44  ;;  %v3648_v44 = vld [vmem:[%s4617_s1 + $0x450] sm:$0xff]  }
  0x2c   :  { %3181 = vmatpush3.bf16.msra.mxu0 %v3530_v48  ;;  %v2854_v48 = vcombine.low %v20_v45, %v20_v45 }
  0x2d   :  { %3203 = vmatpush3.bf16.msra.mxu1 %v3531_v49  ;;  %3182 = vmatprep.subr.bf16.mxu0 %v3532_v50  ;;  %v2855_v49 = vcombine.high %v20_v45, %v20_v45  ;;  %v3592_v50 = vld [vmem:[%s4617_s1 + $0x378] sm:$0xff]   ;;  %v3649_v45 = vld [vmem:[%s4617_s1 + $0x4d0] sm:$0xff]  }
  0x2e   :  { %3204 = vmatprep.subr.bf16.mxu1 %v3533_v51  ;;  %v3593_v51 = vld [vmem:[%s4617_s1 + $0x3f8] sm:$0xff]  }
  0x30   :  { %3183 = vmatpush3.bf16.msra.mxu0 %v3534_v52  ;;  %v3594_v52 = vld [vmem:[%s4617_s1 + $0x338] sm:$0xff]  }
  0x31   :  { %3205 = vmatpush3.bf16.msra.mxu1 %v3535_v53  ;;  %3184 = vmatprep.subr.bf16.mxu0 %v3536_v54  ;;  %v3595_v53 = vld [vmem:[%s4617_s1 + $0x3b8] sm:$0xff]   ;;  %v3596_v54 = vld [vmem:[%s4617_s1 + $0x370] sm:$0xff]  }
  0x32   :  { %3206 = vmatprep.subr.bf16.mxu1 %v3537_v55  ;;  %v3597_v55 = vld [vmem:[%s4617_s1 + $0x3f0] sm:$0xff]  }
  0x34   :  { %3185 = vmatpush3.bf16.msra.mxu0 %v3538_v56  ;;  %v3598_v56 = vld [vmem:[%s4617_s1 + $0x330] sm:$0xff]  }
  0x35   :  { %3207 = vmatpush3.bf16.msra.mxu1 %v3539_v57  ;;  %3186 = vmatprep.subr.bf16.mxu0 %v3540_v58  ;;  %v3599_v57 = vld [vmem:[%s4617_s1 + $0x3b0] sm:$0xff]   ;;  %v3600_v58 = vld [vmem:[%s4617_s1 + $0x368] sm:$0xff]  }
  0x36   :  { %3208 = vmatprep.subr.bf16.mxu1 %v3541_v59  ;;  %v3601_v59 = vld [vmem:[%s4617_s1 + $0x3e8] sm:$0xff]  }
  0x38   :  { %3187 = vmatpush3.bf16.msra.mxu0 %v3542_v60  ;;  %v3602_v60 = vld [vmem:[%s4617_s1 + $0x328] sm:$0xff]  }
  0x39   :  { %3209 = vmatpush3.bf16.msra.mxu1 %v3543_v61  ;;  %3188 = vmatprep.subr.bf16.mxu0 %v3544_v62  ;;  %v3603_v61 = vld [vmem:[%s4617_s1 + $0x3a8] sm:$0xff]   ;;  %v3604_v62 = vld [vmem:[%s4617_s1 + $0x360] sm:$0xff]  }
  0x3a   :  { %3210 = vmatprep.subr.bf16.mxu1 %v3545_v63  ;;  %v3605_v63 = vld [vmem:[%s4617_s1 + $0x3e0] sm:$0xff]  }
  0x3c   :  { %3189 = vmatpush3.bf16.msra.mxu0 %v3546_v0  ;;  %v3606_v0 = vld [vmem:[%s4617_s1 + $0x320] sm:$0xff]  }
  0x3d   :  { %3211 = vmatpush3.bf16.msra.mxu1 %v3547_v1  ;;  %3190 = vmatprep.subr.bf16.mxu0 %v3548_v2  ;;  %v3607_v1 = vld [vmem:[%s4617_s1 + $0x3a0] sm:$0xff]   ;;  %v3608_v2 = vld [vmem:[%s4617_s1 + $0x358] sm:$0xff]  }
  0x3e   :  { %3212 = vmatprep.subr.bf16.mxu1 %v3549_v3  ;;  %v3609_v3 = vld [vmem:[%s4617_s1 + $0x3d8] sm:$0xff]  }
  0x40   :  { %3191 = vmatpush3.bf16.msra.mxu0 %v3550_v4  ;;  %v3610_v4 = vld [vmem:[%s4617_s1 + $0x318] sm:$0xff]  }
  0x41   :  { %3213 = vmatpush3.bf16.msra.mxu1 %v3551_v5  ;;  %3220 = vmatprep.subr.bf16.mxu0 %v3556_v12  ;;  %v3611_v5 = vld [vmem:[%s4617_s1 + $0x398] sm:$0xff]   ;;  %v3618_v12 = vld [vmem:[%s4617_s1 + $0x308] sm:$0xff]  }
  0x42   :  { %3242 = vmatprep.subr.bf16.mxu1 %v3557_v13  ;;  %v3619_v13 = vld [vmem:[%s4617_s1 + $0x388] sm:$0xff]  }
  0x43   :  { %2311 = vmatmul.mubr.bf16.vlgmr.msra.gmra.mxu0 %v2848_v7  ;;  %v3613_v7 = vld [vmem:[%s4617_s1 + $0x3d0] sm:$0xff]  }
  0x44   :  { %2351 = vmatmul.mubr.bf16.vlgmr.msra.gmra.mxu1 %v2850_v10  ;;  %3221 = vmatpush3.bf16.msra.mxu0 %v3558_v14  ;;  %v3616_v10 = vld [vmem:[%s4617_s1 + $0x348] sm:$0xff]   ;;  %v3620_v14 = vld [vmem:[%s4617_s1 + $0x340] sm:$0xff]  }
  0x45   :  { %3243 = vmatpush3.bf16.msra.mxu1 %v3559_v15  ;;  %3222 = vmatprep.subr.bf16.mxu0 %v3560_v16  ;;  %v3621_v15 = vld [vmem:[%s4617_s1 + $0x3c0] sm:$0xff]  }
  0x46   :  { %3244 = vmatprep.subr.bf16.mxu1 %v3561_v17  ;;  %2390 = vmatprep.mubr.bf16.mxu0 %v2853_v47  ;;  %v3622_v16 = vld [vmem:[%s4617_s1 + $0x300] sm:$0xff]   ;;  %v3651_v47 = vld [vmem:[%s4617_s1 + $0x490] sm:$0xff]  }
  0x47   :  { %2430 = vmatprep.mubr.bf16.mxu1 %v2855_v49  ;;  %v3623_v17 = vld [vmem:[%s4617_s1 + $0x380] sm:$0xff]   ;;  %v3653_v49 = vld [vmem:[%s4617_s1 + $0x4c8] sm:$0xff]  }
  0x48   :  { %3223 = vmatpush3.bf16.msra.mxu0 %v3562_v18  ;;  %v21_v18 = vld [vmem:[%s4618_s0 + $0x30] sm:$0xff] }
  0x49   :  { %3245 = vmatpush3.bf16.msra.mxu1 %v3563_v19  ;;  %3224 = vmatprep.subr.bf16.mxu0 %v3564_v20  ;;  %v22_v19 = vld [vmem:[%s4618_s0 + $0x38] sm:$0xff]  ;;  %v2856_v20 = vcombine.low %v21_v18, %v21_v18 }
  0x4a   :  { %3246 = vmatprep.subr.bf16.mxu1 %v3565_v21  ;;  %v2857_v21 = vcombine.high %v21_v18, %v21_v18  ;;  %v3684_v18 = vld [vmem:[%s4617_s1 + $0x550] sm:$0xff]  }
  0x4c   :  { %3225 = vmatpush3.bf16.msra.mxu0 %v3566_v22  ;;  %v2858_v22 = vcombine.low %v22_v19, %v22_v19 }
  0x4d   :  { %3247 = vmatpush3.bf16.msra.mxu1 %v3567_v23  ;;  %3226 = vmatprep.subr.bf16.mxu0 %v3568_v24  ;;  %v3628_v23 = vld [vmem:[%s4617_s1 + $0x478] sm:$0xff]   ;;  %v2859_v24 = vcombine.high %v22_v19, %v22_v19  ;;  %v3685_v19 = vld [vmem:[%s4617_s1 + $0x5d0] sm:$0xff]  }
  0x4e   :  { %3248 = vmatprep.subr.bf16.mxu1 %v3569_v25  ;;  %v3629_v25 = vld [vmem:[%s4617_s1 + $0x4f8] sm:$0xff]  }
  0x50   :  { %3227 = vmatpush3.bf16.msra.mxu0 %v3570_v26  ;;  %v3630_v26 = vld [vmem:[%s4617_s1 + $0x438] sm:$0xff]  }
  0x51   :  { %3249 = vmatpush3.bf16.msra.mxu1 %v3571_v27  ;;  %3228 = vmatprep.subr.bf16.mxu0 %v3572_v28  ;;  %v3631_v27 = vld [vmem:[%s4617_s1 + $0x4b8] sm:$0xff]   ;;  %v3632_v28 = vld [vmem:[%s4617_s1 + $0x470] sm:$0xff]  }
  0x52   :  { %3250 = vmatprep.subr.bf16.mxu1 %v3573_v29  ;;  %v3633_v29 = vld [vmem:[%s4617_s1 + $0x4f0] sm:$0xff]  }
  0x54   :  { %3229 = vmatpush3.bf16.msra.mxu0 %v3574_v30  ;;  %v3634_v30 = vld [vmem:[%s4617_s1 + $0x430] sm:$0xff]  }
  0x55   :  { %3251 = vmatpush3.bf16.msra.mxu1 %v3575_v31  ;;  %3230 = vmatprep.subr.bf16.mxu0 %v3576_v32  ;;  %v3635_v31 = vld [vmem:[%s4617_s1 + $0x4b0] sm:$0xff]   ;;  %v3636_v32 = vld [vmem:[%s4617_s1 + $0x468] sm:$0xff]  }
  0x56   :  { %3252 = vmatprep.subr.bf16.mxu1 %v3577_v33  ;;  %v3637_v33 = vld [vmem:[%s4617_s1 + $0x4e8] sm:$0xff]  }
  0x58   :  { %3231 = vmatpush3.bf16.msra.mxu0 %v3578_v34  ;;  %v3638_v34 = vld [vmem:[%s4617_s1 + $0x428] sm:$0xff]  }
  0x59   :  { %3253 = vmatpush3.bf16.msra.mxu1 %v3579_v35  ;;  %3232 = vmatprep.subr.bf16.mxu0 %v3580_v36  ;;  %v3639_v35 = vld [vmem:[%s4617_s1 + $0x4a8] sm:$0xff]   ;;  %v3640_v36 = vld [vmem:[%s4617_s1 + $0x460] sm:$0xff]  }
  0x5a   :  { %3254 = vmatprep.subr.bf16.mxu1 %v3581_v37  ;;  %v3641_v37 = vld [vmem:[%s4617_s1 + $0x4e0] sm:$0xff]  }
  0x5c   :  { %3233 = vmatpush3.bf16.msra.mxu0 %v3582_v38  ;;  %v3642_v38 = vld [vmem:[%s4617_s1 + $0x420] sm:$0xff]  }
  0x5d   :  { %3255 = vmatpush3.bf16.msra.mxu1 %v3583_v39  ;;  %3234 = vmatprep.subr.bf16.mxu0 %v3584_v40  ;;  %v3643_v39 = vld [vmem:[%s4617_s1 + $0x4a0] sm:$0xff]   ;;  %v3644_v40 = vld [vmem:[%s4617_s1 + $0x458] sm:$0xff]  }
  0x5e   :  { %3256 = vmatprep.subr.bf16.mxu1 %v3585_v41  ;;  %v3645_v41 = vld [vmem:[%s4617_s1 + $0x4d8] sm:$0xff]  }
  0x60   :  { %3235 = vmatpush3.bf16.msra.mxu0 %v3586_v42  ;;  %v3646_v42 = vld [vmem:[%s4617_s1 + $0x418] sm:$0xff]  }
  0x61   :  { %3257 = vmatpush3.bf16.msra.mxu1 %v3587_v43  ;;  %3264 = vmatprep.subr.bf16.mxu0 %v3592_v50  ;;  %v3647_v43 = vld [vmem:[%s4617_s1 + $0x498] sm:$0xff]   ;;  %v3654_v50 = vld [vmem:[%s4617_s1 + $0x408] sm:$0xff]  }
  0x62   :  { %3286 = vmatprep.subr.bf16.mxu1 %v3593_v51  ;;  %v3655_v51 = vld [vmem:[%s4617_s1 + $0x488] sm:$0xff]  }
  0x63   :  { %2391 = vmatmul.mubr.bf16.vlgmr.msra.gmra.mxu0 %v2852_v46  ;;  %v3650_v46 = vld [vmem:[%s4617_s1 + $0x410] sm:$0xff]  }
  0x64   :  { %2431 = vmatmul.mubr.bf16.vlgmr.msra.gmra.mxu1 %v2854_v48  ;;  %3265 = vmatpush3.bf16.msra.mxu0 %v3594_v52  ;;  %v3652_v48 = vld [vmem:[%s4617_s1 + $0x448] sm:$0xff]   ;;  %v3656_v52 = vld [vmem:[%s4617_s1 + $0x440] sm:$0xff]  }
  0x65   :  { %3287 = vmatpush3.bf16.msra.mxu1 %v3595_v53  ;;  %3266 = vmatprep.subr.bf16.mxu0 %v3596_v54  ;;  %v3657_v53 = vld [vmem:[%s4617_s1 + $0x4c0] sm:$0xff]  }
  0x66   :  { %3288 = vmatprep.subr.bf16.mxu1 %v3597_v55  ;;  %2470 = vmatprep.mubr.bf16.mxu0 %v2857_v21  ;;  %v3658_v54 = vld [vmem:[%s4617_s1 + $0x400] sm:$0xff]   ;;  %v3687_v21 = vld [vmem:[%s4617_s1 + $0x590] sm:$0xff]  }
  0x67   :  { %2510 = vmatprep.mubr.bf16.mxu1 %v2859_v24  ;;  %v3659_v55 = vld [vmem:[%s4617_s1 + $0x480] sm:$0xff]   ;;  %v3690_v24 = vld [vmem:[%s4617_s1 + $0x508] sm:$0xff]  }
  0x68   :  { %3267 = vmatpush3.bf16.msra.mxu0 %v3598_v56  ;;  %v23_v56 = vld [vmem:[%s4618_s0 + $0x40] sm:$0xff] }
  0x69   :  { %3289 = vmatpush3.bf16.msra.mxu1 %v3599_v57  ;;  %3268 = vmatprep.subr.bf16.mxu0 %v3600_v58  ;;  %v2860_v57 = vcombine.low %v23_v56, %v23_v56  ;;  %v2861_v58 = vcombine.high %v23_v56, %v23_v56  ;;  %v3720_v56 = vld [vmem:[%s4617_s1 + $0x650] sm:$0xff]  }
  0x6a   :  { %3290 = vmatprep.subr.bf16.mxu1 %v3601_v59  ;;  %v24_v59 = vld [vmem:[%s4618_s0 + $0x48] sm:$0xff] }
  0x6c   :  { %3269 = vmatpush3.bf16.msra.mxu0 %v3602_v60  ;;  %v2862_v60 = vcombine.low %v24_v59, %v24_v59 }
  0x6d   :  { %3291 = vmatpush3.bf16.msra.mxu1 %v3603_v61  ;;  %3270 = vmatprep.subr.bf16.mxu0 %v3604_v62  ;;  %v2863_v61 = vcombine.high %v24_v59, %v24_v59  ;;  %v3664_v62 = vld [vmem:[%s4617_s1 + $0x578] sm:$0xff]   ;;  %v3723_v59 = vld [vmem:[%s4617_s1 + $0x690] sm:$0xff]  }
  0x6e   :  { %3292 = vmatprep.subr.bf16.mxu1 %v3605_v63  ;;  %v3665_v63 = vld [vmem:[%s4617_s1 + $0x5f8] sm:$0xff]  }
  0x70   :  { %3271 = vmatpush3.bf16.msra.mxu0 %v3606_v0  ;;  %v3666_v0 = vld [vmem:[%s4617_s1 + $0x538] sm:$0xff]  }
  0x71   :  { %3293 = vmatpush3.bf16.msra.mxu1 %v3607_v1  ;;  %3272 = vmatprep.subr.bf16.mxu0 %v3608_v2  ;;  %v3667_v1 = vld [vmem:[%s4617_s1 + $0x5b8] sm:$0xff]   ;;  %v3668_v2 = vld [vmem:[%s4617_s1 + $0x570] sm:$0xff]  }
  0x72   :  { %3294 = vmatprep.subr.bf16.mxu1 %v3609_v3  ;;  %v3669_v3 = vld [vmem:[%s4617_s1 + $0x5f0] sm:$0xff]  }
  0x74   :  { %3273 = vmatpush3.bf16.msra.mxu0 %v3610_v4  ;;  %v3670_v4 = vld [vmem:[%s4617_s1 + $0x530] sm:$0xff]  }
  0x75   :  { %3295 = vmatpush3.bf16.msra.mxu1 %v3611_v5  ;;  %3274 = vmatprep.subr.bf16.mxu0 %v3612_v6  ;;  %v3671_v5 = vld [vmem:[%s4617_s1 + $0x5b0] sm:$0xff]   ;;  %v3672_v6 = vld [vmem:[%s4617_s1 + $0x568] sm:$0xff]  }
  0x76   :  { %3296 = vmatprep.subr.bf16.mxu1 %v3613_v7  ;;  %v3673_v7 = vld [vmem:[%s4617_s1 + $0x5e8] sm:$0xff]  }
  0x78   :  { %3275 = vmatpush3.bf16.msra.mxu0 %v3614_v8  ;;  %v3674_v8 = vld [vmem:[%s4617_s1 + $0x528] sm:$0xff]  }
  0x79   :  { %3297 = vmatpush3.bf16.msra.mxu1 %v3615_v9  ;;  %3276 = vmatprep.subr.bf16.mxu0 %v3616_v10  ;;  %v3675_v9 = vld [vmem:[%s4617_s1 + $0x5a8] sm:$0xff]   ;;  %v3676_v10 = vld [vmem:[%s4617_s1 + $0x560] sm:$0xff]  }
  0x7a   :  { %3298 = vmatprep.subr.bf16.mxu1 %v3617_v11  ;;  %v3677_v11 = vld [vmem:[%s4617_s1 + $0x5e0] sm:$0xff]  }
  0x7c   :  { %3277 = vmatpush3.bf16.msra.mxu0 %v3618_v12  ;;  %v3678_v12 = vld [vmem:[%s4617_s1 + $0x520] sm:$0xff]  }
  0x7d   :  { %3299 = vmatpush3.bf16.msra.mxu1 %v3619_v13  ;;  %3278 = vmatprep.subr.bf16.mxu0 %v3620_v14  ;;  %v3679_v13 = vld [vmem:[%s4617_s1 + $0x5a0] sm:$0xff]   ;;  %v3680_v14 = vld [vmem:[%s4617_s1 + $0x558] sm:$0xff]  }
  0x7e   :  { %3300 = vmatprep.subr.bf16.mxu1 %v3621_v15  ;;  %v3681_v15 = vld [vmem:[%s4617_s1 + $0x5d8] sm:$0xff]  }
  0x80   :  { %3279 = vmatpush3.bf16.msra.mxu0 %v3622_v16  ;;  %v3682_v16 = vld [vmem:[%s4617_s1 + $0x518] sm:$0xff]  }
  0x81   :  { %3301 = vmatpush3.bf16.msra.mxu1 %v3623_v17  ;;  %3308 = vmatprep.subr.bf16.mxu0 %v3628_v23  ;;  %v3683_v17 = vld [vmem:[%s4617_s1 + $0x598] sm:$0xff]   ;;  %v3689_v23 = vld [vmem:[%s4617_s1 + $0x5c8] sm:$0xff]  }
  0x82   :  { %3330 = vmatprep.subr.bf16.mxu1 %v3629_v25  ;;  %v3691_v25 = vld [vmem:[%s4617_s1 + $0x588] sm:$0xff]  }
  0x83   :  { %2471 = vmatmul.mubr.bf16.vlgmr.msra.gmra.mxu0 %v2856_v20  ;;  %v3686_v20 = vld [vmem:[%s4617_s1 + $0x510] sm:$0xff]  }
  0x84   :  { %2511 = vmatmul.mubr.bf16.vlgmr.msra.gmra.mxu1 %v2858_v22  ;;  %3309 = vmatpush3.bf16.msra.mxu0 %v3630_v26  ;;  %v3688_v22 = vld [vmem:[%s4617_s1 + $0x548] sm:$0xff]   ;;  %v3692_v26 = vld [vmem:[%s4617_s1 + $0x540] sm:$0xff]  }
  0x85   :  { %3331 = vmatpush3.bf16.msra.mxu1 %v3631_v27  ;;  %3310 = vmatprep.subr.bf16.mxu0 %v3632_v28  ;;  %v3693_v27 = vld [vmem:[%s4617_s1 + $0x5c0] sm:$0xff]  }
  0x86   :  { %3332 = vmatprep.subr.bf16.mxu1 %v3633_v29  ;;  %2550 = vmatprep.mubr.bf16.mxu0 %v2861_v58  ;;  %v3694_v28 = vld [vmem:[%s4617_s1 + $0x500] sm:$0xff]   ;;  %v3722_v58 = vld [vmem:[%s4617_s1 + $0x610] sm:$0xff]  }
  0x87   :  { %2590 = vmatprep.mubr.bf16.mxu1 %v2863_v61  ;;  %v3695_v29 = vld [vmem:[%s4617_s1 + $0x580] sm:$0xff]   ;;  %v3725_v61 = vld [vmem:[%s4617_s1 + $0x6c8] sm:$0xff]  }
  0x88   :  { %3311 = vmatpush3.bf16.msra.mxu0 %v3634_v30  ;;  %v25_v30 = vld [vmem:[%s4618_s0 + $0x50] sm:$0xff] }
  0x89   :  { %3333 = vmatpush3.bf16.msra.mxu1 %v3635_v31  ;;  %3312 = vmatprep.subr.bf16.mxu0 %v3636_v32  ;;  %v26_v31 = vld [vmem:[%s4618_s0 + $0x58] sm:$0xff]  ;;  %v2864_v32 = vcombine.low %v25_v30, %v25_v30 }
  0x8a   :  { %3334 = vmatprep.subr.bf16.mxu1 %v3637_v33  ;;  %v2865_v33 = vcombine.high %v25_v30, %v25_v30  ;;  %v3743_v30 = vld [vmem:[%s4617_s1 + $0x7b0] sm:$0xff]  }
  0x8c   :  { %3313 = vmatpush3.bf16.msra.mxu0 %v3638_v34  ;;  %v2866_v34 = vcombine.low %v26_v31, %v26_v31 }
  0x8d   :  { %3335 = vmatpush3.bf16.msra.mxu1 %v3639_v35  ;;  %3314 = vmatprep.subr.bf16.mxu0 %v3640_v36  ;;  %v2867_v35 = vcombine.high %v26_v31, %v26_v31  ;;  %v3700_v36 = vld [vmem:[%s4617_s1 + $0x678] sm:$0xff]   ;;  %v3744_v31 = vld [vmem:[%s4617_s1 + $0x768] sm:$0xff]  }
  0x8e   :  { %3336 = vmatprep.subr.bf16.mxu1 %v3641_v37  ;;  %v3701_v37 = vld [vmem:[%s4617_s1 + $0x6f8] sm:$0xff]  }
  0x90   :  { %3315 = vmatpush3.bf16.msra.mxu0 %v3642_v38  ;;  %v3702_v38 = vld [vmem:[%s4617_s1 + $0x638] sm:$0xff]  }
  0x91   :  { %3337 = vmatpush3.bf16.msra.mxu1 %v3643_v39  ;;  %3316 = vmatprep.subr.bf16.mxu0 %v3644_v40  ;;  %v3703_v39 = vld [vmem:[%s4617_s1 + $0x6b8] sm:$0xff]   ;;  %v3704_v40 = vld [vmem:[%s4617_s1 + $0x670] sm:$0xff]  }
  0x92   :  { %3338 = vmatprep.subr.bf16.mxu1 %v3645_v41  ;;  %v3705_v41 = vld [vmem:[%s4617_s1 + $0x6f0] sm:$0xff]  }
  0x94   :  { %3317 = vmatpush3.bf16.msra.mxu0 %v3646_v42  ;;  %v3706_v42 = vld [vmem:[%s4617_s1 + $0x630] sm:$0xff]  }
  0x95   :  { %3339 = vmatpush3.bf16.msra.mxu1 %v3647_v43  ;;  %3318 = vmatprep.subr.bf16.mxu0 %v3648_v44  ;;  %v3707_v43 = vld [vmem:[%s4617_s1 + $0x6b0] sm:$0xff]   ;;  %v3708_v44 = vld [vmem:[%s4617_s1 + $0x668] sm:$0xff]  }
  0x96   :  { %3340 = vmatprep.subr.bf16.mxu1 %v3649_v45  ;;  %v3709_v45 = vld [vmem:[%s4617_s1 + $0x6e8] sm:$0xff]  }
  0x98   :  { %3319 = vmatpush3.bf16.msra.mxu0 %v3650_v46  ;;  %v3710_v46 = vld [vmem:[%s4617_s1 + $0x628] sm:$0xff]  }
  0x99   :  { %3341 = vmatpush3.bf16.msra.mxu1 %v3651_v47  ;;  %3320 = vmatprep.subr.bf16.mxu0 %v3652_v48  ;;  %v3711_v47 = vld [vmem:[%s4617_s1 + $0x6a8] sm:$0xff]   ;;  %v3712_v48 = vld [vmem:[%s4617_s1 + $0x660] sm:$0xff]  }
  0x9a   :  { %3342 = vmatprep.subr.bf16.mxu1 %v3653_v49  ;;  %v3713_v49 = vld [vmem:[%s4617_s1 + $0x6e0] sm:$0xff]  }
  0x9c   :  { %3321 = vmatpush3.bf16.msra.mxu0 %v3654_v50  ;;  %v3714_v50 = vld [vmem:[%s4617_s1 + $0x620] sm:$0xff]  }
  0x9d   :  { %3343 = vmatpush3.bf16.msra.mxu1 %v3655_v51  ;;  %3322 = vmatprep.subr.bf16.mxu0 %v3656_v52  ;;  %v3715_v51 = vld [vmem:[%s4617_s1 + $0x6a0] sm:$0xff]   ;;  %v3716_v52 = vld [vmem:[%s4617_s1 + $0x658] sm:$0xff]  }
  0x9e   :  { %3344 = vmatprep.subr.bf16.mxu1 %v3657_v53  ;;  %v3717_v53 = vld [vmem:[%s4617_s1 + $0x6d8] sm:$0xff]  }
  0xa0   :  { %3323 = vmatpush3.bf16.msra.mxu0 %v3658_v54  ;;  %v3718_v54 = vld [vmem:[%s4617_s1 + $0x618] sm:$0xff]  }
  0xa1   :  { %3345 = vmatpush3.bf16.msra.mxu1 %v3659_v55  ;;  %3352 = vmatprep.subr.bf16.mxu0 %v3664_v62  ;;  %v3719_v55 = vld [vmem:[%s4617_s1 + $0x698] sm:$0xff]   ;;  %v3726_v62 = vld [vmem:[%s4617_s1 + $0x608] sm:$0xff]  }
  0xa2   :  { %3374 = vmatprep.subr.bf16.mxu1 %v3665_v63  ;;  %v3727_v63 = vld [vmem:[%s4617_s1 + $0x688] sm:$0xff]  }
  0xa3   :  { %2551 = vmatmul.mubr.bf16.vlgmr.msra.gmra.mxu0 %v2860_v57  ;;  %v3721_v57 = vld [vmem:[%s4617_s1 + $0x6d0] sm:$0xff]  }
  0xa4   :  { %2591 = vmatmul.mubr.bf16.vlgmr.msra.gmra.mxu1 %v2862_v60  ;;  %3353 = vmatpush3.bf16.msra.mxu0 %v3666_v0  ;;  %v3724_v60 = vld [vmem:[%s4617_s1 + $0x648] sm:$0xff]   ;;  %v3728_v0 = vld [vmem:[%s4617_s1 + $0x640] sm:$0xff]  }
  0xa5   :  { %3375 = vmatpush3.bf16.msra.mxu1 %v3667_v1  ;;  %3354 = vmatprep.subr.bf16.mxu0 %v3668_v2  ;;  %v3729_v1 = vld [vmem:[%s4617_s1 + $0x6c0] sm:$0xff]  }
  0xa6   :  { %3376 = vmatprep.subr.bf16.mxu1 %v3669_v3  ;;  %2630 = vmatprep.mubr.bf16.mxu0 %v2865_v33  ;;  %v3730_v2 = vld [vmem:[%s4617_s1 + $0x600] sm:$0xff]   ;;  %v3746_v33 = vld [vmem:[%s4617_s1 + $0x728] sm:$0xff]  }
  0xa7   :  { %2670 = vmatprep.mubr.bf16.mxu1 %v2867_v35  ;;  %v3731_v3 = vld [vmem:[%s4617_s1 + $0x680] sm:$0xff]  }
  0xa8   :  { %3355 = vmatpush3.bf16.msra.mxu0 %v3670_v4  ;;  %v27_v4 = vld [vmem:[%s4618_s0 + $0x60] sm:$0xff] }
  0xa9   :  { %3377 = vmatpush3.bf16.msra.mxu1 %v3671_v5  ;;  %3356 = vmatprep.subr.bf16.mxu0 %v3672_v6  ;;  %v28_v5 = vld [vmem:[%s4618_s0 + $0x68] sm:$0xff]  ;;  %v3748_v35 = vld [vmem:[%s4617_s1 + $0x760] sm:$0xff]  }
  0xaa   :  { %3378 = vmatprep.subr.bf16.mxu1 %v3673_v7 }
  0xac   :  { %3357 = vmatpush3.bf16.msra.mxu0 %v3674_v8  ;;  %v2868_v8 = vcombine.low %v27_v4, %v27_v4 }
  0xad   :  { %3379 = vmatpush3.bf16.msra.mxu1 %v3675_v9  ;;  %3358 = vmatprep.subr.bf16.mxu0 %v3676_v10  ;;  %v2869_v9 = vcombine.high %v27_v4, %v27_v4  ;;  %v2870_v10 = vcombine.low %v28_v5, %v28_v5 }
  0xae   :  { %3380 = vmatprep.subr.bf16.mxu1 %v3677_v11  ;;  %v3736_v11 = vld [vmem:[%s4617_s1 + $0x778] sm:$0xff]  }
  0xb0   :  { %3359 = vmatpush3.bf16.msra.mxu0 %v3678_v12  ;;  %v2871_v12 = vcombine.high %v28_v5, %v28_v5 }
  0xb1   :  { %3381 = vmatpush3.bf16.msra.mxu1 %v3679_v13  ;;  %3360 = vmatprep.subr.bf16.mxu0 %v3680_v14  ;;  %v3737_v13 = vld [vmem:[%s4617_s1 + $0x7f8] sm:$0xff]  }
  0xb2   :  { %3382 = vmatprep.subr.bf16.mxu1 %v3681_v15 }
  0xb4   :  { %3361 = vmatpush3.bf16.msra.mxu0 %v3682_v16  ;;  %v3738_v16 = vld [vmem:[%s4617_s1 + $0x738] sm:$0xff]  }
  0xb5   :  { %3383 = vmatpush3.bf16.msra.mxu1 %v3683_v17  ;;  %3362 = vmatprep.subr.bf16.mxu0 %v3684_v18 }
  0xb6   :  { %3384 = vmatprep.subr.bf16.mxu1 %v3685_v19  ;;  %v3739_v19 = vld [vmem:[%s4617_s1 + $0x7b8] sm:$0xff]  }
  0xb8   :  { %3363 = vmatpush3.bf16.msra.mxu0 %v3686_v20  ;;  %v2843_v20 = vld [vmem:[%s4619_s2] ss:$0 sm:$0xff] }
  0xb9   :  { %3385 = vmatpush3.bf16.msra.mxu1 %v3687_v21  ;;  %3364 = vmatprep.subr.bf16.mxu0 %v3688_v22 }
  0xba   :  { %3386 = vmatprep.subr.bf16.mxu1 %v3689_v23 }
  0xbc   :  { %3365 = vmatpush3.bf16.msra.mxu0 %v3690_v24  ;;  %v3740_v24 = vld [vmem:[%s4617_s1 + $0x770] sm:$0xff]  }
  0xbd   :  { %3387 = vmatpush3.bf16.msra.mxu1 %v3691_v25  ;;  %3366 = vmatprep.subr.bf16.mxu0 %v3692_v26  ;;  %v3741_v25 = vld [vmem:[%s4617_s1 + $0x7f0] sm:$0xff]  }
  0xbe   :  { %3388 = vmatprep.subr.bf16.mxu1 %v3693_v27 }
  0xc0   :  { %3367 = vmatpush3.bf16.msra.mxu0 %v3694_v28 }
  0xc1   :  { %3389 = vmatpush3.bf16.msra.mxu1 %v3695_v29  ;;  %3396 = vmatprep.subr.bf16.mxu0 %v3700_v36  ;;  %v3742_v29 = vld [vmem:[%s4617_s1 + $0x730] sm:$0xff]   ;;  %v3749_v36 = vld [vmem:[%s4617_s1 + $0x7e0] sm:$0xff]  }
  0xc2   :  { %3418 = vmatprep.subr.bf16.mxu1 %v3701_v37  ;;  %v3750_v37 = vld [vmem:[%s4617_s1 + $0x720] sm:$0xff]  }
  0xc3   :  { %2631 = vmatmul.mubr.bf16.vlgmr.msra.gmra.mxu0 %v2864_v32  ;;  %v3745_v32 = vld [vmem:[%s4617_s1 + $0x7e8] sm:$0xff]  }
  0xc4   :  { %2671 = vmatmul.mubr.bf16.vlgmr.msra.gmra.mxu1 %v2866_v34  ;;  %3397 = vmatpush3.bf16.msra.mxu0 %v3702_v38  ;;  %v3747_v34 = vld [vmem:[%s4617_s1 + $0x7a8] sm:$0xff]   ;;  %v3751_v38 = vld [vmem:[%s4617_s1 + $0x7a0] sm:$0xff]  }
  0xc5   :  { %3419 = vmatpush3.bf16.msra.mxu1 %v3703_v39  ;;  %3398 = vmatprep.subr.bf16.mxu0 %v3704_v40  ;;  %v3752_v39 = vld [vmem:[%s4617_s1 + $0x758] sm:$0xff]  }
  0xc6   :  { %3420 = vmatprep.subr.bf16.mxu1 %v3705_v41  ;;  %2710 = vmatprep.mubr.bf16.mxu0 %v2869_v9  ;;  %v3753_v40 = vld [vmem:[%s4617_s1 + $0x7d8] sm:$0xff]  }
  0xc7   :  { %2750 = vmatprep.mubr.bf16.mxu1 %v2871_v12  ;;  %v3754_v41 = vld [vmem:[%s4617_s1 + $0x718] sm:$0xff]  }
  0xc8   :  { %3399 = vmatpush3.bf16.msra.mxu0 %v3706_v42  ;;  %v3755_v42 = vld [vmem:[%s4617_s1 + $0x798] sm:$0xff]  }
  0xc9   :  { %3421 = vmatpush3.bf16.msra.mxu1 %v3707_v43  ;;  %3400 = vmatprep.subr.bf16.mxu0 %v3708_v44  ;;  %v3756_v43 = vld [vmem:[%s4617_s1 + $0x750] sm:$0xff]  }
  0xca   :  { %3422 = vmatprep.subr.bf16.mxu1 %v3709_v45  ;;  %v3757_v44 = vld [vmem:[%s4617_s1 + $0x7d0] sm:$0xff]  }
  0xcb   :  { %v3758_v45 = vld [vmem:[%s4617_s1 + $0x710] sm:$0xff]  }
  0xcc   :  { %3401 = vmatpush3.bf16.msra.mxu0 %v3710_v46  ;;  %v3759_v46 = vld [vmem:[%s4617_s1 + $0x790] sm:$0xff]  }
  0xcd   :  { %3423 = vmatpush3.bf16.msra.mxu1 %v3711_v47  ;;  %3402 = vmatprep.subr.bf16.mxu0 %v3712_v48  ;;  %v3760_v47 = vld [vmem:[%s4617_s1 + $0x748] sm:$0xff]  }
  0xce   :  { %3424 = vmatprep.subr.bf16.mxu1 %v3713_v49  ;;  %v3761_v48 = vld [vmem:[%s4617_s1 + $0x7c8] sm:$0xff]  }
  0xcf   :  { %v3762_v49 = vld [vmem:[%s4617_s1 + $0x708] sm:$0xff]  }
  0xd0   :  { %3403 = vmatpush3.bf16.msra.mxu0 %v3714_v50  ;;  %v3763_v50 = vld [vmem:[%s4617_s1 + $0x788] sm:$0xff]  }
  0xd1   :  { %3425 = vmatpush3.bf16.msra.mxu1 %v3715_v51  ;;  %3404 = vmatprep.subr.bf16.mxu0 %v3716_v52  ;;  %v3764_v51 = vld [vmem:[%s4617_s1 + $0x740] sm:$0xff]  }
  0xd2   :  { %3426 = vmatprep.subr.bf16.mxu1 %v3717_v53  ;;  %v3765_v52 = vld [vmem:[%s4617_s1 + $0x7c0] sm:$0xff]  }
  0xd3   :  { %v3766_v53 = vld [vmem:[%s4617_s1 + $0x700] sm:$0xff]  }
  0xd4   :  { %3405 = vmatpush3.bf16.msra.mxu0 %v3718_v54  ;;  %v3767_v54 = vld [vmem:[%s4617_s1 + $0x780] sm:$0xff]  }
  0xd5   :  { %3427 = vmatpush3.bf16.msra.mxu1 %v3719_v55  ;;  %3406 = vmatprep.subr.bf16.mxu0 %v3720_v56  ;;  %v29_v55 = vld [vmem:[%s4618_s0 + $0x70] sm:$0xff]  ;;  %v30_v56 = vld [vmem:[%s4618_s0 + $0x78] sm:$0xff] }
  0xd6   :  { %3428 = vmatprep.subr.bf16.mxu1 %v3721_v57 }
  0xd8   :  { %3407 = vmatpush3.bf16.msra.mxu0 %v3722_v58 }
  0xd9   :  { %3429 = vmatpush3.bf16.msra.mxu1 %v3723_v59  ;;  %3408 = vmatprep.subr.bf16.mxu0 %v3724_v60  ;;  %v2872_v59 = vcombine.low %v29_v55, %v29_v55  ;;  %v2873_v60 = vcombine.high %v29_v55, %v29_v55 }
  0xda   :  { %3430 = vmatprep.subr.bf16.mxu1 %v3725_v61  ;;  %v2874_v61 = vcombine.low %v30_v56, %v30_v56 }
  0xdc   :  { %3409 = vmatpush3.bf16.msra.mxu0 %v3726_v62  ;;  %v2875_v62 = vcombine.high %v30_v56, %v30_v56 }
  0xdd   :  { %3431 = vmatpush3.bf16.msra.mxu1 %v3727_v63  ;;  %3410 = vmatprep.subr.bf16.mxu0 %v3728_v0 }
  0xde   :  { %3432 = vmatprep.subr.bf16.mxu1 %v3729_v1 }
  0xe0   :  { %3411 = vmatpush3.bf16.msra.mxu0 %v3730_v2 }
  0xe1   :  { %3433 = vmatpush3.bf16.msra.mxu1 %v3731_v3  ;;  %3440 = vmatprep.subr.bf16.mxu0 %v3736_v11 }
  0xe2   :  { %3462 = vmatprep.subr.bf16.mxu1 %v3737_v13 }
  0xe3   :  { %v3148_v6 = vpop.f32.mrf.mxu0  ;;  %2711 = vmatmul.mubr.bf16.vlgmr.msra.gmra.mxu0 %v2868_v8 }
  0xe4   :  { %v3170_v7 = vpop.f32.mrf.mxu1  ;;  %2751 = vmatmul.mubr.bf16.vlgmr.msra.gmra.mxu1 %v2870_v10  ;;  %3441 = vmatpush3.bf16.msra.mxu0 %v3738_v16 }
  0xe5   :  { %v3149_v14 = vpop.f32.mrf.mxu0  ;;  %3463 = vmatpush3.bf16.msra.mxu1 %v3739_v19  ;;  %3442 = vmatprep.subr.bf16.mxu0 %v3740_v24 }
  0xe6   :  { %v3171_v15 = vpop.f32.mrf.mxu1  ;;  %v3150_v17 = vadd.f32 %v3149_v14, %v3148_v6  ;;  %3464 = vmatprep.subr.bf16.mxu1 %v3741_v25  ;;  %2790 = vmatprep.mubr.bf16.mxu0 %v2873_v60 }
  0xe7   :  { %v3172_v18 = vadd.f32 %v3171_v15, %v3170_v7  ;;  %v3151_v21 = vpop.f32.mrf.mxu0  ;;  %2830 = vmatprep.mubr.bf16.mxu1 %v2875_v62 }
  0xe8   :  { %v3173_v22 = vpop.f32.mrf.mxu1  ;;  %v2233_v23 = vadd.f32 %v3150_v17, %v2843_v20  ;;  %3443 = vmatpush3.bf16.msra.mxu0 %v3742_v29 }
  0xe9   :  { %v3152_v26 = vpop.f32.mrf.mxu0  ;;  %3465 = vmatpush3.bf16.msra.mxu1 %v3743_v30  ;;  %3444 = vmatprep.subr.bf16.mxu0 %v3744_v31 }
  0xea   :  { %v3174_v27 = vpop.f32.mrf.mxu1  ;;  %v4527_v28 = vadd.f32 %v3172_v18, %v2233_v23  ;;  %3466 = vmatprep.subr.bf16.mxu1 %v3745_v32 }
  0xec   :  { %3445 = vmatpush3.bf16.msra.mxu0 %v3746_v33 }
  0xed   :  { %3467 = vmatpush3.bf16.msra.mxu1 %v3747_v34  ;;  %3446 = vmatprep.subr.bf16.mxu0 %v3748_v35 }
  0xee   :  { %3468 = vmatprep.subr.bf16.mxu1 %v3749_v36 }
  0xf0   :  { %3447 = vmatpush3.bf16.msra.mxu0 %v3750_v37 }
  0xf1   :  { %3469 = vmatpush3.bf16.msra.mxu1 %v3751_v38  ;;  %3448 = vmatprep.subr.bf16.mxu0 %v3752_v39 }
  0xf2   :  { %3470 = vmatprep.subr.bf16.mxu1 %v3753_v40 }
  0xf4   :  { %3449 = vmatpush3.bf16.msra.mxu0 %v3754_v41 }
  0xf5   :  { %3471 = vmatpush3.bf16.msra.mxu1 %v3755_v42  ;;  %3450 = vmatprep.subr.bf16.mxu0 %v3756_v43 }
  0xf6   :  { %3472 = vmatprep.subr.bf16.mxu1 %v3757_v44 }
  0xf8   :  { %3451 = vmatpush3.bf16.msra.mxu0 %v3758_v45 }
  0xf9   :  { %3473 = vmatpush3.bf16.msra.mxu1 %v3759_v46  ;;  %3452 = vmatprep.subr.bf16.mxu0 %v3760_v47 }
  0xfa   :  { %3474 = vmatprep.subr.bf16.mxu1 %v3761_v48 }
  0xfc   :  { %3453 = vmatpush3.bf16.msra.mxu0 %v3762_v49 }
  0xfd   :  { %3475 = vmatpush3.bf16.msra.mxu1 %v3763_v50  ;;  %3454 = vmatprep.subr.bf16.mxu0 %v3764_v51 }
  0xfe   :  { %3476 = vmatprep.subr.bf16.mxu1 %v3765_v52 }
 0x100   :  { %3455 = vmatpush3.bf16.msra.mxu0 %v3766_v53 }
 0x101   :  { %3477 = vmatpush3.bf16.msra.mxu1 %v3767_v54 }
 0x103   :  { %v3192_v57 = vpop.f32.mrf.mxu0  ;;  %2791 = vmatmul.mubr.bf16.vlgmr.msra.gmra.mxu0 %v2872_v59 }
 0x104   :  { %v3214_v58 = vpop.f32.mrf.mxu1  ;;  %2831 = vmatmul.mubr.bf16.vlgmr.msra.gmra.mxu1 %v2874_v61 }
 0x105   :  { %v3193_v63 = vpop.f32.mrf.mxu0 }
 0x106   :  { %v3215_v0 = vpop.f32.mrf.mxu1  ;;  %v3194_v1 = vadd.f32 %v3193_v63, %v3192_v57 }
 0x107   :  { %v3216_v2 = vadd.f32 %v3215_v0, %v3214_v58  ;;  %v3195_v3 = vpop.f32.mrf.mxu0 }
 0x108   :  { %v3217_v4 = vpop.f32.mrf.mxu1  ;;  %v2313_v5 = vadd.f32 %v3194_v1, %v4527_v28 }
 0x109   :  { %v3196_v6 = vpop.f32.mrf.mxu0 }
 0x10a   :  { %v3218_v7 = vpop.f32.mrf.mxu1  ;;  %v2353_v8 = vadd.f32 %v3216_v2, %v2313_v5 }
 0x123   :  { %v3236_v9 = vpop.f32.mrf.mxu0 }
 0x124   :  { %v3258_v10 = vpop.f32.mrf.mxu1 }
 0x125   :  { %v3237_v11 = vpop.f32.mrf.mxu0 }
 0x126   :  { %v3238_v12 = vadd.f32 %v3237_v11, %v3236_v9  ;;  %v3259_v13 = vpop.f32.mrf.mxu1 }
 0x127   :  { %v3260_v14 = vadd.f32 %v3259_v13, %v3258_v10  ;;  %v3239_v15 = vpop.f32.mrf.mxu0 }
 0x128   :  { %v2393_v16 = vadd.f32 %v3238_v12, %v2353_v8  ;;  %v3261_v17 = vpop.f32.mrf.mxu1 }
 0x129   :  { %v3240_v18 = vpop.f32.mrf.mxu0 }
 0x12a   :  { %v2433_v19 = vadd.f32 %v3260_v14, %v2393_v16  ;;  %v3262_v20 = vpop.f32.mrf.mxu1 }
 0x143   :  { %v3280_v21 = vpop.f32.mrf.mxu0 }
 0x144   :  { %v3302_v22 = vpop.f32.mrf.mxu1 }
 0x145   :  { %v3281_v23 = vpop.f32.mrf.mxu0 }
 0x146   :  { %v3282_v24 = vadd.f32 %v3281_v23, %v3280_v21  ;;  %v3303_v25 = vpop.f32.mrf.mxu1 }
 0x147   :  { %v3304_v26 = vadd.f32 %v3303_v25, %v3302_v22  ;;  %v3283_v27 = vpop.f32.mrf.mxu0 }
 0x148   :  { %v2473_v28 = vadd.f32 %v3282_v24, %v2433_v19  ;;  %v3305_v29 = vpop.f32.mrf.mxu1 }
 0x149   :  { %v3284_v30 = vpop.f32.mrf.mxu0 }
 0x14a   :  { %v2513_v31 = vadd.f32 %v3304_v26, %v2473_v28  ;;  %v3306_v32 = vpop.f32.mrf.mxu1 }
 0x163   :  { %v3324_v33 = vpop.f32.mrf.mxu0 }
 0x164   :  { %v3346_v34 = vpop.f32.mrf.mxu1 }
 0x165   :  { %v3325_v35 = vpop.f32.mrf.mxu0 }
 0x166   :  { %v3347_v36 = vpop.f32.mrf.mxu1  ;;  %v3326_v37 = vadd.f32 %v3325_v35, %v3324_v33 }
 0x167   :  { %v3348_v38 = vadd.f32 %v3347_v36, %v3346_v34  ;;  %v3327_v39 = vpop.f32.mrf.mxu0 }
 0x168   :  { %v3349_v40 = vpop.f32.mrf.mxu1  ;;  %v2553_v41 = vadd.f32 %v3326_v37, %v2513_v31 }
 0x169   :  { %v3328_v42 = vpop.f32.mrf.mxu0 }
 0x16a   :  { %v3350_v43 = vpop.f32.mrf.mxu1  ;;  %v2593_v44 = vadd.f32 %v3348_v38, %v2553_v41 }
 0x183   :  { %v3368_v45 = vpop.f32.mrf.mxu0 }
 0x184   :  { %v3390_v46 = vpop.f32.mrf.mxu1 }
 0x185   :  { %v3369_v47 = vpop.f32.mrf.mxu0 }
 0x186   :  { %v3391_v48 = vpop.f32.mrf.mxu1  ;;  %v3370_v61 = vadd.f32 %v3369_v47, %v3368_v45 }
 0x187   :  { %v3371_v49 = vpop.f32.mrf.mxu0  ;;  %v3392_v63 = vadd.f32 %v3391_v48, %v3390_v46 }
 0x188   :  { %v3393_v50 = vpop.f32.mrf.mxu1  ;;  %v2633_v62 = vadd.f32 %v3370_v61, %v2593_v44 }
 0x189   :  { %v3372_v51 = vpop.f32.mrf.mxu0 }
 0x18a   :  { %v3394_v52 = vpop.f32.mrf.mxu1  ;;  %v2673_v1 = vadd.f32 %v3392_v63, %v2633_v62 }
 0x1a3   :  { %v3412_v53 = vpop.f32.mrf.mxu0 }
 0x1a4   :  { %v3434_v54 = vpop.f32.mrf.mxu1 }
 0x1a5   :  { %v3413_v55 = vpop.f32.mrf.mxu0 }
 0x1a6   :  { %v3435_v56 = vpop.f32.mrf.mxu1  ;;  %v3414_v0 = vadd.f32 %v3413_v55, %v3412_v53 }
 0x1a7   :  { %v3415_v57 = vpop.f32.mrf.mxu0  ;;  %v3436_v3 = vadd.f32 %v3435_v56, %v3434_v54 }
 0x1a8   :  { %v3437_v58 = vpop.f32.mrf.mxu1  ;;  %v2713_v2 = vadd.f32 %v3414_v0, %v2673_v1 }
 0x1a9   :  { %v3416_v59 = vpop.f32.mrf.mxu0 }
 0x1aa   :  { %v3438_v60 = vpop.f32.mrf.mxu1  ;;  %v2753_v7 = vadd.f32 %v3436_v3, %v2713_v2 }
 0x1c3   :  { %v3456_v4 = vpop.f32.mrf.mxu0 }
 0x1c4   :  { %v3478_v5 = vpop.f32.mrf.mxu1 }
 0x1c5   :  { %v3457_v6 = vpop.f32.mrf.mxu0 }
 0x1c6   :  { %v3458_v8 = vadd.f32 %v3457_v6, %v3456_v4  ;;  %v3479_v9 = vpop.f32.mrf.mxu1 }
 0x1c7   :  { %v3459_v10 = vpop.f32.mrf.mxu0  ;;  %v3480_v12 = vadd.f32 %v3479_v9, %v3478_v5 }
 0x1c8   :  { %v2793_v11 = vadd.f32 %v3458_v8, %v2753_v7  ;;  %v3481_v13 = vpop.f32.mrf.mxu1 }
 0x1c9   :  { %v3460_v14 = vpop.f32.mrf.mxu0 }
 0x1ca   :  { %v2833_v15 = vadd.f32 %v3480_v12, %v2793_v11  ;;  %v3482_v16 = vpop.f32.mrf.mxu1 }
 0x1cc   :  { %2838 = vst [vmem:[%s4620_s3] sm:$0xff] %v2833_v15 }

</bundles_post_ra>
